<compile_context>
chip_gen: v5e
topology: v5e:2x2
jax: 0.10.0
libtpu: 0.0.40
codegen_flags: <defaults>
</compile_context>

<pallas_src>
import functools

import jax
import jax.numpy as jnp
from jax import lax
from jax.experimental import pallas as pl
from jax.experimental.pallas import tpu as pltpu


def _round_up(x, m):
    return (x + m - 1) // m * m


def _cdiv(a, b):
    return -(-a // b)


def _pick_time_block(T, Bb, Ep, Hp, budget_bytes=12 << 20, max_tc=32):
    """Largest time block (<= max_tc) whose per-step VMEM footprint fits the budget,
    rebalanced so that the amount of front padding is < the number of time blocks."""
    per_step = Bb * 4 * Hp * 4 + 2 * Bb * Ep * 2   # f32 xz scratch + double-buffered bf16 x
    tc_cap = max(1, min(max_tc, budget_bytes // per_step))
    tc0 = max(1, min(tc_cap, T))
    nt = _cdiv(T, tc0)
    tc = _cdiv(T, nt)
    return tc, nt


def _vmem_limit_bytes(Tc, Bb, Ep, Hp):
    x_blk = Tc * Bb * Ep * 2              # bf16 x_emb block
    wx = Ep * 4 * Hp * 2                  # bf16 Wx
    wh = Hp * 4 * Hp * 2                  # bf16 Wh
    bias = 4 * Hp * 4                     # f32 bias
    out = Bb * Hp * 4                     # f32 h output block
    scratch = Tc * Bb * 4 * Hp * 4 + 2 * Bb * Hp * 4
    need = 2 * (x_blk + wx + wh + bias + out) + scratch   # double-buffered pipeline regs
    return int(min(max(need * 3 // 2 + (4 << 20), 32 << 20), 64 << 20))


def lstm_kernel(x_ref, wx_ref, wh_ref, b_ref, h_out_ref, xz_sc, h_sc, c_sc,
                *, pad_t, unroll):
    """One grid step = one (batch block, time block).

    x_ref : (Tc, Bb, Ep) bf16   embedded inputs (time-major block)
    wx_ref: (Ep, 4*Hp)  bf16    input->gate weights [i, f, g, o]
    wh_ref: (Hp, 4*Hp)  bf16    recurrent weights  [i, f, g, o]
    b_ref : (1, 4*Hp)   f32     gate biases
    h_out_ref: (Bb, Hp) f32     final hidden state (written at last time block)
    xz_sc : (Tc, Bb, 4*Hp) f32  blocked x-projection scratch
    h_sc/c_sc: (Bb, Hp) f32     persistent state scratch
    """
    t = pl.program_id(1)
    nt = pl.num_programs(1)

    @pl.when(t == 0)
    def _():
        h_sc[...] = jnp.zeros_like(h_sc)
        c_sc[...] = jnp.zeros_like(c_sc)

    tc, bb, ep = x_ref.shape
    hp = h_sc.shape[-1]

    # Blocked input projection: one (Tc*Bb, Ep) @ (Ep, 4Hp) GEMM, independent of
    # the sequential h chain.  Parked (with bias) in f32 VMEM scratch so the
    # unrolled recurrence does not hold it live in vregs.
    xz = jnp.dot(x_ref[...].reshape(tc * bb, ep), wx_ref[...],
                 preferred_element_type=jnp.float32)
    xz_sc[...] = (xz + b_ref[...]).reshape(tc, bb, 4 * hp)

    wh = wh_ref[...]  # bf16, hoisted out of the inner loop

    def step(tt, carry):
        h, c = carry
        # Gate pre-activations: parked x-projection + recurrent matmul (bf16 MXU,
        # f32 accumulation).
        z = xz_sc[tt] + jnp.dot(h.astype(wh.dtype), wh,
                                preferred_element_type=jnp.float32)
        i_g = jax.nn.sigmoid(z[:, 0 * hp:1 * hp])
        f_g = jax.nn.sigmoid(z[:, 1 * hp:2 * hp])
        g_g = jnp.tanh(z[:, 2 * hp:3 * hp])
        o_g = jax.nn.sigmoid(z[:, 3 * hp:4 * hp])
        c_new = f_g * c + i_g * g_g
        h_new = o_g * jnp.tanh(c_new)
        if pad_t > 0:
            # Front-pad steps live only in the first time block; keep h/c at
            # exactly 0 there (zero x_emb alone is not enough if biases != 0).
            valid = jnp.logical_or(t > 0, tt >= pad_t)
            h_new = jnp.where(valid, h_new, h)
            c_new = jnp.where(valid, c_new, c)
        return h_new, c_new

    h, c = lax.fori_loop(0, tc, step, (h_sc[...], c_sc[...]), unroll=unroll)
    h_sc[...] = h
    c_sc[...] = c

    @pl.when(t == nt - 1)
    def _():
        h_out_ref[...] = h


def lstm_forward(tokens, params):
    """tokens: int32 (B, T). Returns (B, output_dim) float32 (eval-mode forward)."""
    emb = params["embedding"]                                   # (V, E)
    Wxi, Whi, bi = params["Wxi"], params["Whi"], params["bi"]
    Wxf, Whf, bf = params["Wxf"], params["Whf"], params["bf"]
    Wxc, Whc, bc = params["Wxc"], params["Whc"], params["bc"]
    Wxo, Who, bo = params["Wxo"], params["Who"], params["bo"]
    Why, by = params["Why"], params["by"]                       # (H, O), (O,)

    B, T = tokens.shape
    E = emb.shape[1]
    H = Why.shape[0]
    O = Why.shape[1]

    if T == 0:
        # Empty sequence: h stays zero -> out = 0 @ Why + by.
        return jnp.broadcast_to(by[None, :], (B, O)).astype(jnp.float32)

    # --- aligned padded sizes ------------------------------------------------
    Ep = _round_up(E, 128)
    Hp = _round_up(H, 128)
    if B > 128:
        Bb = 128                                  # per-core batch block
        Bp = _round_up(B, Bb)
    else:
        Bp = _round_up(B, 16)                     # 16: bf16 sublane packing
        Bb = Bp
    nb = Bp // Bb

    Tc, nt = _pick_time_block(T, Bb, Ep, Hp)
    T_pad = nt * Tc
    pad_t = T_pad - T                              # padding goes at the FRONT
    unroll = True if Tc <= 16 else 8

    # --- fuse gates [i, f, g, o], zero-pad, cast matmul operands to bf16 ------
    pc = lambda w: jnp.pad(w, ((0, Ep - E), (0, Hp - H)))       # (E,H) -> (Ep,Hp)
    ph = lambda w: jnp.pad(w, ((0, Hp - H), (0, Hp - H)))       # (H,H) -> (Hp,Hp)
    pb = lambda v: jnp.pad(v, (0, Hp - H))
    Wx = jnp.concatenate([pc(Wxi), pc(Wxf), pc(Wxc), pc(Wxo)],
                         axis=1).astype(jnp.bfloat16)           # (Ep, 4Hp)
    Wh = jnp.concatenate([ph(Whi), ph(Whf), ph(Whc), ph(Who)],
                         axis=1).astype(jnp.bfloat16)           # (Hp, 4Hp)
    b = jnp.concatenate([pb(bi), pb(bf), pb(bc), pb(bo)])[None, :]  # (1, 4Hp) f32

    # --- embedded inputs, time-major, front-padded, bf16 ----------------------
    # Padded batch rows use token 0's embedding; their h/c are garbage but
    # bounded (tanh/sigmoid) and are sliced off below.
    tokens_p = jnp.pad(tokens, ((0, Bp - B), (0, 0)))           # (Bp, T)
    x_emb = jnp.take(emb, tokens_p, axis=0)                     # (Bp, T, E)
    x_emb = jnp.transpose(x_emb, (1, 0, 2))                     # (T, Bp, E)
    x_emb = jnp.pad(x_emb, ((pad_t, 0), (0, 0), (0, Ep - E))).astype(jnp.bfloat16)

    # --- sequential recurrence kernel -----------------------------------------
    kernel = functools.partial(lstm_kernel, pad_t=pad_t, unroll=unroll)

    h_pad = pl.pallas_call(
        kernel,
        out_shape=jax.ShapeDtypeStruct((Bp, Hp), jnp.float32),
        grid_spec=pltpu.PrefetchScalarGridSpec(
            num_scalar_prefetch=0,
            grid=(nb, nt),
            in_specs=[
                pl.BlockSpec((Tc, Bb, Ep), lambda bI, tI: (tI, bI, 0)),
                pl.BlockSpec((Ep, 4 * Hp), lambda bI, tI: (0, 0)),
                pl.BlockSpec((Hp, 4 * Hp), lambda bI, tI: (0, 0)),
                pl.BlockSpec((1, 4 * Hp), lambda bI, tI: (0, 0)),
            ],
            out_specs=pl.BlockSpec((Bb, Hp), lambda bI, tI: (bI, 0)),
            scratch_shapes=[
                pltpu.VMEM((Tc, Bb, 4 * Hp), jnp.float32),   # blocked x-projection
                pltpu.VMEM((Bb, Hp), jnp.float32),           # h
                pltpu.VMEM((Bb, Hp), jnp.float32),           # c
            ],
        ),
        compiler_params=pltpu.CompilerParams(
            # batch blocks are independent (megacore on v7x); time is a true
            # recurrence.
            dimension_semantics=("parallel", "arbitrary"),
            vmem_limit_bytes=_vmem_limit_bytes(Tc, Bb, Ep, Hp),
        ),
    )(x_emb, Wx, Wh, b)

    # --- head in the wrapper (f32): Why/by never sit resident in VMEM ---------
    h_final = h_pad[:B, :H]
    # Dropout is identity in eval mode.  TODO(synk): train-mode dropout.
    return h_final @ Why + by


def xavier_uniform(key, shape):
    fan_in, fan_out = shape
    bound = (6.0 / (fan_in + fan_out)) ** 0.5
    return jax.random.uniform(key, shape, jnp.float32, -bound, bound)


def init_params(key, vocab_size, embedding_dim, hidden_dim, output_dim):
    ks = jax.random.split(key, 10)
    emb = jax.random.uniform(ks[0], (vocab_size, embedding_dim), jnp.float32, -0.1, 0.1)
    return {
        "embedding": emb,
        "Wxi": xavier_uniform(ks[1], (embedding_dim, hidden_dim)),
        "Whi": xavier_uniform(ks[2], (hidden_dim, hidden_dim)),
        "bi": jnp.zeros((hidden_dim,), jnp.float32),
        "Wxf": xavier_uniform(ks[3], (embedding_dim, hidden_dim)),
        "Whf": xavier_uniform(ks[4], (hidden_dim, hidden_dim)),
        "bf": jnp.zeros((hidden_dim,), jnp.float32),
        "Wxc": xavier_uniform(ks[5], (embedding_dim, hidden_dim)),
        "Whc": xavier_uniform(ks[6], (hidden_dim, hidden_dim)),
        "bc": jnp.zeros((hidden_dim,), jnp.float32),
        "Wxo": xavier_uniform(ks[7], (embedding_dim, hidden_dim)),
        "Who": xavier_uniform(ks[8], (hidden_dim, hidden_dim)),
        "bo": jnp.zeros((hidden_dim,), jnp.float32),
        "Why": xavier_uniform(ks[9], (hidden_dim, output_dim)),
        "by": jnp.zeros((output_dim,), jnp.float32),
    }


def lstm_reference(tokens, params):
    """Pure-JAX f32 reference matching the PyTorch forward exactly (eval mode)."""
    emb = params["embedding"]
    Wxi, Whi, bi = params["Wxi"], params["Whi"], params["bi"]
    Wxf, Whf, bf = params["Wxf"], params["Whf"], params["bf"]
    Wxc, Whc, bc = params["Wxc"], params["Whc"], params["bc"]
    Wxo, Who, bo = params["Wxo"], params["Who"], params["bo"]
    Why, by = params["Why"], params["by"]
    x_embedded = jnp.take(emb, tokens, axis=0)          # (B, T, E)
    B = tokens.shape[0]
    H = Why.shape[0]
    h = jnp.zeros((B, H), jnp.float32)
    c = jnp.zeros((B, H), jnp.float32)
    for t in range(x_embedded.shape[1]):
        xt = x_embedded[:, t, :]
        i = jax.nn.sigmoid(xt @ Wxi + h @ Whi + bi)
        f = jax.nn.sigmoid(xt @ Wxf + h @ Whf + bf)
        g = jnp.tanh(xt @ Wxc + h @ Whc + bc)
        o = jax.nn.sigmoid(xt @ Wxo + h @ Who + bo)
        c = f * c + i * g
        h = o * jnp.tanh(c)
    return h @ Why + by


if __name__ == "__main__":
    vocab_size, embedding_dim, hidden_dim, output_dim = 64, 32, 32, 8
    batch, seq = 4, 8

    key = jax.random.PRNGKey(0)
    k_params, k_tok = jax.random.split(key)
    params = init_params(k_params, vocab_size, embedding_dim, hidden_dim, output_dim)
    tokens = jax.random.randint(k_tok, (batch, seq), 0, vocab_size, dtype=jnp.int32)

    fwd = jax.jit(lstm_forward)
    out = jax.block_until_ready(fwd(tokens, params))
    ref = lstm_reference(tokens, params)

    assert out.shape == (batch, output_dim)
    # bf16 matmul operands inside the kernel (f32 accumulation/state) => relaxed
    # tolerance vs the all-f32 reference.
    assert jnp.allclose(out, ref, atol=2e-2, rtol=2e-2), "mismatch vs reference"

    print("KERNEL_OK")
</pallas_src>

<mosaic_0001>
module attributes {stable_mosaic.version = 11 : i64} {
  func.func @lstm_kernel(%arg0: i32, %arg1: i32, %arg2: memref<8x16x128xbf16, #tpu.memory_space<vmem>>, %arg3: memref<128x512xbf16, #tpu.memory_space<vmem>>, %arg4: memref<128x512xbf16, #tpu.memory_space<vmem>>, %arg5: memref<1x512xf32, #tpu.memory_space<vmem>>, %arg6: memref<16x128xf32, #tpu.memory_space<vmem>>, %arg7: memref<8x16x512xf32, #tpu.memory_space<vmem>>, %arg8: memref<16x128xf32, #tpu.memory_space<vmem>>, %arg9: memref<16x128xf32, #tpu.memory_space<vmem>>) attributes {dimension_semantics = [#tpu.dimension_semantics<parallel>, #tpu.dimension_semantics<arbitrary>], iteration_bounds = array<i64: 1, 1>, scalar_prefetch = 0 : i64, scratch_operands = 3 : i64, tpu.core_type = #tpu.core_type<tc>, window_params = [{transform_indices = @transform_0, window_bounds = array<i64: 8, 16, 128>}, {pipeline_mode = #tpu.pipeline_mode<synchronous>, transform_indices = @transform_1, window_bounds = array<i64: 128, 512>}, {pipeline_mode = #tpu.pipeline_mode<synchronous>, transform_indices = @transform_2, window_bounds = array<i64: 128, 512>}, {pipeline_mode = #tpu.pipeline_mode<synchronous>, transform_indices = @transform_3, window_bounds = array<i64: 1, 512>}, {transform_indices = @transform_4, window_bounds = array<i64: 16, 128>}]} {
    %c0_i32 = arith.constant 0 : i32
    %0 = arith.cmpi eq, %arg1, %c0_i32 : i32
    %1 = arith.extui %0 : i1 to i32
    %c0_i32_0 = arith.constant 0 : i32
    %2 = arith.cmpi ne, %1, %c0_i32_0 : i32
    scf.if %2 {
      %cst_71 = arith.constant 0.000000e+00 : f32
      %268 = vector.broadcast %cst_71 : f32 to vector<16x128xf32>
      %c0_72 = arith.constant 0 : index
      %c0_73 = arith.constant 0 : index
      %269 = vector.load %arg8[%c0_72, %c0_73] : memref<16x128xf32, #tpu.memory_space<vmem>>, vector<16x128xf32>
      tpu.vector_store %arg8[%c0_72, %c0_73], %268 {strides = array<i32>} : memref<16x128xf32, #tpu.memory_space<vmem>>, vector<16x128xf32>,
      %cst_74 = arith.constant 0.000000e+00 : f32
      %270 = vector.broadcast %cst_74 : f32 to vector<16x128xf32>
      %c0_75 = arith.constant 0 : index
      %c0_76 = arith.constant 0 : index
      %271 = vector.load %arg9[%c0_75, %c0_76] : memref<16x128xf32, #tpu.memory_space<vmem>>, vector<16x128xf32>
      tpu.vector_store %arg9[%c0_75, %c0_76], %270 {strides = array<i32>} : memref<16x128xf32, #tpu.memory_space<vmem>>, vector<16x128xf32>,
    } else {
    }
    %c0 = arith.constant 0 : index
    %c0_1 = arith.constant 0 : index
    %c0_2 = arith.constant 0 : index
    %3 = vector.load %arg2[%c0, %c0_1, %c0_2] : memref<8x16x128xbf16, #tpu.memory_space<vmem>>, vector<8x16x128xbf16>
    %4 = vector.shape_cast %3 : vector<8x16x128xbf16> to vector<128x128xbf16>
    %c0_3 = arith.constant 0 : index
    %c0_4 = arith.constant 0 : index
    %5 = vector.load %arg3[%c0_3, %c0_4] : memref<128x512xbf16, #tpu.memory_space<vmem>>, vector<128x512xbf16>
    %cst = arith.constant dense<0.000000e+00> : vector<128x512xf32>
    %6 = tpu.matmul %4, %5, %cst {dimension_numbers = #tpu.dot_dimension_numbers<[1], [0], [0], [1], [0, 0, 1, 1], [], []>} : vector<128x128xbf16>, vector<128x512xbf16>, vector<128x512xf32> -> vector<128x512xf32>
    %c0_5 = arith.constant 0 : index
    %c0_6 = arith.constant 0 : index
    %7 = vector.load %arg5[%c0_5, %c0_6] : memref<1x512xf32, #tpu.memory_space<vmem>>, vector<1x512xf32>
    %8 = vector.broadcast %7 : vector<1x512xf32> to vector<128x512xf32>
    %9 = arith.addf %6, %8 : vector<128x512xf32>
    %10 = vector.shape_cast %9 : vector<128x512xf32> to vector<8x16x512xf32>
    %c0_7 = arith.constant 0 : index
    %c0_8 = arith.constant 0 : index
    %c0_9 = arith.constant 0 : index
    %11 = vector.load %arg7[%c0_7, %c0_8, %c0_9] : memref<8x16x512xf32, #tpu.memory_space<vmem>>, vector<8x16x512xf32>
    tpu.vector_store %arg7[%c0_7, %c0_8, %c0_9], %10 {strides = array<i32>} : memref<8x16x512xf32, #tpu.memory_space<vmem>>, vector<8x16x512xf32>,
    %c0_10 = arith.constant 0 : index
    %c0_11 = arith.constant 0 : index
    %12 = vector.load %arg4[%c0_10, %c0_11] : memref<128x512xbf16, #tpu.memory_space<vmem>>, vector<128x512xbf16>
    %c0_12 = arith.constant 0 : index
    %c0_13 = arith.constant 0 : index
    %13 = vector.load %arg8[%c0_12, %c0_13] : memref<16x128xf32, #tpu.memory_space<vmem>>, vector<16x128xf32>
    %c0_14 = arith.constant 0 : index
    %c0_15 = arith.constant 0 : index
    %14 = vector.load %arg9[%c0_14, %c0_15] : memref<16x128xf32, #tpu.memory_space<vmem>>, vector<16x128xf32>
    %c0_i32_16 = arith.constant 0 : i32
    %15 = arith.index_cast %c0_i32_16 : i32 to index
    %c0_17 = arith.constant 0 : index
    %c0_18 = arith.constant 0 : index
    %16 = vector.load %arg7[%15, %c0_17, %c0_18] : memref<8x16x512xf32, #tpu.memory_space<vmem>>, vector<1x16x512xf32>
    %17 = vector.shape_cast %16 : vector<1x16x512xf32> to vector<16x512xf32>
    %18 = arith.truncf %13 : vector<16x128xf32> to vector<16x128xbf16>
    %cst_19 = arith.constant dense<0.000000e+00> : vector<16x512xf32>
    %19 = tpu.matmul %18, %12, %cst_19 {dimension_numbers = #tpu.dot_dimension_numbers<[1], [0], [0], [1], [0, 0, 1, 1], [], []>} : vector<16x128xbf16>, vector<128x512xbf16>, vector<16x512xf32> -> vector<16x512xf32>
    %20 = arith.addf %17, %19 : vector<16x512xf32>
    %21 = vector.extract_strided_slice %20 {offsets = [0, 0], sizes = [16, 128], strides = [1, 1]} : vector<16x512xf32> to vector<16x128xf32>
    %22 = arith.negf %21 : vector<16x128xf32>
    %23 = math.exp %22 : vector<16x128xf32>
    %cst_20 = arith.constant 1.000000e+00 : f32
    %24 = vector.broadcast %cst_20 : f32 to vector<16x128xf32>
    %25 = arith.addf %24, %23 : vector<16x128xf32>
    %26 = arith.divf %24, %25 : vector<16x128xf32>
    %27 = vector.extract_strided_slice %20 {offsets = [0, 128], sizes = [16, 128], strides = [1, 1]} : vector<16x512xf32> to vector<16x128xf32>
    %28 = arith.negf %27 : vector<16x128xf32>
    %29 = math.exp %28 : vector<16x128xf32>
    %cst_21 = arith.constant 1.000000e+00 : f32
    %30 = vector.broadcast %cst_21 : f32 to vector<16x128xf32>
    %31 = arith.addf %30, %29 : vector<16x128xf32>
    %32 = arith.divf %30, %31 : vector<16x128xf32>
    %33 = vector.extract_strided_slice %20 {offsets = [0, 256], sizes = [16, 128], strides = [1, 1]} : vector<16x512xf32> to vector<16x128xf32>
    %34 = math.tanh %33 : vector<16x128xf32>
    %35 = vector.extract_strided_slice %20 {offsets = [0, 384], sizes = [16, 128], strides = [1, 1]} : vector<16x512xf32> to vector<16x128xf32>
    %36 = arith.negf %35 : vector<16x128xf32>
    %37 = math.exp %36 : vector<16x128xf32>
    %cst_22 = arith.constant 1.000000e+00 : f32
    %38 = vector.broadcast %cst_22 : f32 to vector<16x128xf32>
    %39 = arith.addf %38, %37 : vector<16x128xf32>
    %40 = arith.divf %38, %39 : vector<16x128xf32>
    %41 = arith.mulf %32, %14 : vector<16x128xf32>
    %42 = arith.mulf %26, %34 : vector<16x128xf32>
    %43 = arith.addf %41, %42 : vector<16x128xf32>
    %44 = math.tanh %43 : vector<16x128xf32>
    %45 = arith.mulf %40, %44 : vector<16x128xf32>
    %c1_i32 = arith.constant 1 : i32
    %46 = arith.index_cast %c1_i32 : i32 to index
    %c0_23 = arith.constant 0 : index
    %c0_24 = arith.constant 0 : index
    %47 = vector.load %arg7[%46, %c0_23, %c0_24] : memref<8x16x512xf32, #tpu.memory_space<vmem>>, vector<1x16x512xf32>
    %48 = vector.shape_cast %47 : vector<1x16x512xf32> to vector<16x512xf32>
    %49 = arith.truncf %45 : vector<16x128xf32> to vector<16x128xbf16>
    %cst_25 = arith.constant dense<0.000000e+00> : vector<16x512xf32>
    %50 = tpu.matmul %49, %12, %cst_25 {dimension_numbers = #tpu.dot_dimension_numbers<[1], [0], [0], [1], [0, 0, 1, 1], [], []>} : vector<16x128xbf16>, vector<128x512xbf16>, vector<16x512xf32> -> vector<16x512xf32>
    %51 = arith.addf %48, %50 : vector<16x512xf32>
    %52 = vector.extract_strided_slice %51 {offsets = [0, 0], sizes = [16, 128], strides = [1, 1]} : vector<16x512xf32> to vector<16x128xf32>
    %53 = arith.negf %52 : vector<16x128xf32>
    %54 = math.exp %53 : vector<16x128xf32>
    %cst_26 = arith.constant 1.000000e+00 : f32
    %55 = vector.broadcast %cst_26 : f32 to vector<16x128xf32>
    %56 = arith.addf %55, %54 : vector<16x128xf32>
    %57 = arith.divf %55, %56 : vector<16x128xf32>
    %58 = vector.extract_strided_slice %51 {offsets = [0, 128], sizes = [16, 128], strides = [1, 1]} : vector<16x512xf32> to vector<16x128xf32>
    %59 = arith.negf %58 : vector<16x128xf32>
    %60 = math.exp %59 : vector<16x128xf32>
    %cst_27 = arith.constant 1.000000e+00 : f32
    %61 = vector.broadcast %cst_27 : f32 to vector<16x128xf32>
    %62 = arith.addf %61, %60 : vector<16x128xf32>
    %63 = arith.divf %61, %62 : vector<16x128xf32>
    %64 = vector.extract_strided_slice %51 {offsets = [0, 256], sizes = [16, 128], strides = [1, 1]} : vector<16x512xf32> to vector<16x128xf32>
    %65 = math.tanh %64 : vector<16x128xf32>
    %66 = vector.extract_strided_slice %51 {offsets = [0, 384], sizes = [16, 128], strides = [1, 1]} : vector<16x512xf32> to vector<16x128xf32>
    %67 = arith.negf %66 : vector<16x128xf32>
    %68 = math.exp %67 : vector<16x128xf32>
    %cst_28 = arith.constant 1.000000e+00 : f32
    %69 = vector.broadcast %cst_28 : f32 to vector<16x128xf32>
    %70 = arith.addf %69, %68 : vector<16x128xf32>
    %71 = arith.divf %69, %70 : vector<16x128xf32>
    %72 = arith.mulf %63, %43 : vector<16x128xf32>
    %73 = arith.mulf %57, %65 : vector<16x128xf32>
    %74 = arith.addf %72, %73 : vector<16x128xf32>
    %75 = math.tanh %74 : vector<16x128xf32>
    %76 = arith.mulf %71, %75 : vector<16x128xf32>
    %c2_i32 = arith.constant 2 : i32
    %77 = arith.index_cast %c2_i32 : i32 to index
    %c0_29 = arith.constant 0 : index
    %c0_30 = arith.constant 0 : index
    %78 = vector.load %arg7[%77, %c0_29, %c0_30] : memref<8x16x512xf32, #tpu.memory_space<vmem>>, vector<1x16x512xf32>
    %79 = vector.shape_cast %78 : vector<1x16x512xf32> to vector<16x512xf32>
    %80 = arith.truncf %76 : vector<16x128xf32> to vector<16x128xbf16>
    %cst_31 = arith.constant dense<0.000000e+00> : vector<16x512xf32>
    %81 = tpu.matmul %80, %12, %cst_31 {dimension_numbers = #tpu.dot_dimension_numbers<[1], [0], [0], [1], [0, 0, 1, 1], [], []>} : vector<16x128xbf16>, vector<128x512xbf16>, vector<16x512xf32> -> vector<16x512xf32>
    %82 = arith.addf %79, %81 : vector<16x512xf32>
    %83 = vector.extract_strided_slice %82 {offsets = [0, 0], sizes = [16, 128], strides = [1, 1]} : vector<16x512xf32> to vector<16x128xf32>
    %84 = arith.negf %83 : vector<16x128xf32>
    %85 = math.exp %84 : vector<16x128xf32>
    %cst_32 = arith.constant 1.000000e+00 : f32
    %86 = vector.broadcast %cst_32 : f32 to vector<16x128xf32>
    %87 = arith.addf %86, %85 : vector<16x128xf32>
    %88 = arith.divf %86, %87 : vector<16x128xf32>
    %89 = vector.extract_strided_slice %82 {offsets = [0, 128], sizes = [16, 128], strides = [1, 1]} : vector<16x512xf32> to vector<16x128xf32>
    %90 = arith.negf %89 : vector<16x128xf32>
    %91 = math.exp %90 : vector<16x128xf32>
    %cst_33 = arith.constant 1.000000e+00 : f32
    %92 = vector.broadcast %cst_33 : f32 to vector<16x128xf32>
    %93 = arith.addf %92, %91 : vector<16x128xf32>
    %94 = arith.divf %92, %93 : vector<16x128xf32>
    %95 = vector.extract_strided_slice %82 {offsets = [0, 256], sizes = [16, 128], strides = [1, 1]} : vector<16x512xf32> to vector<16x128xf32>
    %96 = math.tanh %95 : vector<16x128xf32>
    %97 = vector.extract_strided_slice %82 {offsets = [0, 384], sizes = [16, 128], strides = [1, 1]} : vector<16x512xf32> to vector<16x128xf32>
    %98 = arith.negf %97 : vector<16x128xf32>
    %99 = math.exp %98 : vector<16x128xf32>
    %cst_34 = arith.constant 1.000000e+00 : f32
    %100 = vector.broadcast %cst_34 : f32 to vector<16x128xf32>
    %101 = arith.addf %100, %99 : vector<16x128xf32>
    %102 = arith.divf %100, %101 : vector<16x128xf32>
    %103 = arith.mulf %94, %74 : vector<16x128xf32>
    %104 = arith.mulf %88, %96 : vector<16x128xf32>
    %105 = arith.addf %103, %104 : vector<16x128xf32>
    %106 = math.tanh %105 : vector<16x128xf32>
    %107 = arith.mulf %102, %106 : vector<16x128xf32>
    %c3_i32 = arith.constant 3 : i32
    %108 = arith.index_cast %c3_i32 : i32 to index
    %c0_35 = arith.constant 0 : index
    %c0_36 = arith.constant 0 : index
    %109 = vector.load %arg7[%108, %c0_35, %c0_36] : memref<8x16x512xf32, #tpu.memory_space<vmem>>, vector<1x16x512xf32>
    %110 = vector.shape_cast %109 : vector<1x16x512xf32> to vector<16x512xf32>
    %111 = arith.truncf %107 : vector<16x128xf32> to vector<16x128xbf16>
    %cst_37 = arith.constant dense<0.000000e+00> : vector<16x512xf32>
    %112 = tpu.matmul %111, %12, %cst_37 {dimension_numbers = #tpu.dot_dimension_numbers<[1], [0], [0], [1], [0, 0, 1, 1], [], []>} : vector<16x128xbf16>, vector<128x512xbf16>, vector<16x512xf32> -> vector<16x512xf32>
    %113 = arith.addf %110, %112 : vector<16x512xf32>
    %114 = vector.extract_strided_slice %113 {offsets = [0, 0], sizes = [16, 128], strides = [1, 1]} : vector<16x512xf32> to vector<16x128xf32>
    %115 = arith.negf %114 : vector<16x128xf32>
    %116 = math.exp %115 : vector<16x128xf32>
    %cst_38 = arith.constant 1.000000e+00 : f32
    %117 = vector.broadcast %cst_38 : f32 to vector<16x128xf32>
    %118 = arith.addf %117, %116 : vector<16x128xf32>
    %119 = arith.divf %117, %118 : vector<16x128xf32>
    %120 = vector.extract_strided_slice %113 {offsets = [0, 128], sizes = [16, 128], strides = [1, 1]} : vector<16x512xf32> to vector<16x128xf32>
    %121 = arith.negf %120 : vector<16x128xf32>
    %122 = math.exp %121 : vector<16x128xf32>
    %cst_39 = arith.constant 1.000000e+00 : f32
    %123 = vector.broadcast %cst_39 : f32 to vector<16x128xf32>
    %124 = arith.addf %123, %122 : vector<16x128xf32>
    %125 = arith.divf %123, %124 : vector<16x128xf32>
    %126 = vector.extract_strided_slice %113 {offsets = [0, 256], sizes = [16, 128], strides = [1, 1]} : vector<16x512xf32> to vector<16x128xf32>
    %127 = math.tanh %126 : vector<16x128xf32>
    %128 = vector.extract_strided_slice %113 {offsets = [0, 384], sizes = [16, 128], strides = [1, 1]} : vector<16x512xf32> to vector<16x128xf32>
    %129 = arith.negf %128 : vector<16x128xf32>
    %130 = math.exp %129 : vector<16x128xf32>
    %cst_40 = arith.constant 1.000000e+00 : f32
    %131 = vector.broadcast %cst_40 : f32 to vector<16x128xf32>
    %132 = arith.addf %131, %130 : vector<16x128xf32>
    %133 = arith.divf %131, %132 : vector<16x128xf32>
    %134 = arith.mulf %125, %105 : vector<16x128xf32>
    %135 = arith.mulf %119, %127 : vector<16x128xf32>
    %136 = arith.addf %134, %135 : vector<16x128xf32>
    %137 = math.tanh %136 : vector<16x128xf32>
    %138 = arith.mulf %133, %137 : vector<16x128xf32>
    %c4_i32 = arith.constant 4 : i32
    %139 = arith.index_cast %c4_i32 : i32 to index
    %c0_41 = arith.constant 0 : index
    %c0_42 = arith.constant 0 : index
    %140 = vector.load %arg7[%139, %c0_41, %c0_42] : memref<8x16x512xf32, #tpu.memory_space<vmem>>, vector<1x16x512xf32>
    %141 = vector.shape_cast %140 : vector<1x16x512xf32> to vector<16x512xf32>
    %142 = arith.truncf %138 : vector<16x128xf32> to vector<16x128xbf16>
    %cst_43 = arith.constant dense<0.000000e+00> : vector<16x512xf32>
    %143 = tpu.matmul %142, %12, %cst_43 {dimension_numbers = #tpu.dot_dimension_numbers<[1], [0], [0], [1], [0, 0, 1, 1], [], []>} : vector<16x128xbf16>, vector<128x512xbf16>, vector<16x512xf32> -> vector<16x512xf32>
    %144 = arith.addf %141, %143 : vector<16x512xf32>
    %145 = vector.extract_strided_slice %144 {offsets = [0, 0], sizes = [16, 128], strides = [1, 1]} : vector<16x512xf32> to vector<16x128xf32>
    %146 = arith.negf %145 : vector<16x128xf32>
    %147 = math.exp %146 : vector<16x128xf32>
    %cst_44 = arith.constant 1.000000e+00 : f32
    %148 = vector.broadcast %cst_44 : f32 to vector<16x128xf32>
    %149 = arith.addf %148, %147 : vector<16x128xf32>
    %150 = arith.divf %148, %149 : vector<16x128xf32>
    %151 = vector.extract_strided_slice %144 {offsets = [0, 128], sizes = [16, 128], strides = [1, 1]} : vector<16x512xf32> to vector<16x128xf32>
    %152 = arith.negf %151 : vector<16x128xf32>
    %153 = math.exp %152 : vector<16x128xf32>
    %cst_45 = arith.constant 1.000000e+00 : f32
    %154 = vector.broadcast %cst_45 : f32 to vector<16x128xf32>
    %155 = arith.addf %154, %153 : vector<16x128xf32>
    %156 = arith.divf %154, %155 : vector<16x128xf32>
    %157 = vector.extract_strided_slice %144 {offsets = [0, 256], sizes = [16, 128], strides = [1, 1]} : vector<16x512xf32> to vector<16x128xf32>
    %158 = math.tanh %157 : vector<16x128xf32>
    %159 = vector.extract_strided_slice %144 {offsets = [0, 384], sizes = [16, 128], strides = [1, 1]} : vector<16x512xf32> to vector<16x128xf32>
    %160 = arith.negf %159 : vector<16x128xf32>
    %161 = math.exp %160 : vector<16x128xf32>
    %cst_46 = arith.constant 1.000000e+00 : f32
    %162 = vector.broadcast %cst_46 : f32 to vector<16x128xf32>
    %163 = arith.addf %162, %161 : vector<16x128xf32>
    %164 = arith.divf %162, %163 : vector<16x128xf32>
    %165 = arith.mulf %156, %136 : vector<16x128xf32>
    %166 = arith.mulf %150, %158 : vector<16x128xf32>
    %167 = arith.addf %165, %166 : vector<16x128xf32>
    %168 = math.tanh %167 : vector<16x128xf32>
    %169 = arith.mulf %164, %168 : vector<16x128xf32>
    %c5_i32 = arith.constant 5 : i32
    %170 = arith.index_cast %c5_i32 : i32 to index
    %c0_47 = arith.constant 0 : index
    %c0_48 = arith.constant 0 : index
    %171 = vector.load %arg7[%170, %c0_47, %c0_48] : memref<8x16x512xf32, #tpu.memory_space<vmem>>, vector<1x16x512xf32>
    %172 = vector.shape_cast %171 : vector<1x16x512xf32> to vector<16x512xf32>
    %173 = arith.truncf %169 : vector<16x128xf32> to vector<16x128xbf16>
    %cst_49 = arith.constant dense<0.000000e+00> : vector<16x512xf32>
    %174 = tpu.matmul %173, %12, %cst_49 {dimension_numbers = #tpu.dot_dimension_numbers<[1], [0], [0], [1], [0, 0, 1, 1], [], []>} : vector<16x128xbf16>, vector<128x512xbf16>, vector<16x512xf32> -> vector<16x512xf32>
    %175 = arith.addf %172, %174 : vector<16x512xf32>
    %176 = vector.extract_strided_slice %175 {offsets = [0, 0], sizes = [16, 128], strides = [1, 1]} : vector<16x512xf32> to vector<16x128xf32>
    %177 = arith.negf %176 : vector<16x128xf32>
    %178 = math.exp %177 : vector<16x128xf32>
    %cst_50 = arith.constant 1.000000e+00 : f32
    %179 = vector.broadcast %cst_50 : f32 to vector<16x128xf32>
    %180 = arith.addf %179, %178 : vector<16x128xf32>
    %181 = arith.divf %179, %180 : vector<16x128xf32>
    %182 = vector.extract_strided_slice %175 {offsets = [0, 128], sizes = [16, 128], strides = [1, 1]} : vector<16x512xf32> to vector<16x128xf32>
    %183 = arith.negf %182 : vector<16x128xf32>
    %184 = math.exp %183 : vector<16x128xf32>
    %cst_51 = arith.constant 1.000000e+00 : f32
    %185 = vector.broadcast %cst_51 : f32 to vector<16x128xf32>
    %186 = arith.addf %185, %184 : vector<16x128xf32>
    %187 = arith.divf %185, %186 : vector<16x128xf32>
    %188 = vector.extract_strided_slice %175 {offsets = [0, 256], sizes = [16, 128], strides = [1, 1]} : vector<16x512xf32> to vector<16x128xf32>
    %189 = math.tanh %188 : vector<16x128xf32>
    %190 = vector.extract_strided_slice %175 {offsets = [0, 384], sizes = [16, 128], strides = [1, 1]} : vector<16x512xf32> to vector<16x128xf32>
    %191 = arith.negf %190 : vector<16x128xf32>
    %192 = math.exp %191 : vector<16x128xf32>
    %cst_52 = arith.constant 1.000000e+00 : f32
    %193 = vector.broadcast %cst_52 : f32 to vector<16x128xf32>
    %194 = arith.addf %193, %192 : vector<16x128xf32>
    %195 = arith.divf %193, %194 : vector<16x128xf32>
    %196 = arith.mulf %187, %167 : vector<16x128xf32>
    %197 = arith.mulf %181, %189 : vector<16x128xf32>
    %198 = arith.addf %196, %197 : vector<16x128xf32>
    %199 = math.tanh %198 : vector<16x128xf32>
    %200 = arith.mulf %195, %199 : vector<16x128xf32>
    %c6_i32 = arith.constant 6 : i32
    %201 = arith.index_cast %c6_i32 : i32 to index
    %c0_53 = arith.constant 0 : index
    %c0_54 = arith.constant 0 : index
    %202 = vector.load %arg7[%201, %c0_53, %c0_54] : memref<8x16x512xf32, #tpu.memory_space<vmem>>, vector<1x16x512xf32>
    %203 = vector.shape_cast %202 : vector<1x16x512xf32> to vector<16x512xf32>
    %204 = arith.truncf %200 : vector<16x128xf32> to vector<16x128xbf16>
    %cst_55 = arith.constant dense<0.000000e+00> : vector<16x512xf32>
    %205 = tpu.matmul %204, %12, %cst_55 {dimension_numbers = #tpu.dot_dimension_numbers<[1], [0], [0], [1], [0, 0, 1, 1], [], []>} : vector<16x128xbf16>, vector<128x512xbf16>, vector<16x512xf32> -> vector<16x512xf32>
    %206 = arith.addf %203, %205 : vector<16x512xf32>
    %207 = vector.extract_strided_slice %206 {offsets = [0, 0], sizes = [16, 128], strides = [1, 1]} : vector<16x512xf32> to vector<16x128xf32>
    %208 = arith.negf %207 : vector<16x128xf32>
    %209 = math.exp %208 : vector<16x128xf32>
    %cst_56 = arith.constant 1.000000e+00 : f32
    %210 = vector.broadcast %cst_56 : f32 to vector<16x128xf32>
    %211 = arith.addf %210, %209 : vector<16x128xf32>
    %212 = arith.divf %210, %211 : vector<16x128xf32>
    %213 = vector.extract_strided_slice %206 {offsets = [0, 128], sizes = [16, 128], strides = [1, 1]} : vector<16x512xf32> to vector<16x128xf32>
    %214 = arith.negf %213 : vector<16x128xf32>
    %215 = math.exp %214 : vector<16x128xf32>
    %cst_57 = arith.constant 1.000000e+00 : f32
    %216 = vector.broadcast %cst_57 : f32 to vector<16x128xf32>
    %217 = arith.addf %216, %215 : vector<16x128xf32>
    %218 = arith.divf %216, %217 : vector<16x128xf32>
    %219 = vector.extract_strided_slice %206 {offsets = [0, 256], sizes = [16, 128], strides = [1, 1]} : vector<16x512xf32> to vector<16x128xf32>
    %220 = math.tanh %219 : vector<16x128xf32>
    %221 = vector.extract_strided_slice %206 {offsets = [0, 384], sizes = [16, 128], strides = [1, 1]} : vector<16x512xf32> to vector<16x128xf32>
    %222 = arith.negf %221 : vector<16x128xf32>
    %223 = math.exp %222 : vector<16x128xf32>
    %cst_58 = arith.constant 1.000000e+00 : f32
    %224 = vector.broadcast %cst_58 : f32 to vector<16x128xf32>
    %225 = arith.addf %224, %223 : vector<16x128xf32>
    %226 = arith.divf %224, %225 : vector<16x128xf32>
    %227 = arith.mulf %218, %198 : vector<16x128xf32>
    %228 = arith.mulf %212, %220 : vector<16x128xf32>
    %229 = arith.addf %227, %228 : vector<16x128xf32>
    %230 = math.tanh %229 : vector<16x128xf32>
    %231 = arith.mulf %226, %230 : vector<16x128xf32>
    %c7_i32 = arith.constant 7 : i32
    %232 = arith.index_cast %c7_i32 : i32 to index
    %c0_59 = arith.constant 0 : index
    %c0_60 = arith.constant 0 : index
    %233 = vector.load %arg7[%232, %c0_59, %c0_60] : memref<8x16x512xf32, #tpu.memory_space<vmem>>, vector<1x16x512xf32>
    %234 = vector.shape_cast %233 : vector<1x16x512xf32> to vector<16x512xf32>
    %235 = arith.truncf %231 : vector<16x128xf32> to vector<16x128xbf16>
    %cst_61 = arith.constant dense<0.000000e+00> : vector<16x512xf32>
    %236 = tpu.matmul %235, %12, %cst_61 {dimension_numbers = #tpu.dot_dimension_numbers<[1], [0], [0], [1], [0, 0, 1, 1], [], []>} : vector<16x128xbf16>, vector<128x512xbf16>, vector<16x512xf32> -> vector<16x512xf32>
    %237 = arith.addf %234, %236 : vector<16x512xf32>
    %238 = vector.extract_strided_slice %237 {offsets = [0, 0], sizes = [16, 128], strides = [1, 1]} : vector<16x512xf32> to vector<16x128xf32>
    %239 = arith.negf %238 : vector<16x128xf32>
    %240 = math.exp %239 : vector<16x128xf32>
    %cst_62 = arith.constant 1.000000e+00 : f32
    %241 = vector.broadcast %cst_62 : f32 to vector<16x128xf32>
    %242 = arith.addf %241, %240 : vector<16x128xf32>
    %243 = arith.divf %241, %242 : vector<16x128xf32>
    %244 = vector.extract_strided_slice %237 {offsets = [0, 128], sizes = [16, 128], strides = [1, 1]} : vector<16x512xf32> to vector<16x128xf32>
    %245 = arith.negf %244 : vector<16x128xf32>
    %246 = math.exp %245 : vector<16x128xf32>
    %cst_63 = arith.constant 1.000000e+00 : f32
    %247 = vector.broadcast %cst_63 : f32 to vector<16x128xf32>
    %248 = arith.addf %247, %246 : vector<16x128xf32>
    %249 = arith.divf %247, %248 : vector<16x128xf32>
    %250 = vector.extract_strided_slice %237 {offsets = [0, 256], sizes = [16, 128], strides = [1, 1]} : vector<16x512xf32> to vector<16x128xf32>
    %251 = math.tanh %250 : vector<16x128xf32>
    %252 = vector.extract_strided_slice %237 {offsets = [0, 384], sizes = [16, 128], strides = [1, 1]} : vector<16x512xf32> to vector<16x128xf32>
    %253 = arith.negf %252 : vector<16x128xf32>
    %254 = math.exp %253 : vector<16x128xf32>
    %cst_64 = arith.constant 1.000000e+00 : f32
    %255 = vector.broadcast %cst_64 : f32 to vector<16x128xf32>
    %256 = arith.addf %255, %254 : vector<16x128xf32>
    %257 = arith.divf %255, %256 : vector<16x128xf32>
    %258 = arith.mulf %249, %229 : vector<16x128xf32>
    %259 = arith.mulf %243, %251 : vector<16x128xf32>
    %260 = arith.addf %258, %259 : vector<16x128xf32>
    %261 = math.tanh %260 : vector<16x128xf32>
    %262 = arith.mulf %257, %261 : vector<16x128xf32>
    %c8_i32 = arith.constant 8 : i32
    %c0_65 = arith.constant 0 : index
    %c0_66 = arith.constant 0 : index
    %263 = vector.load %arg8[%c0_65, %c0_66] : memref<16x128xf32, #tpu.memory_space<vmem>>, vector<16x128xf32>
    tpu.vector_store %arg8[%c0_65, %c0_66], %262 {strides = array<i32>} : memref<16x128xf32, #tpu.memory_space<vmem>>, vector<16x128xf32>,
    %c0_67 = arith.constant 0 : index
    %c0_68 = arith.constant 0 : index
    %264 = vector.load %arg9[%c0_67, %c0_68] : memref<16x128xf32, #tpu.memory_space<vmem>>, vector<16x128xf32>
    tpu.vector_store %arg9[%c0_67, %c0_68], %260 {strides = array<i32>} : memref<16x128xf32, #tpu.memory_space<vmem>>, vector<16x128xf32>,
    %c0_i32_69 = arith.constant 0 : i32
    %265 = arith.cmpi eq, %arg1, %c0_i32_69 : i32
    %266 = arith.extui %265 : i1 to i32
    %c0_i32_70 = arith.constant 0 : i32
    %267 = arith.cmpi ne, %266, %c0_i32_70 : i32
    scf.if %267 {
      %c0_71 = arith.constant 0 : index
      %c0_72 = arith.constant 0 : index
      %268 = vector.load %arg6[%c0_71, %c0_72] : memref<16x128xf32, #tpu.memory_space<vmem>>, vector<16x128xf32>
      tpu.vector_store %arg6[%c0_71, %c0_72], %262 {strides = array<i32>} : memref<16x128xf32, #tpu.memory_space<vmem>>, vector<16x128xf32>,
    } else {
    }
    return
  }
  func.func @transform_0(%arg0: i32, %arg1: i32) -> (i32, i32, i32) {
    %c0_i32 = arith.constant 0 : i32
    %c0_i32_0 = arith.constant 0 : i32
    return %arg1, %arg0, %c0_i32 : i32, i32, i32
  }
  func.func @transform_1(%arg0: i32, %arg1: i32) -> (i32, i32) {
    %c0_i32 = arith.constant 0 : i32
    %c0_i32_0 = arith.constant 0 : i32
    %c0_i32_1 = arith.constant 0 : i32
    return %c0_i32, %c0_i32_0 : i32, i32
  }
  func.func @transform_2(%arg0: i32, %arg1: i32) -> (i32, i32) {
    %c0_i32 = arith.constant 0 : i32
    %c0_i32_0 = arith.constant 0 : i32
    %c0_i32_1 = arith.constant 0 : i32
    return %c0_i32, %c0_i32_0 : i32, i32
  }
  func.func @transform_3(%arg0: i32, %arg1: i32) -> (i32, i32) {
    %c0_i32 = arith.constant 0 : i32
    %c0_i32_0 = arith.constant 0 : i32
    %c0_i32_1 = arith.constant 0 : i32
    return %c0_i32, %c0_i32_0 : i32, i32
  }
  func.func @transform_4(%arg0: i32, %arg1: i32) -> (i32, i32) {
    %c0_i32 = arith.constant 0 : i32
    %c0_i32_0 = arith.constant 0 : i32
    return %arg0, %c0_i32 : i32, i32
  }
}

</mosaic_0001>

<bundles_post_ra>
// kernel: lstm_forward.1
= control target key start
LH: loop header
LB: loop body
LE: loop exit
PB: predicated region body
PF: predicated region fallthrough
CT: control target
= control target key end

     0   :  { %s4347_s1 = inlined_call_operand.vmem [shape: bf16[128,512], index: 1, kind: input, shape index: {}]   ;;  %s4348_s2 = inlined_call_operand.vmem [shape: bf16[128,512], index: 2, kind: input, shape index: {}]   ;;  %s4349_s0 = inlined_call_operand.vmem [shape: bf16[8,16,128], index: 0, kind: input, shape index: {}]   ;;  %s4350_s3 = inlined_call_operand.vmem [shape: f32[1,512], index: 3, kind: input, shape index: {}]   ;;  %s4351_s4 = inlined_call_operand.vmem [shape: f32[16,128], index: 4, kind: output, shape index: {}]  }
   0x1   :  { %v2505_v0 = vld [vmem:[%s4347_s1 + $0xe0] sm:$0xf]  ;;  %v2733_v1 = vld [vmem:[%s4347_s1 + $0xec] sm:$0xf0]  ;;  %v2731_v2 = vld [vmem:[%s4347_s1 + $0xe4] sm:$0xf] }
   0x2   :  { %v2506_v3 = vor.u32 %v2733_v1, %v2505_v0  ;;  %v2507_v4 = vld [vmem:[%s4347_s1 + $0xf0] sm:$0xf0]  ;;  %v2513_v5 = vld [vmem:[%s4347_s1 + $0xe8] sm:$0xf]  ;;  %v2734_v6 = vld [vmem:[%s4347_s1 + $0xf4] sm:$0xf0] }
   0x3   :  { %v2510_v7 = vor.u32 %v2731_v2, %v2507_v4  ;;  %v2514_v8 = vor.u32 %v2734_v6, %v2513_v5  ;;  %v2732_v9 = vld [vmem:[%s4347_s1 + $0xec] sm:$0xf]  ;;  %v2515_v10 = vld [vmem:[%s4347_s1 + $0xf8] sm:$0xf0]  ;;  %v2489_v11 = vld [vmem:[%s4347_s1 + $0xc0] sm:$0xf] }
   0x4   :  { %291 = vmatpush.bf16.msra.mxu0 %v2506_v3  ;;  %v2518_v12 = vor.u32 %v2732_v9, %v2515_v10  ;;  %v2729_v13 = vld [vmem:[%s4347_s1 + $0xcc] sm:$0xf0]  ;;  %v2727_v14 = vld [vmem:[%s4347_s1 + $0xc4] sm:$0xf]  ;;  %v2491_v15 = vld [vmem:[%s4347_s1 + $0xd0] sm:$0xf0] }
   0x5   :  { %340 = vmatpush.bf16.msra.mxu1 %v2510_v7  ;;  %389 = vmatpush.bf16.msra.mxu2 %v2514_v8  ;;  %v2490_v16 = vor.u32 %v2729_v13, %v2489_v11  ;;  %v2494_v17 = vor.u32 %v2727_v14, %v2491_v15  ;;  %v2497_v18 = vld [vmem:[%s4347_s1 + $0xc8] sm:$0xf]  ;;  %v2730_v19 = vld [vmem:[%s4347_s1 + $0xd4] sm:$0xf0]  ;;  %v2728_v20 = vld [vmem:[%s4347_s1 + $0xcc] sm:$0xf] }
   0x6   :  { %438 = vmatpush.bf16.msra.mxu3 %v2518_v12  ;;  %v2498_v21 = vor.u32 %v2730_v19, %v2497_v18  ;;  %v2499_v22 = vld [vmem:[%s4347_s1 + $0xd8] sm:$0xf0]  ;;  %v2473_v23 = vld [vmem:[%s4347_s1 + $0xa0] sm:$0xf]  ;;  %v2725_v24 = vld [vmem:[%s4347_s1 + $0xac] sm:$0xf0] }
   0x7   :  { %v2502_v25 = vor.u32 %v2728_v20, %v2499_v22  ;;  %v2723_v26 = vld [vmem:[%s4347_s1 + $0xa4] sm:$0xf]  ;;  %v2475_v27 = vld [vmem:[%s4347_s1 + $0xb0] sm:$0xf0]  ;;  %v2481_v28 = vld [vmem:[%s4347_s1 + $0xa8] sm:$0xf]  ;;  %v2474_v29 = vor.u32 %v2725_v24, %v2473_v23 }
   0x8   :  { %292 = vmatpush.bf16.msra.mxu0 %v2490_v16  ;;  %v2726_v30 = vld [vmem:[%s4347_s1 + $0xb4] sm:$0xf0]  ;;  %v2724_v31 = vld [vmem:[%s4347_s1 + $0xac] sm:$0xf]  ;;  %v2483_v32 = vld [vmem:[%s4347_s1 + $0xb8] sm:$0xf0]  ;;  %v2478_v33 = vor.u32 %v2723_v26, %v2475_v27 }
   0x9   :  { %341 = vmatpush.bf16.msra.mxu1 %v2494_v17  ;;  %390 = vmatpush.bf16.msra.mxu2 %v2498_v21  ;;  %v2482_v34 = vor.u32 %v2726_v30, %v2481_v28  ;;  %v2457_v35 = vld [vmem:[%s4347_s1 + $0x80] sm:$0xf]  ;;  %v2721_v36 = vld [vmem:[%s4347_s1 + $0x8c] sm:$0xf0]  ;;  %v2719_v37 = vld [vmem:[%s4347_s1 + $0x84] sm:$0xf]  ;;  %v2486_v38 = vor.u32 %v2724_v31, %v2483_v32 }
   0xa   :  { %439 = vmatpush.bf16.msra.mxu3 %v2502_v25  ;;  %v2459_v39 = vld [vmem:[%s4347_s1 + $0x90] sm:$0xf0]  ;;  %v2465_v40 = vld [vmem:[%s4347_s1 + $0x88] sm:$0xf]  ;;  %v2722_v41 = vld [vmem:[%s4347_s1 + $0x94] sm:$0xf0]  ;;  %v2458_v44 = vor.u32 %v2721_v36, %v2457_v35 }
   0xb   :  { %v2720_v42 = vld [vmem:[%s4347_s1 + $0x8c] sm:$0xf]  ;;  %v2467_v43 = vld [vmem:[%s4347_s1 + $0x98] sm:$0xf0]  ;;  %v2462_v45 = vor.u32 %v2719_v37, %v2459_v39  ;;  %v2466_v46 = vor.u32 %v2722_v41, %v2465_v40  ;;  %v2441_v47 = vld [vmem:[%s4347_s1 + $0x60] sm:$0xf] }
   0xc   :  { %293 = vmatpush.bf16.msra.mxu0 %v2474_v29  ;;  %v2717_v48 = vld [vmem:[%s4347_s1 + $0x6c] sm:$0xf0]  ;;  %v2715_v49 = vld [vmem:[%s4347_s1 + $0x64] sm:$0xf]  ;;  %v2470_v50 = vor.u32 %v2720_v42, %v2467_v43  ;;  %v2443_v51 = vld [vmem:[%s4347_s1 + $0x70] sm:$0xf0] }
   0xd   :  { %342 = vmatpush.bf16.msra.mxu1 %v2478_v33  ;;  %391 = vmatpush.bf16.msra.mxu2 %v2482_v34  ;;  %v2449_v52 = vld [vmem:[%s4347_s1 + $0x68] sm:$0xf]  ;;  %v2718_v53 = vld [vmem:[%s4347_s1 + $0x74] sm:$0xf0]  ;;  %v2716_v54 = vld [vmem:[%s4347_s1 + $0x6c] sm:$0xf]  ;;  %v2442_v56 = vor.u32 %v2717_v48, %v2441_v47  ;;  %v2446_v57 = vor.u32 %v2715_v49, %v2443_v51 }
   0xe   :  { %440 = vmatpush.bf16.msra.mxu3 %v2486_v38  ;;  %v2451_v55 = vld [vmem:[%s4347_s1 + $0x78] sm:$0xf0]  ;;  %v2450_v58 = vor.u32 %v2718_v53, %v2449_v52  ;;  %v2425_v59 = vld [vmem:[%s4347_s1 + $0x40] sm:$0xf]  ;;  %v2713_v60 = vld [vmem:[%s4347_s1 + $0x4c] sm:$0xf0] }
   0xf   :  { %v2711_v61 = vld [vmem:[%s4347_s1 + $0x44] sm:$0xf]  ;;  %v2454_v62 = vor.u32 %v2716_v54, %v2451_v55  ;;  %v2427_v63 = vld [vmem:[%s4347_s1 + $0x50] sm:$0xf0]  ;;  %v2433_v0 = vld [vmem:[%s4347_s1 + $0x48] sm:$0xf]  ;;  %v2426_v4 = vor.u32 %v2713_v60, %v2425_v59 }
  0x10   :  { %294 = vmatpush.bf16.msra.mxu0 %v2458_v44  ;;  %v2714_v1 = vld [vmem:[%s4347_s1 + $0x54] sm:$0xf0]  ;;  %v2712_v2 = vld [vmem:[%s4347_s1 + $0x4c] sm:$0xf]  ;;  %v2435_v3 = vld [vmem:[%s4347_s1 + $0x58] sm:$0xf0]  ;;  %v2430_v5 = vor.u32 %v2711_v61, %v2427_v63 }
  0x11   :  { %343 = vmatpush.bf16.msra.mxu1 %v2462_v45  ;;  %392 = vmatpush.bf16.msra.mxu2 %v2466_v46  ;;  %v2434_v6 = vor.u32 %v2714_v1, %v2433_v0  ;;  %v2409_v7 = vld [vmem:[%s4347_s1 + $0x20] sm:$0xf]  ;;  %v2709_v8 = vld [vmem:[%s4347_s1 + $0x2c] sm:$0xf0]  ;;  %v2707_v9 = vld [vmem:[%s4347_s1 + $0x24] sm:$0xf]  ;;  %v2438_v10 = vor.u32 %v2712_v2, %v2435_v3 }
  0x12   :  { %441 = vmatpush.bf16.msra.mxu3 %v2470_v50  ;;  %v2411_v11 = vld [vmem:[%s4347_s1 + $0x30] sm:$0xf0]  ;;  %v2417_v12 = vld [vmem:[%s4347_s1 + $0x28] sm:$0xf]  ;;  %v2710_v13 = vld [vmem:[%s4347_s1 + $0x34] sm:$0xf0]  ;;  %v2410_v16 = vor.u32 %v2709_v8, %v2409_v7 }
  0x13   :  { %v2708_v14 = vld [vmem:[%s4347_s1 + $0x2c] sm:$0xf]  ;;  %v2419_v15 = vld [vmem:[%s4347_s1 + $0x38] sm:$0xf0]  ;;  %v2393_v17 = vld [vmem:[%s4347_s1] sm:$0xf]  ;;  %v2414_v18 = vor.u32 %v2707_v9, %v2411_v11  ;;  %v2418_v19 = vor.u32 %v2710_v13, %v2417_v12 }
  0x14   :  { %295 = vmatpush.bf16.msra.mxu0 %v2442_v56  ;;  %v2705_v20 = vld [vmem:[%s4347_s1 + $0xc] sm:$0xf0]  ;;  %v2703_v21 = vld [vmem:[%s4347_s1 + $0x4] sm:$0xf]  ;;  %v2395_v22 = vld [vmem:[%s4347_s1 + $0x10] sm:$0xf0]  ;;  %v2422_v23 = vor.u32 %v2708_v14, %v2419_v15 }
  0x15   :  { %344 = vmatpush.bf16.msra.mxu1 %v2446_v57  ;;  %393 = vmatpush.bf16.msra.mxu2 %v2450_v58  ;;  %v2401_v24 = vld [vmem:[%s4347_s1 + $0x8] sm:$0xf]  ;;  %v2706_v25 = vld [vmem:[%s4347_s1 + $0x14] sm:$0xf0]  ;;  %v2704_v26 = vld [vmem:[%s4347_s1 + $0xc] sm:$0xf]  ;;  %v2394_v30 = vor.u32 %v2705_v20, %v2393_v17  ;;  %v2398_v33 = vor.u32 %v2703_v21, %v2395_v22 }
  0x16   :  { %442 = vmatpush.bf16.msra.mxu3 %v2454_v62  ;;  %v2403_v27 = vld [vmem:[%s4347_s1 + $0x18] sm:$0xf0]  ;;  %v2633_v28 = vld [vmem:[%s4348_s2 + $0xe0] sm:$0xf]  ;;  %v2765_v29 = vld [vmem:[%s4348_s2 + $0xec] sm:$0xf0]  ;;  %v2402_v34 = vor.u32 %v2706_v25, %v2401_v24 }
  0x17   :  { %v2763_v31 = vld [vmem:[%s4348_s2 + $0xe4] sm:$0xf]  ;;  %v2635_v32 = vld [vmem:[%s4348_s2 + $0xf0] sm:$0xf0]  ;;  %v2406_v36 = vor.u32 %v2704_v26, %v2403_v27  ;;  %v3257_v37 = vor.u32 %v2765_v29, %v2633_v28  ;;  %v2764_v38 = vld [vmem:[%s4348_s2 + $0xec] sm:$0xf] }
  0x18   :  { %296 = vmatpush.bf16.msra.mxu0 %v2426_v4  ;;  %v2695_v35 = vld [vmem:[%s4349_s0] sm:$0xff]  ;;  %v2641_v39 = vld [vmem:[%s4348_s2 + $0xe8] sm:$0xf]  ;;  %v2766_v40 = vld [vmem:[%s4348_s2 + $0xf4] sm:$0xf0]  ;;  %v3268_v41 = vor.u32 %v2763_v31, %v2635_v32 }
  0x19   :  { %345 = vmatpush.bf16.msra.mxu1 %v2430_v5  ;;  %394 = vmatpush.bf16.msra.mxu2 %v2434_v6  ;;  %v2643_v42 = vld [vmem:[%s4348_s2 + $0xf8] sm:$0xf0]  ;;  %v2617_v43 = vld [vmem:[%s4348_s2 + $0xc0] sm:$0xf]  ;;  %v2761_v44 = vld [vmem:[%s4348_s2 + $0xcc] sm:$0xf0]  ;;  %v3285_v47 = vor.u32 %v2766_v40, %v2641_v39 }
  0x1a   :  { %443 = vmatpush.bf16.msra.mxu3 %v2438_v10  ;;  %v2759_v45 = vld [vmem:[%s4348_s2 + $0xc4] sm:$0xf]  ;;  %v2619_v46 = vld [vmem:[%s4348_s2 + $0xd0] sm:$0xf0]  ;;  %v3288_v48 = vor.u32 %v2764_v38, %v2643_v42  ;;  %v3290_v49 = vor.u32 %v2761_v44, %v2617_v43  ;;  %v2625_v50 = vld [vmem:[%s4348_s2 + $0xc8] sm:$0xf] }
  0x1b   :  { %v2762_v51 = vld [vmem:[%s4348_s2 + $0xd4] sm:$0xf0]  ;;  %v3299_v52 = vor.u32 %v2759_v45, %v2619_v46  ;;  %v2760_v53 = vld [vmem:[%s4348_s2 + $0xcc] sm:$0xf]  ;;  %v2627_v54 = vld [vmem:[%s4348_s2 + $0xd8] sm:$0xf0] }
  0x1c   :  { %297 = vmatpush.bf16.msra.mxu0 %v2410_v16  ;;  %v3308_v55 = vor.u32 %v2762_v51, %v2625_v50  ;;  %v2601_v56 = vld [vmem:[%s4348_s2 + $0xa0] sm:$0xf]  ;;  %v2757_v57 = vld [vmem:[%s4348_s2 + $0xac] sm:$0xf0]  ;;  %v2755_v58 = vld [vmem:[%s4348_s2 + $0xa4] sm:$0xf]  ;;  %v3321_v59 = vor.u32 %v2760_v53, %v2627_v54 }
  0x1d   :  { %346 = vmatpush.bf16.msra.mxu1 %v2414_v18  ;;  %395 = vmatpush.bf16.msra.mxu2 %v2418_v19  ;;  %v3323_v60 = vor.u32 %v2757_v57, %v2601_v56  ;;  %v2603_v61 = vld [vmem:[%s4348_s2 + $0xb0] sm:$0xf0]  ;;  %v2756_v62 = vld [vmem:[%s4348_s2 + $0xac] sm:$0xf]  ;;  %v2611_v0 = vld [vmem:[%s4348_s2 + $0xb8] sm:$0xf0] }
  0x1e   :  { %444 = vmatpush.bf16.msra.mxu3 %v2422_v23  ;;  %v3332_v63 = vor.u32 %v2755_v58, %v2603_v61  ;;  %v2609_v1 = vld [vmem:[%s4348_s2 + $0xa8] sm:$0xf]  ;;  %v2758_v2 = vld [vmem:[%s4348_s2 + $0xb4] sm:$0xf0]  ;;  %v3348_v4 = vor.u32 %v2756_v62, %v2611_v0  ;;  %v2585_v6 = vld [vmem:[%s4348_s2 + $0x80] sm:$0xf] }
  0x1f   :  { %v3344_v3 = vor.u32 %v2758_v2, %v2609_v1  ;;  %v2696_v5 = vld [vmem:[%s4349_s0 + $0x8] sm:$0xff]  ;;  %v2753_v7 = vld [vmem:[%s4348_s2 + $0x8c] sm:$0xf0]  ;;  %v2751_v8 = vld [vmem:[%s4348_s2 + $0x84] sm:$0xf] }
  0x20   :  { %298 = vmatpush.bf16.msra.mxu0 %v2394_v30  ;;  %v3365_v9 = vor.u32 %v2753_v7, %v2585_v6  ;;  %v2587_v10 = vld [vmem:[%s4348_s2 + $0x90] sm:$0xf0]  ;;  %v2752_v11 = vld [vmem:[%s4348_s2 + $0x8c] sm:$0xf]  ;;  %v2595_v12 = vld [vmem:[%s4348_s2 + $0x98] sm:$0xf0] }
  0x21   :  { %347 = vmatpush.bf16.msra.mxu1 %v2398_v33  ;;  %396 = vmatpush.bf16.msra.mxu2 %v2402_v34  ;;  %v3376_v13 = vor.u32 %v2751_v8, %v2587_v10  ;;  %v3378_v14 = vor.u32 %v2752_v11, %v2595_v12  ;;  %v2593_v15 = vld [vmem:[%s4348_s2 + $0x88] sm:$0xf]  ;;  %v2754_v16 = vld [vmem:[%s4348_s2 + $0x94] sm:$0xf0]  ;;  %v2697_v18 = vld [vmem:[%s4349_s0 + $0x10] sm:$0xff] }
  0x22   :  { %445 = vmatpush.bf16.msra.mxu3 %v2406_v36  ;;  %v3387_v17 = vor.u32 %v2754_v16, %v2593_v15  ;;  %v2569_v19 = vld [vmem:[%s4348_s2 + $0x60] sm:$0xf]  ;;  %v2749_v20 = vld [vmem:[%s4348_s2 + $0x6c] sm:$0xf0]  ;;  %v2747_v21 = vld [vmem:[%s4348_s2 + $0x64] sm:$0xf] }
  0x23   :  { %299 = vmatmul.bf16.vlgmr.msra.gmra.mxu0 %v2695_v35  ;;  %v3404_v22 = vor.u32 %v2749_v20, %v2569_v19  ;;  %v2571_v23 = vld [vmem:[%s4348_s2 + $0x70] sm:$0xf0]  ;;  %v2748_v24 = vld [vmem:[%s4348_s2 + $0x6c] sm:$0xf]  ;;  %v2579_v25 = vld [vmem:[%s4348_s2 + $0x78] sm:$0xf0] }
  0x24   :  { %756 = vmatpush.bf16.msrb.mxu0 %v3257_v37  ;;  %348 = vmatmul.bf16.vlgmr.msra.gmra.mxu1 %v2695_v35  ;;  %v3415_v26 = vor.u32 %v2747_v21, %v2571_v23  ;;  %v3417_v27 = vor.u32 %v2748_v24, %v2579_v25  ;;  %v2577_v28 = vld [vmem:[%s4348_s2 + $0x68] sm:$0xf]  ;;  %v2750_v29 = vld [vmem:[%s4348_s2 + $0x74] sm:$0xf0]  ;;  %v2553_v32 = vld [vmem:[%s4348_s2 + $0x40] sm:$0xf] }
  0x25   :  { %770 = vmatpush.bf16.msrb.mxu1 %v3268_v41  ;;  %397 = vmatmul.bf16.vlgmr.msra.gmra.mxu2 %v2695_v35  ;;  %v3426_v30 = vor.u32 %v2750_v29, %v2577_v28  ;;  %v2698_v31 = vld [vmem:[%s4349_s0 + $0x18] sm:$0xff]  ;;  %v2745_v33 = vld [vmem:[%s4348_s2 + $0x4c] sm:$0xf0]  ;;  %v2743_v34 = vld [vmem:[%s4348_s2 + $0x44] sm:$0xf]  ;;  %v3024_v29 = vmov 0.0|0.0  }
  0x26   :  { %446 = vmatmul.bf16.vlgmr.msra.gmra.mxu3 %v2695_v35  ;;  %784 = vmatpush.bf16.msrb.mxu2 %v3285_v47  ;;  %v3443_v35 = vor.u32 %v2745_v33, %v2553_v32  ;;  %v2555_v36 = vld [vmem:[%s4348_s2 + $0x50] sm:$0xf0]  ;;  %v2744_v38 = vld [vmem:[%s4348_s2 + $0x4c] sm:$0xf]  ;;  %v2563_v39 = vld [vmem:[%s4348_s2 + $0x58] sm:$0xf0] }
  0x27   :  { %798 = vmatpush.bf16.msrb.mxu3 %v3288_v48  ;;  %v3454_v40 = vor.u32 %v2743_v34, %v2555_v36  ;;  %v3456_v42 = vor.u32 %v2744_v38, %v2563_v39  ;;  %v2561_v43 = vld [vmem:[%s4348_s2 + $0x48] sm:$0xf]  ;;  %v2746_v44 = vld [vmem:[%s4348_s2 + $0x54] sm:$0xf0]  ;;  %v2699_v46 = vld [vmem:[%s4349_s0 + $0x20] sm:$0xff] }
  0x28   :  { %757 = vmatpush.bf16.msrb.mxu0 %v3290_v49  ;;  %v3465_v45 = vor.u32 %v2746_v44, %v2561_v43  ;;  %v2537_v50 = vld [vmem:[%s4348_s2 + $0x20] sm:$0xf]  ;;  %v2741_v51 = vld [vmem:[%s4348_s2 + $0x2c] sm:$0xf0]  ;;  %v2739_v53 = vld [vmem:[%s4348_s2 + $0x24] sm:$0xf] }
  0x29   :  { %771 = vmatpush.bf16.msrb.mxu1 %v3299_v52  ;;  %v3482_v54 = vor.u32 %v2741_v51, %v2537_v50  ;;  %v2539_v56 = vld [vmem:[%s4348_s2 + $0x30] sm:$0xf0]  ;;  %v2740_v57 = vld [vmem:[%s4348_s2 + $0x2c] sm:$0xf]  ;;  %v2547_v58 = vld [vmem:[%s4348_s2 + $0x38] sm:$0xf0] }
  0x2a   :  { %785 = vmatpush.bf16.msrb.mxu2 %v3308_v55  ;;  %v3493_v61 = vor.u32 %v2739_v53, %v2539_v56  ;;  %v3495_v62 = vor.u32 %v2740_v57, %v2547_v58  ;;  %v2545_v0 = vld [vmem:[%s4348_s2 + $0x28] sm:$0xf]  ;;  %v2742_v1 = vld [vmem:[%s4348_s2 + $0x34] sm:$0xf0]  ;;  %v2521_v6 = vld [vmem:[%s4348_s2] sm:$0xf] }
  0x2b   :  { %799 = vmatpush.bf16.msrb.mxu3 %v3321_v59  ;;  %v3504_v2 = vor.u32 %v2742_v1, %v2545_v0  ;;  %v2737_v7 = vld [vmem:[%s4348_s2 + $0xc] sm:$0xf0]  ;;  %v2735_v8 = vld [vmem:[%s4348_s2 + $0x4] sm:$0xf]  ;;  %v2523_v11 = vld [vmem:[%s4348_s2 + $0x10] sm:$0xf0] }
  0x2c   :  { %758 = vmatpush.bf16.msrb.mxu0 %v3323_v60  ;;  %v3521_v10 = vor.u32 %v2737_v7, %v2521_v6  ;;  %v2736_v12 = vld [vmem:[%s4348_s2 + $0xc] sm:$0xf]  ;;  %v2531_v15 = vld [vmem:[%s4348_s2 + $0x18] sm:$0xf0]  ;;  %v3532_v16 = vor.u32 %v2735_v8, %v2523_v11  ;;  %v2701_v19 = vld [vmem:[%s4349_s0 + $0x30] sm:$0xff] }
  0x2d   :  { %772 = vmatpush.bf16.msrb.mxu1 %v3332_v63  ;;  %v2529_v20 = vld [vmem:[%s4348_s2 + $0x8] sm:$0xf]  ;;  %v2738_v21 = vld [vmem:[%s4348_s2 + $0x14] sm:$0xf0] }
  0x2e   :  { %786 = vmatpush.bf16.msrb.mxu2 %v3344_v3  ;;  %v3554_v23 = vor.u32 %v2738_v21, %v2529_v20  ;;  %v2702_v24 = vld [vmem:[%s4349_s0 + $0x38] sm:$0xff] }
  0x2f   :  { %800 = vmatpush.bf16.msrb.mxu3 %v3348_v4 }
  0x30   :  { %759 = vmatpush.bf16.msrb.mxu0 %v3365_v9 }
  0x31   :  { %773 = vmatpush.bf16.msrb.mxu1 %v3376_v13 }
  0x32   :  { %787 = vmatpush.bf16.msrb.mxu2 %v3387_v17 }
  0x33   :  { %304 = vmatmul.bf16.gmra.mxu0 %v2696_v5  ;;  %801 = vmatpush.bf16.msrb.mxu3 %v3378_v14 }
  0x34   :  { %353 = vmatmul.bf16.gmra.mxu1 %v2696_v5  ;;  %760 = vmatpush.bf16.msrb.mxu0 %v3404_v22 }
  0x35   :  { %402 = vmatmul.bf16.gmra.mxu2 %v2696_v5  ;;  %774 = vmatpush.bf16.msrb.mxu1 %v3415_v26 }
  0x36   :  { %451 = vmatmul.bf16.gmra.mxu3 %v2696_v5  ;;  %788 = vmatpush.bf16.msrb.mxu2 %v3426_v30  ;;  %v2700_v5 = vld [vmem:[%s4349_s0 + $0x28] sm:$0xff] }
  0x37   :  { %802 = vmatpush.bf16.msrb.mxu3 %v3417_v27 }
  0x38   :  { %761 = vmatpush.bf16.msrb.mxu0 %v3443_v35 }
  0x39   :  { %775 = vmatpush.bf16.msrb.mxu1 %v3454_v40 }
  0x3a   :  { %789 = vmatpush.bf16.msrb.mxu2 %v3465_v45 }
  0x3b   :  { %803 = vmatpush.bf16.msrb.mxu3 %v3456_v42 }
  0x3c   :  { %762 = vmatpush.bf16.msrb.mxu0 %v3482_v54 }
  0x3d   :  { %776 = vmatpush.bf16.msrb.mxu1 %v3493_v61 }
  0x3e   :  { %790 = vmatpush.bf16.msrb.mxu2 %v3504_v2 }
  0x3f   :  { %804 = vmatpush.bf16.msrb.mxu3 %v3495_v62 }
  0x40   :  { %763 = vmatpush.bf16.msrb.mxu0 %v3521_v10 }
  0x41   :  { %777 = vmatpush.bf16.msrb.mxu1 %v3532_v16 }
  0x42   :  { %791 = vmatpush.bf16.msrb.mxu2 %v3554_v23 }
  0x43   :  { %309 = vmatmul.bf16.gmra.mxu0 %v2697_v18 }
  0x44   :  { %358 = vmatmul.bf16.gmra.mxu1 %v2697_v18  ;;  %956 = vmatpush.bf16.msra.mxu0 %v3257_v37 }
  0x45   :  { %407 = vmatmul.bf16.gmra.mxu2 %v2697_v18  ;;  %970 = vmatpush.bf16.msra.mxu1 %v3268_v41 }
  0x46   :  { %456 = vmatmul.bf16.gmra.mxu3 %v2697_v18  ;;  %v3534_v18 = vor.u32 %v2736_v12, %v2531_v15  ;;  %984 = vmatpush.bf16.msra.mxu2 %v3285_v47 }
  0x48   :  { %805 = vmatpush.bf16.msrb.mxu3 %v3534_v18  ;;  %957 = vmatpush.bf16.msra.mxu0 %v3290_v49 }
  0x49   :  { %971 = vmatpush.bf16.msra.mxu1 %v3299_v52 }
  0x4a   :  { %985 = vmatpush.bf16.msra.mxu2 %v3308_v55 }
  0x4c   :  { %998 = vmatpush.bf16.msra.mxu3 %v3288_v48  ;;  %958 = vmatpush.bf16.msra.mxu0 %v3323_v60 }
  0x4d   :  { %972 = vmatpush.bf16.msra.mxu1 %v3332_v63 }
  0x4e   :  { %986 = vmatpush.bf16.msra.mxu2 %v3344_v3 }
  0x50   :  { %999 = vmatpush.bf16.msra.mxu3 %v3321_v59  ;;  %959 = vmatpush.bf16.msra.mxu0 %v3365_v9 }
  0x51   :  { %973 = vmatpush.bf16.msra.mxu1 %v3376_v13 }
  0x52   :  { %987 = vmatpush.bf16.msra.mxu2 %v3387_v17 }
  0x53   :  { %314 = vmatmul.bf16.gmra.mxu0 %v2698_v31 }
  0x54   :  { %363 = vmatmul.bf16.gmra.mxu1 %v2698_v31  ;;  %1000 = vmatpush.bf16.msra.mxu3 %v3348_v4 }
  0x55   :  { %412 = vmatmul.bf16.gmra.mxu2 %v2698_v31  ;;  %960 = vmatpush.bf16.msra.mxu0 %v3404_v22 }
  0x56   :  { %461 = vmatmul.bf16.gmra.mxu3 %v2698_v31  ;;  %974 = vmatpush.bf16.msra.mxu1 %v3415_v26 }
  0x57   :  { %988 = vmatpush.bf16.msra.mxu2 %v3426_v30 }
  0x58   :  { %1001 = vmatpush.bf16.msra.mxu3 %v3378_v14 }
  0x59   :  { %961 = vmatpush.bf16.msra.mxu0 %v3443_v35 }
  0x5a   :  { %975 = vmatpush.bf16.msra.mxu1 %v3454_v40 }
  0x5b   :  { %989 = vmatpush.bf16.msra.mxu2 %v3465_v45 }
  0x5c   :  { %1002 = vmatpush.bf16.msra.mxu3 %v3417_v27 }
  0x5d   :  { %962 = vmatpush.bf16.msra.mxu0 %v3482_v54 }
  0x5e   :  { %976 = vmatpush.bf16.msra.mxu1 %v3493_v61 }
  0x5f   :  { %990 = vmatpush.bf16.msra.mxu2 %v3504_v2 }
  0x60   :  { %1003 = vmatpush.bf16.msra.mxu3 %v3456_v42 }
  0x61   :  { %963 = vmatpush.bf16.msra.mxu0 %v3521_v10 }
  0x62   :  { %977 = vmatpush.bf16.msra.mxu1 %v3532_v16 }
  0x63   :  { %319 = vmatmul.bf16.gmra.mxu0 %v2699_v46  ;;  %991 = vmatpush.bf16.msra.mxu2 %v3554_v23 }
  0x64   :  { %368 = vmatmul.bf16.gmra.mxu1 %v2699_v46  ;;  %1004 = vmatpush.bf16.msra.mxu3 %v3495_v62 }
  0x65   :  { %417 = vmatmul.bf16.gmra.mxu2 %v2699_v46 }
  0x66   :  { %466 = vmatmul.bf16.gmra.mxu3 %v2699_v46 }
  0x68   :  { %1005 = vmatpush.bf16.msra.mxu3 %v3534_v18 }
  0x73   :  { %324 = vmatmul.bf16.gmra.mxu0 %v2700_v5 }
  0x74   :  { %373 = vmatmul.bf16.gmra.mxu1 %v2700_v5 }
  0x75   :  { %422 = vmatmul.bf16.gmra.mxu2 %v2700_v5 }
  0x76   :  { %471 = vmatmul.bf16.gmra.mxu3 %v2700_v5 }
  0x83   :  { %329 = vmatmul.bf16.gmra.mxu0 %v2701_v19 }
  0x84   :  { %378 = vmatmul.bf16.gmra.mxu1 %v2701_v19 }
  0x85   :  { %427 = vmatmul.bf16.gmra.mxu2 %v2701_v19 }
  0x86   :  { %476 = vmatmul.bf16.gmra.mxu3 %v2701_v19 }
  0x93   :  { %334 = vmatmul.bf16.gmra.mxu0 %v2702_v24 }
  0x94   :  { %383 = vmatmul.bf16.gmra.mxu1 %v2702_v24 }
  0x95   :  { %432 = vmatmul.bf16.gmra.mxu2 %v2702_v24 }
  0x96   :  { %481 = vmatmul.bf16.gmra.mxu3 %v2702_v24 }
  0xa0   :  { %v3586_v25 = vpop.f32.mrf.mxu0 }
  0xa1   :  { %v3588_v28 = vpop.f32.mrf.mxu1 }
  0xa3   :  { %764 = vmatmul.bf16.vlgmr.msrb.gmra.mxu0 %v3024_v29 }
  0xa4   :  { %778 = vmatmul.bf16.vlgmr.msrb.gmra.mxu1 %v3024_v29  ;;  %1156 = vmatpush.bf16.msrb.mxu0 %v3257_v37 }
  0xa5   :  { %792 = vmatmul.bf16.vlgmr.msrb.gmra.mxu2 %v3024_v29  ;;  %1170 = vmatpush.bf16.msrb.mxu1 %v3268_v41 }
  0xa6   :  { %806 = vmatmul.bf16.vlgmr.msrb.gmra.mxu3 %v3024_v29  ;;  %1184 = vmatpush.bf16.msrb.mxu2 %v3285_v47 }
  0xa7   :  { %1198 = vmatpush.bf16.msrb.mxu3 %v3288_v48 }
  0xa8   :  { %v3593_v31 = vpop.f32.mrf.mxu2  ;;  %v3598_v33 = vpop.f32.mrf.mxu0  ;;  %1157 = vmatpush.bf16.msrb.mxu0 %v3290_v49 }
  0xa9   :  { %v3596_v32 = vpop.f32.mrf.mxu3  ;;  %v3600_v34 = vpop.f32.mrf.mxu1  ;;  %1171 = vmatpush.bf16.msrb.mxu1 %v3299_v52 }
  0xaa   :  { %1185 = vmatpush.bf16.msrb.mxu2 %v3308_v55 }
  0xab   :  { %1199 = vmatpush.bf16.msrb.mxu3 %v3321_v59 }
  0xac   :  { %1158 = vmatpush.bf16.msrb.mxu0 %v3323_v60 }
  0xad   :  { %1172 = vmatpush.bf16.msrb.mxu1 %v3332_v63 }
  0xae   :  { %1186 = vmatpush.bf16.msrb.mxu2 %v3344_v3 }
  0xaf   :  { %1200 = vmatpush.bf16.msrb.mxu3 %v3348_v4 }
  0xb0   :  { %v3609_v36 = vpop.f32.mrf.mxu2  ;;  %v3614_v39 = vpop.f32.mrf.mxu0  ;;  %1159 = vmatpush.bf16.msrb.mxu0 %v3365_v9 }
  0xb1   :  { %v3612_v38 = vpop.f32.mrf.mxu3  ;;  %v3616_v43 = vpop.f32.mrf.mxu1  ;;  %1173 = vmatpush.bf16.msrb.mxu1 %v3376_v13 }
  0xb2   :  { %4367 = vst [vmem:[#allocation5_spill] sm:$0xff] %v3616_v43  ;;  %1187 = vmatpush.bf16.msrb.mxu2 %v3387_v17 }
  0xb3   :  { %1201 = vmatpush.bf16.msrb.mxu3 %v3378_v14 }
  0xb4   :  { %1160 = vmatpush.bf16.msrb.mxu0 %v3404_v22 }
  0xb5   :  { %1174 = vmatpush.bf16.msrb.mxu1 %v3415_v26 }
  0xb6   :  { %1188 = vmatpush.bf16.msrb.mxu2 %v3426_v30 }
  0xb7   :  { %1202 = vmatpush.bf16.msrb.mxu3 %v3417_v27 }
  0xb8   :  { %v3625_v44 = vpop.f32.mrf.mxu2  ;;  %v3630_v50 = vpop.f32.mrf.mxu0  ;;  %1161 = vmatpush.bf16.msrb.mxu0 %v3443_v35 }
  0xb9   :  { %4368 = vst [vmem:[#allocation6_spill] sm:$0xff] %v3625_v44  ;;  %v3628_v46 = vpop.f32.mrf.mxu3  ;;  %v3632_v51 = vpop.f32.mrf.mxu1  ;;  %1175 = vmatpush.bf16.msrb.mxu1 %v3454_v40 }
  0xba   :  { %4369 = vst [vmem:[#allocation7_spill] sm:$0xff] %v3628_v46  ;;  %1189 = vmatpush.bf16.msrb.mxu2 %v3465_v45 }
  0xbb   :  { %4370 = vst [vmem:[#allocation8_spill] sm:$0xff] %v3630_v50  ;;  %1203 = vmatpush.bf16.msrb.mxu3 %v3456_v42 }
  0xbc   :  { %4371 = vst [vmem:[#allocation9_spill] sm:$0xff] %v3632_v51  ;;  %1162 = vmatpush.bf16.msrb.mxu0 %v3482_v54 }
  0xbd   :  { %1176 = vmatpush.bf16.msrb.mxu1 %v3493_v61 }
  0xbe   :  { %1190 = vmatpush.bf16.msrb.mxu2 %v3504_v2 }
  0xbf   :  { %1204 = vmatpush.bf16.msrb.mxu3 %v3495_v62 }
  0xc0   :  { %v3641_v53 = vpop.f32.mrf.mxu2  ;;  %v3646_v57 = vpop.f32.mrf.mxu0  ;;  %1163 = vmatpush.bf16.msrb.mxu0 %v3521_v10 }
  0xc1   :  { %4372 = vst [vmem:[#allocation10_spill] sm:$0xff] %v3641_v53  ;;  %v3644_v56 = vpop.f32.mrf.mxu3  ;;  %v3648_v58 = vpop.f32.mrf.mxu1  ;;  %1177 = vmatpush.bf16.msrb.mxu1 %v3532_v16 }
  0xc2   :  { %4373 = vst [vmem:[#allocation11_spill] sm:$0xff] %v3644_v56  ;;  %1191 = vmatpush.bf16.msrb.mxu2 %v3554_v23 }
  0xc3   :  { %4374 = vst [vmem:[#allocation12_spill] sm:$0xff] %v3646_v57  ;;  %1205 = vmatpush.bf16.msrb.mxu3 %v3534_v18 }
  0xc4   :  { %4375 = vst [vmem:[#allocation13_spill] sm:$0xff] %v3648_v58 }
  0xc8   :  { %v3654_v0 = vpop.f32.mrf.mxu2  ;;  %v3658_v5 = vpop.f32.mrf.mxu0 }
  0xc9   :  { %4376 = vst [vmem:[#allocation14_spill] sm:$0xff] %v3654_v0  ;;  %v3656_v1 = vpop.f32.mrf.mxu3  ;;  %v3660_v6 = vpop.f32.mrf.mxu1 }
  0xca   :  { %4377 = vst [vmem:[#allocation15_spill] sm:$0xff] %v3656_v1 }
  0xcb   :  { %4378 = vst [vmem:[#allocation16_spill] sm:$0xff] %v3658_v5 }
  0xcc   :  { %4379 = vst [vmem:[#allocation17_spill] sm:$0xff] %v3660_v6 }
  0xd0   :  { %v3662_v7 = vpop.f32.mrf.mxu2  ;;  %v3666_v11 = vpop.f32.mrf.mxu0 }
  0xd1   :  { %4380 = vst [vmem:[#allocation18_spill] sm:$0xff] %v3662_v7  ;;  %v3664_v8 = vpop.f32.mrf.mxu3  ;;  %v3668_v12 = vpop.f32.mrf.mxu1 }
  0xd2   :  { %4381 = vst [vmem:[#allocation19_spill] sm:$0xff] %v3664_v8 }
  0xd3   :  { %4382 = vst [vmem:[#allocation20_spill] sm:$0xff] %v3666_v11 }
  0xd4   :  { %4383 = vst [vmem:[#allocation21_spill] sm:$0xff] %v3668_v12 }
  0xd8   :  { %v3670_v15 = vpop.f32.mrf.mxu2  ;;  %v3674_v20 = vpop.f32.mrf.mxu0 }
  0xd9   :  { %4384 = vst [vmem:[#allocation22_spill] sm:$0xff] %v3670_v15  ;;  %v3672_v19 = vpop.f32.mrf.mxu3  ;;  %v3676_v21 = vpop.f32.mrf.mxu1 }
  0xda   :  { %4385 = vst [vmem:[#allocation23_spill] sm:$0xff] %v3672_v19 }
  0xdb   :  { %4386 = vst [vmem:[#allocation24_spill] sm:$0xff] %v3674_v20 }
  0xdc   :  { %4387 = vst [vmem:[#allocation25_spill] sm:$0xff] %v3676_v21 }
  0xe0   :  { %v3678_v24 = vpop.f32.mrf.mxu2  ;;  %v3682_v0 = vpop.f32.mrf.mxu0 }
  0xe1   :  { %4388 = vst [vmem:[#allocation26_spill] sm:$0xff] %v3678_v24  ;;  %v3680_v29 = vpop.f32.mrf.mxu3  ;;  %v3684_v7 = vpop.f32.mrf.mxu1 }
  0xe2   :  { %4389 = vst [vmem:[#allocation27_spill] sm:$0xff] %v3680_v29 }
  0xe3   :  { %4390 = vst [vmem:[#allocation28_spill] sm:$0xff] %v3682_v0 }
  0xe4   :  { %4391 = vst [vmem:[#allocation29_spill] sm:$0xff] %v3684_v7 }
  0xe8   :  { %v3686_v8 = vpop.f32.mrf.mxu2  ;;  %v3690_v12 = vpop.f32.mrf.mxu0 }
  0xe9   :  { %4392 = vst [vmem:[#allocation30_spill] sm:$0xff] %v3686_v8  ;;  %v3688_v11 = vpop.f32.mrf.mxu3  ;;  %v3692_v15 = vpop.f32.mrf.mxu1 }
  0xea   :  { %4393 = vst [vmem:[#allocation31_spill] sm:$0xff] %v3688_v11 }
  0xeb   :  { %4394 = vst [vmem:[#allocation32_spill] sm:$0xff] %v3690_v12 }
  0xec   :  { %4395 = vst [vmem:[#allocation33_spill] sm:$0xff] %v3692_v15 }
  0xf0   :  { %v3694_v19 = vpop.f32.mrf.mxu2  ;;  %v3698_v21 = vpop.f32.mrf.mxu0 }
  0xf1   :  { %4396 = vst [vmem:[#allocation34_spill] sm:$0xff] %v3694_v19  ;;  %v3696_v20 = vpop.f32.mrf.mxu3  ;;  %v3700_v24 = vpop.f32.mrf.mxu1 }
  0xf2   :  { %4397 = vst [vmem:[#allocation35_spill] sm:$0xff] %v3696_v20 }
  0xf3   :  { %4398 = vst [vmem:[#allocation36_spill] sm:$0xff] %v3698_v21 }
  0xf4   :  { %4399 = vst [vmem:[#allocation37_spill] sm:$0xff] %v3700_v24 }
  0xf8   :  { %v3702_v29 = vpop.f32.mrf.mxu2  ;;  %v3706_v7 = vpop.f32.mrf.mxu0 }
  0xf9   :  { %4400 = vst [vmem:[#allocation38_spill] sm:$0xff] %v3702_v29  ;;  %v3704_v0 = vpop.f32.mrf.mxu3  ;;  %v3708_v8 = vpop.f32.mrf.mxu1 }
  0xfa   :  { %4401 = vst [vmem:[#allocation39_spill] sm:$0xff] %v3704_v0 }
  0xfb   :  { %4402 = vst [vmem:[#allocation40_spill] sm:$0xff] %v3706_v7 }
  0xfc   :  { %4403 = vst [vmem:[#allocation41_spill] sm:$0xff] %v3708_v8 }
 0x100   :  { %v3710_v11 = vpop.f32.mrf.mxu2  ;;  %v3714_v15 = vpop.f32.mrf.mxu0 }
 0x101   :  { %4404 = vst [vmem:[#allocation42_spill] sm:$0xff] %v3710_v11  ;;  %v3712_v12 = vpop.f32.mrf.mxu3  ;;  %v3716_v19 = vpop.f32.mrf.mxu1 }
 0x102   :  { %4405 = vst [vmem:[#allocation43_spill] sm:$0xff] %v3712_v12 }
 0x103   :  { %4406 = vst [vmem:[#allocation44_spill] sm:$0xff] %v3714_v15 }
 0x104   :  { %4407 = vst [vmem:[#allocation45_spill] sm:$0xff] %v3716_v19  ;;  %v73_v19 = vld [vmem:[%s4350_s3] sm:$0xf] }
 0x105   :  { %v3755_v5 = vperm.slane %v73_v19, 3  ;;  %v3765_v53 = vperm.slane %v73_v19, 2 }
 0x107   :  { %4422 = vst [vmem:[#allocation60_spill] sm:$0xff] %v3755_v5 }
 0x108   :  { %v3718_v20 = vpop.f32.mrf.mxu2  ;;  %v3722_v24 = vpop.f32.mrf.mxu0  ;;  %4424 = vst [vmem:[#allocation62_spill] sm:$0xff] %v3765_v53 }
 0x109   :  { %4408 = vst [vmem:[#allocation46_spill] sm:$0xff] %v3718_v20  ;;  %v3720_v21 = vpop.f32.mrf.mxu3  ;;  %v3724_v29 = vpop.f32.mrf.mxu1 }
 0x10a   :  { %4409 = vst [vmem:[#allocation47_spill] sm:$0xff] %v3720_v21 }
 0x10b   :  { %4410 = vst [vmem:[#allocation48_spill] sm:$0xff] %v3722_v24  ;;  %v3743_v24 = vperm.slane %v73_v19, 0 }
 0x10c   :  { %4411 = vst [vmem:[#allocation49_spill] sm:$0xff] %v3724_v29  ;;  %v3745_v29 = vperm.slane %v73_v19, 1 }
 0x10e   :  { %4419 = vst [vmem:[#allocation57_spill] sm:$0xff] %v3745_v29 }
 0x110   :  { %v3728_v7 = vpop.f32.mrf.mxu0  ;;  %v3732_v11 = vpop.f32.mrf.mxu2 }
 0x111   :  { %v3726_v0 = vpop.f32.mrf.mxu3  ;;  %4413 = vst [vmem:[#allocation51_spill] sm:$0xff] %v3728_v7  ;;  %v3730_v8 = vpop.f32.mrf.mxu1  ;;  %v350_v7 = vadd.f32 %v3588_v28, %v3745_v29  ;;  %v303_v28 = vadd.f32 %v3598_v33, %v3743_v24  ;;  %v450_v33 = vadd.f32 %v3612_v38, %v3755_v5 }
 0x112   :  { %4412 = vst [vmem:[#allocation50_spill] sm:$0xff] %v3726_v0 }
 0x113   :  { %4414 = vst [vmem:[#allocation52_spill] sm:$0xff] %v3730_v8  ;;  %v301_v8 = vadd.f32 %v3586_v25, %v3743_v24  ;;  %v448_v25 = vadd.f32 %v3596_v32, %v3755_v5 }
 0x114   :  { %4415 = vst [vmem:[#allocation53_spill] sm:$0xff] %v3732_v11 }
 0x118   :  { %v3739_v20 = vpop.f32.mrf.mxu0  ;;  %v3747_v0 = vpop.f32.mrf.mxu2 }
 0x119   :  { %v3737_v15 = vpop.f32.mrf.mxu3  ;;  %4417 = vst [vmem:[#allocation55_spill] sm:$0xff] %v3739_v20  ;;  %v3741_v21 = vpop.f32.mrf.mxu1 }
 0x11a   :  { %4416 = vst [vmem:[#allocation54_spill] sm:$0xff] %v3737_v15 }
 0x11b   :  { %4418 = vst [vmem:[#allocation56_spill] sm:$0xff] %v3741_v21 }
 0x11c   :  { %4420 = vst [vmem:[#allocation58_spill] sm:$0xff] %v3747_v0 }
 0x120   :  { %v765_v12 = vpop.f32.mrf.mxu0  ;;  %v3757_v58 = vpop.f32.mrf.mxu2 }
 0x121   :  { %v3753_v11 = vpop.f32.mrf.mxu3  ;;  %v812_v15 = vadd.f32 %v765_v12, %v301_v8  ;;  %v779_v6 = vpop.f32.mrf.mxu1  ;;  %4423 = vst [vmem:[#allocation61_spill] sm:$0xff] %v3757_v58 }
 0x122   :  { %4421 = vst [vmem:[#allocation59_spill] sm:$0xff] %v3753_v11  ;;  %v813_v20 = vadd.f32 %v779_v6, %v350_v7  ;;  %v352_v11 = vadd.f32 %v3600_v34, %v3745_v29 }
 0x123   :  { %v2647_v21 = vmul.f32 -1.442695, %v812_v15 }
 0x124   :  { %v2649_v1 = vmul.f32 -1.442695, %v813_v20 }
 0x125   :  { %2768 = vpow2.f32 %v2647_v21 }
 0x126   :  { %2770 = vpow2.f32 %v2649_v1 }
 0x128   :  { %v767_v12 = vpop.f32.mrf.mxu0  ;;  %v793_v34 = vpop.f32.mrf.mxu2 }
 0x129   :  { %v807_v8 = vpop.f32.mrf.mxu3  ;;  %v816_v7 = vadd.f32 %v767_v12, %v303_v28  ;;  %v781_v0 = vpop.f32.mrf.mxu1 }
 0x12a   :  { %v815_v6 = vadd.f32 %v807_v8, %v448_v25  ;;  %v817_v15 = vadd.f32 %v781_v0, %v352_v11  ;;  %v399_v0 = vadd.f32 %v3593_v31, %v3765_v53 }
 0x12b   :  { %v2769_v20 = vpop.eup %2768  ;;  %v2648_v1 = vmul.f32 -1.442695, %v816_v7 }
 0x12c   :  { %v2651_v21 = vmul.f32 -1.442695, %v815_v6  ;;  %v2771_v57 = vpop.eup %2770  ;;  %v826_v58 = vadd.f32 1.0, %v2769_v20  ;;  %v2650_v56 = vmul.f32 -1.442695, %v817_v15  ;;  %v814_v8 = vadd.f32 %v793_v34, %v399_v0 }
 0x12d   :  { %v864_v32 = vadd.f32 1.0, %v2771_v57 }
 0x12e   :  { %2772 = vpow2.f32 %v2651_v21  ;;  %vm833_vm2 = vweird.f32 %v826_v58 }
 0x12f   :  { %2774 = vrcp.f32 %v826_v58  ;;  %v877_v34 = vand.u32 2147483648, %v864_v32  ;;  %vm871_vm3 = vweird.f32 %v864_v32 }
 0x130   :  { %2776 = vrcp.f32 %v864_v32 }
 0x131   :  { %2778 = vpow2.f32 %v2648_v1  ;;  %v809_v25 = vpop.f32.mrf.mxu3  ;;  %v837_v1 = vand.u32 2147483647, %v826_v58  ;;  %v878_v51 = vor.u32 1.1754944e-38, %v877_v34 }
 0x132   :  { %2780 = vpow2.f32 %v2650_v56  ;;  %v819_v11 = vadd.f32 %v809_v25, %v450_v33  ;;  %v839_v56 = vand.u32 2147483648, %v826_v58 }
 0x133   :  { %vm838_vm5 = vcmp.eq.f32.partialorder %v837_v1, 8.507059e+37 }
 0x134   :  { %v2773_v28 = vpop.eup %2772  ;;  %v2652_v19 = vmul.f32 -1.442695, %v819_v11  ;;  %v875_v11 = vand.u32 2147483647, %v864_v32 }
 0x135   :  { %v2775_v12 = vpop.eup %2774  ;;  %v3771_v57 = vadd.f32 1.0, %v2773_v28 }
 0x136   :  { %v2777_v6 = vpop.eup %2776  ;;  %v829_v7 = vmul.f32 %v2775_v12, %v826_v58  ;;  %2782 = vpow2.f32 %v2652_v19  ;;  %vm834_vm0 = vweird.f32 %v2775_v12  ;;  %v840_v19 = vor.u32 1.1754944e-38, %v839_v56 }
 0x137   :  { %v2779_v15 = vpop.eup %2778  ;;  %v867_v38 = vmul.f32 %v2777_v6, %v864_v32  ;;  %2784 = vtanh.f32 %v814_v8  ;;  %vm872_vm1 = vweird.f32 %v2777_v6  ;;  %vm835_vm4 = vmor %vm833_vm2, %vm834_vm0  ;;  %vm876_vm7 = vcmp.eq.f32.partialorder %v875_v11, 8.507059e+37 }
 0x138   :  { %v2781_v20 = vpop.eup %2780  ;;  %v830_v21 = vsub.f32 1.0, %v829_v7  ;;  %v3773_v44 = vadd.f32 1.0, %v2779_v15  ;;  %2786 = vrcp.f32 %v3771_v57  ;;  %v795_v15 = vpop.f32.mrf.mxu2  ;;  %vm873_vm6 = vmor %vm871_vm3, %vm872_vm1  ;;  %vm911_vm2 = vweird.f32 %v3771_v57 }
 0x139   :  { %v868_v31 = vsub.f32 1.0, %v867_v38  ;;  %v3776_v33 = vadd.f32 1.0, %v2781_v20 }
 0x13a   :  { %v831_v25 = vmul.f32 %v2775_v12, %v830_v21  ;;  %2788 = vrcp.f32 %v3773_v44  ;;  %v401_v21 = vadd.f32 %v3609_v36, %v3765_v53  ;;  %v854_v11 = vand.u32 2147483648, %v3773_v44 }
 0x13b   :  { %v869_v0 = vmul.f32 %v2777_v6, %v868_v31  ;;  %2790 = vrcp.f32 %v3776_v33  ;;  %vm848_vm10 = vweird.f32 %v3773_v44  ;;  %vm886_vm11 = vweird.f32 %v3776_v33 }
 0x13c   :  { %v2783_v28 = vpop.eup %2782  ;;  %v832_v8 = vadd.f32 %v2775_v12, %v831_v25 }
 0x13d   :  { %v870_v7 = vadd.f32 %v2777_v6, %v869_v0  ;;  %v3780_v38 = vadd.f32 1.0, %v2783_v28  ;;  %v2785_v20 = vpop.eup %2784  ;;  %v818_v28 = vadd.f32 %v795_v15, %v401_v21  ;;  %v852_v15 = vand.u32 2147483647, %v3773_v44 }
 0x13e   :  { %v836_v31 = vsel %vm835_vm4, %v2775_v12, %v832_v8  ;;  %v3785_v50 = vpop.eup %2786 }
 0x13f   :  { %v841_v25 = vsel %vm838_vm5, %v840_v19, %v836_v31  ;;  %v874_v58 = vsel %vm873_vm6, %v2777_v6, %v870_v7  ;;  %2792 = vrcp.f32 %v3780_v38  ;;  %v907_v34 = vmul.f32 %v3785_v50, %v3771_v57 }
 0x140   :  { %v2789_v32 = vpop.eup %2788  ;;  %v879_v56 = vsel %vm876_vm7, %v878_v51, %v874_v58  ;;  %v938_v0 = vmul.f32 %v2785_v20, %v841_v25  ;;  %2794 = vtanh.f32 %v818_v28  ;;  %v892_v51 = vand.u32 2147483648, %v3776_v33 }
 0x141   :  { %v2791_v46 = vpop.eup %2790  ;;  %v936_v5 = vmul.f32 0.0, %v879_v56  ;;  %v844_v36 = vmul.f32 %v2789_v32, %v3773_v44  ;;  %vm849_vm8 = vweird.f32 %v2789_v32  ;;  %v908_v31 = vsub.f32 1.0, %v907_v34 }
 0x142   :  { %v882_v12 = vmul.f32 %v2791_v46, %v3776_v33  ;;  %vm887_vm9 = vweird.f32 %v2791_v46  ;;  %vm850_vm12 = vmor %vm848_vm10, %vm849_vm8  ;;  %v855_v58 = vor.u32 1.1754944e-38, %v854_v11  ;;  %v893_v28 = vor.u32 1.1754944e-38, %v892_v51 }
 0x143   :  { %v3790_v1 = vadd.f32 %v938_v0, %v936_v5  ;;  %v845_v8 = vsub.f32 1.0, %v844_v36  ;;  %v890_v5 = vand.u32 2147483647, %v3776_v33  ;;  %vm853_vm13 = vcmp.eq.f32.partialorder %v852_v15, 8.507059e+37  ;;  %vm888_vm14 = vmor %vm886_vm11, %vm887_vm9 }
 0x144   :  { %v883_v6 = vsub.f32 1.0, %v882_v12  ;;  %v909_v53 = vmul.f32 %v3785_v50, %v908_v31  ;;  %vm912_vm0 = vweird.f32 %v3785_v50  ;;  %v932_v51 = vand.u32 2147483648, %v3780_v38 }
 0x145   :  { %v2793_v19 = vpop.eup %2792  ;;  %v846_v7 = vmul.f32 %v2789_v32, %v845_v8  ;;  %vm891_vm15 = vcmp.eq.f32.partialorder %v890_v5, 8.507059e+37  ;;  %2796 = vtanh.f32 %v3790_v1  ;;  %vm926_vm3 = vweird.f32 %v3780_v38  ;;  %vm913_vm4 = vmor %vm911_vm2, %vm912_vm0 }
 0x146   :  { %v884_v20 = vmul.f32 %v2791_v46, %v883_v6  ;;  %v922_v21 = vmul.f32 %v2793_v19, %v3780_v38  ;;  %v2795_v12 = vpop.eup %2794  ;;  %vm927_vm1 = vweird.f32 %v2793_v19  ;;  %v915_v15 = vand.u32 2147483647, %v3771_v57 }
 0x147   :  { %v847_v25 = vadd.f32 %v2789_v32, %v846_v7  ;;  %vm928_vm5 = vmor %vm926_vm3, %vm927_vm1  ;;  %v933_v31 = vor.u32 1.1754944e-38, %v932_v51 }
 0x148   :  { %v885_v56 = vadd.f32 %v2791_v46, %v884_v20  ;;  %v923_v0 = vsub.f32 1.0, %v922_v21  ;;  %v930_v20 = vand.u32 2147483647, %v3780_v38  ;;  %vm916_vm6 = vcmp.eq.f32.partialorder %v915_v15, 8.507059e+37  ;;  %v4429_v15 = vld [vmem:[#allocation9_spill] sm:$0xff] }
 0x149   :  { %v851_v36 = vsel %vm850_vm12, %v2789_v32, %v847_v25  ;;  %v910_v32 = vadd.f32 %v3785_v50, %v909_v53 }
 0x14a   :  { %v856_v8 = vsel %vm853_vm13, %v855_v58, %v851_v36  ;;  %v889_v6 = vsel %vm888_vm14, %v2791_v46, %v885_v56  ;;  %v924_v43 = vmul.f32 %v2793_v19, %v923_v0  ;;  %v917_v46 = vand.u32 2147483648, %v3771_v57  ;;  %v4425_v57 = vld [vmem:[#allocation5_spill] sm:$0xff] }
 0x14b   :  { %v894_v34 = vsel %vm891_vm15, %v893_v28, %v889_v6  ;;  %v939_v7 = vmul.f32 %v2795_v12, %v856_v8  ;;  %v914_v53 = vsel %vm913_vm4, %v3785_v50, %v910_v32  ;;  %v2797_v5 = vpop.eup %2796  ;;  %vm931_vm7 = vcmp.eq.f32.partialorder %v930_v20, 8.507059e+37  ;;  %v4427_v32 = vld [vmem:[#allocation7_spill] sm:$0xff] }
 0x14c   :  { %v937_v44 = vmul.f32 0.0, %v894_v34  ;;  %v925_v11 = vadd.f32 %v2793_v19, %v924_v43  ;;  %v918_v21 = vor.u32 1.1754944e-38, %v917_v46  ;;  %v306_v50 = vadd.f32 %v3614_v39, %v3743_v24  ;;  %v4428_v46 = vld [vmem:[#allocation8_spill] sm:$0xff] }
 0x14d   :  { %v355_v38 = vadd.f32 %v4425_v57, %v3745_v29  ;;  %v308_v51 = vadd.f32 %v4428_v46, %v3743_v24  ;;  %v357_v39 = vadd.f32 %v4429_v15, %v3745_v29 }
 0x14e   :  { %v3803_v33 = vadd.f32 %v939_v7, %v937_v44  ;;  %v929_v43 = vsel %vm928_vm5, %v2793_v19, %v925_v11  ;;  %v919_v58 = vsel %vm916_vm6, %v918_v21, %v914_v53  ;;  %v4426_v44 = vld [vmem:[#allocation60_spill] sm:$0xff] }
 0x14f   :  { %v934_v56 = vsel %vm931_vm7, %v933_v31, %v929_v43  ;;  %v944_v0 = vmul.f32 %v2797_v5, %v919_v58  ;;  %v453_v11 = vadd.f32 %v4427_v32, %v4426_v44 }
 0x150   :  { %2798 = vtanh.f32 %v3803_v33 }
 0x156   :  { %v2799_v25 = vpop.eup %2798 }
 0x157   :  { %v945_v28 = vmul.f32 %v2799_v25, %v934_v56 }
 0x159   :  { %v955_v36 = vpack.c.bf16 %v945_v28, %v944_v0 }
 0x15b   :  { %964 = vmatmul.bf16.vlgmr.msra.gmra.mxu0 %v955_v36  ;;  %978 = vmatmul.bf16.vlgmr.msra.gmra.mxu1 %v955_v36 }
 0x15c   :  { %992 = vmatmul.bf16.vlgmr.msra.gmra.mxu2 %v955_v36  ;;  %1006 = vmatmul.bf16.vlgmr.msra.gmra.mxu3 %v955_v36 }
 0x15d   :  { %1356 = vmatpush.bf16.msra.mxu0 %v3257_v37  ;;  %1370 = vmatpush.bf16.msra.mxu1 %v3268_v41 }
 0x15e   :  { %1384 = vmatpush.bf16.msra.mxu2 %v3285_v47  ;;  %1398 = vmatpush.bf16.msra.mxu3 %v3288_v48 }
 0x161   :  { %1357 = vmatpush.bf16.msra.mxu0 %v3290_v49  ;;  %1371 = vmatpush.bf16.msra.mxu1 %v3299_v52 }
 0x162   :  { %1385 = vmatpush.bf16.msra.mxu2 %v3308_v55  ;;  %1399 = vmatpush.bf16.msra.mxu3 %v3321_v59 }
 0x165   :  { %1358 = vmatpush.bf16.msra.mxu0 %v3323_v60  ;;  %1372 = vmatpush.bf16.msra.mxu1 %v3332_v63 }
 0x166   :  { %1386 = vmatpush.bf16.msra.mxu2 %v3344_v3  ;;  %1400 = vmatpush.bf16.msra.mxu3 %v3348_v4 }
 0x169   :  { %1359 = vmatpush.bf16.msra.mxu0 %v3365_v9  ;;  %1373 = vmatpush.bf16.msra.mxu1 %v3376_v13 }
 0x16a   :  { %1387 = vmatpush.bf16.msra.mxu2 %v3387_v17  ;;  %1401 = vmatpush.bf16.msra.mxu3 %v3378_v14 }
 0x16d   :  { %1360 = vmatpush.bf16.msra.mxu0 %v3404_v22  ;;  %1374 = vmatpush.bf16.msra.mxu1 %v3415_v26 }
 0x16e   :  { %1388 = vmatpush.bf16.msra.mxu2 %v3426_v30  ;;  %1402 = vmatpush.bf16.msra.mxu3 %v3417_v27 }
 0x171   :  { %1361 = vmatpush.bf16.msra.mxu0 %v3443_v35  ;;  %1375 = vmatpush.bf16.msra.mxu1 %v3454_v40 }
 0x172   :  { %1389 = vmatpush.bf16.msra.mxu2 %v3465_v45  ;;  %1403 = vmatpush.bf16.msra.mxu3 %v3456_v42 }
 0x175   :  { %1362 = vmatpush.bf16.msra.mxu0 %v3482_v54  ;;  %1376 = vmatpush.bf16.msra.mxu1 %v3493_v61 }
 0x176   :  { %1390 = vmatpush.bf16.msra.mxu2 %v3504_v2  ;;  %1404 = vmatpush.bf16.msra.mxu3 %v3495_v62 }
 0x179   :  { %1363 = vmatpush.bf16.msra.mxu0 %v3521_v10  ;;  %1377 = vmatpush.bf16.msra.mxu1 %v3532_v16 }
 0x17a   :  { %1391 = vmatpush.bf16.msra.mxu2 %v3554_v23  ;;  %1405 = vmatpush.bf16.msra.mxu3 %v3534_v18 }
 0x1d8   :  { %v965_v19 = vpop.f32.mrf.mxu0  ;;  %v979_v12 = vpop.f32.mrf.mxu1 }
 0x1d9   :  { %v1012_v8 = vadd.f32 %v965_v19, %v306_v50  ;;  %v1013_v6 = vadd.f32 %v979_v12, %v355_v38  ;;  %v4430_v38 = vld [vmem:[#allocation62_spill] sm:$0xff] }
 0x1da   :  { %v4431_v19 = vld [vmem:[#allocation6_spill] sm:$0xff] }
 0x1db   :  { %v2653_v34 = vmul.f32 -1.442695, %v1012_v8  ;;  %v2655_v7 = vmul.f32 -1.442695, %v1013_v6  ;;  %v404_v12 = vadd.f32 %v4431_v19, %v4430_v38  ;;  %v4432_v8 = vld [vmem:[#allocation11_spill] sm:$0xff] }
 0x1dc   :  { %v455_v6 = vadd.f32 %v4432_v8, %v4426_v44 }
 0x1dd   :  { %2800 = vpow2.f32 %v2653_v34 }
 0x1de   :  { %2802 = vpow2.f32 %v2655_v7 }
 0x1df   :  { %v1007_v20 = vpop.f32.mrf.mxu3  ;;  %v993_v57 = vpop.f32.mrf.mxu2 }
 0x1e0   :  { %v1015_v53 = vadd.f32 %v1007_v20, %v453_v11  ;;  %v967_v43 = vpop.f32.mrf.mxu0  ;;  %v981_v5 = vpop.f32.mrf.mxu1  ;;  %v1014_v7 = vadd.f32 %v993_v57, %v404_v12 }
 0x1e1   :  { %v1016_v21 = vadd.f32 %v967_v43, %v308_v51  ;;  %v1017_v31 = vadd.f32 %v981_v5, %v357_v39 }
 0x1e2   :  { %v2657_v25 = vmul.f32 -1.442695, %v1015_v53 }
 0x1e3   :  { %v2801_v58 = vpop.eup %2800  ;;  %v2654_v56 = vmul.f32 -1.442695, %v1016_v21  ;;  %v2656_v36 = vmul.f32 -1.442695, %v1017_v31  ;;  %v4433_v31 = vld [vmem:[#allocation10_spill] sm:$0xff] }
 0x1e4   :  { %v2803_v0 = vpop.eup %2802  ;;  %v1026_v28 = vadd.f32 1.0, %v2801_v58  ;;  %2804 = vpow2.f32 %v2657_v25  ;;  %v406_v25 = vadd.f32 %v4433_v31, %v4430_v38 }
 0x1e5   :  { %v1064_v50 = vadd.f32 1.0, %v2803_v0  ;;  %2806 = vpow2.f32 %v2654_v56 }
 0x1e6   :  { %2808 = vrcp.f32 %v1026_v28  ;;  %v1037_v57 = vand.u32 2147483647, %v1026_v28  ;;  %v1039_v19 = vand.u32 2147483648, %v1026_v28  ;;  %vm1033_vm10 = vweird.f32 %v1026_v28 }
 0x1e7   :  { %2810 = vrcp.f32 %v1064_v50  ;;  %v1009_v34 = vpop.f32.mrf.mxu3  ;;  %v995_v0 = vpop.f32.mrf.mxu2  ;;  %v1077_v12 = vand.u32 2147483648, %v1064_v50  ;;  %vm1071_vm11 = vweird.f32 %v1064_v50 }
 0x1e8   :  { %2812 = vpow2.f32 %v2656_v36  ;;  %v1019_v32 = vadd.f32 %v1009_v34, %v455_v6  ;;  %v1075_v34 = vand.u32 2147483647, %v1064_v50  ;;  %vm1038_vm14 = vcmp.eq.f32.partialorder %v1037_v57, 8.507059e+37 }
 0x1e9   :  { %2814 = vtanh.f32 %v1014_v7  ;;  %v1018_v7 = vadd.f32 %v995_v0, %v406_v25 }
 0x1ea   :  { %v2805_v11 = vpop.eup %2804  ;;  %v2658_v20 = vmul.f32 -1.442695, %v1019_v32  ;;  %vm1076_vm15 = vcmp.eq.f32.partialorder %v1075_v34, 8.507059e+37 }
 0x1eb   :  { %v2807_v46 = vpop.eup %2806  ;;  %v3861_v51 = vadd.f32 1.0, %v2805_v11 }
 0x1ec   :  { %v2809_v15 = vpop.eup %2808  ;;  %v3863_v39 = vadd.f32 1.0, %v2807_v46 }
 0x1ed   :  { %v2811_v53 = vpop.eup %2810  ;;  %v1029_v43 = vmul.f32 %v2809_v15, %v1026_v28  ;;  %vm1034_vm8 = vweird.f32 %v2809_v15 }
 0x1ee   :  { %v2813_v5 = vpop.eup %2812  ;;  %v1067_v21 = vmul.f32 %v2811_v53, %v1064_v50  ;;  %2816 = vrcp.f32 %v3863_v39  ;;  %vm1072_vm9 = vweird.f32 %v2811_v53  ;;  %vm1035_vm12 = vmor %vm1033_vm10, %vm1034_vm8  ;;  %vm1048_vm1 = vweird.f32 %v3863_v39 }
 0x1ef   :  { %v1030_v58 = vsub.f32 1.0, %v1029_v43  ;;  %2818 = vrcp.f32 %v3861_v51  ;;  %v3869_v56 = vadd.f32 1.0, %v2813_v5  ;;  %v2815_v32 = vpop.eup %2814  ;;  %v1040_v43 = vor.u32 1.1754944e-38, %v1039_v19  ;;  %vm1073_vm13 = vmor %vm1071_vm11, %vm1072_vm9 }
 0x1f0   :  { %v1068_v36 = vsub.f32 1.0, %v1067_v21  ;;  %2820 = vpow2.f32 %v2658_v20  ;;  %v1078_v20 = vor.u32 1.1754944e-38, %v1077_v12  ;;  %v1052_v12 = vand.u32 2147483647, %v3863_v39 }
 0x1f1   :  { %v1031_v8 = vmul.f32 %v2809_v15, %v1030_v58  ;;  %2822 = vrcp.f32 %v3869_v56  ;;  %vm1086_vm5 = vweird.f32 %v3869_v56  ;;  %vm1111_vm9 = vweird.f32 %v3861_v51 }
 0x1f2   :  { %v1069_v6 = vmul.f32 %v2811_v53, %v1068_v36  ;;  %2824 = vtanh.f32 %v1018_v7  ;;  %vm1053_vm4 = vcmp.eq.f32.partialorder %v1052_v12, 8.507059e+37  ;;  %v1117_v12 = vand.u32 2147483648, %v3861_v51 }
 0x1f3   :  { %v1032_v11 = vadd.f32 %v2809_v15, %v1031_v8 }
 0x1f4   :  { %v2817_v46 = vpop.eup %2816  ;;  %v1070_v5 = vadd.f32 %v2811_v53, %v1069_v6 }
 0x1f5   :  { %v3872_v21 = vpop.eup %2818  ;;  %v1036_v31 = vsel %vm1035_vm12, %v2809_v15, %v1032_v11  ;;  %v1044_v58 = vmul.f32 %v2817_v46, %v3863_v39  ;;  %v1054_v15 = vand.u32 2147483648, %v3863_v39  ;;  %vm1049_vm0 = vweird.f32 %v2817_v46 }
 0x1f6   :  { %v2821_v36 = vpop.eup %2820  ;;  %v1041_v38 = vsel %vm1038_vm14, %v1040_v43, %v1036_v31  ;;  %v1074_v44 = vsel %vm1073_vm13, %v2811_v53, %v1070_v5  ;;  %v1107_v57 = vmul.f32 %v3872_v21, %v3861_v51  ;;  %vm1050_vm3 = vmor %vm1048_vm1, %vm1049_vm0  ;;  %v1090_v43 = vand.u32 2147483647, %v3869_v56 }
 0x1f7   :  { %v2823_v25 = vpop.eup %2822  ;;  %v1079_v28 = vsel %vm1076_vm15, %v1078_v20, %v1074_v44  ;;  %v1138_v0 = vmul.f32 %v2815_v32, %v1041_v38  ;;  %v1045_v50 = vsub.f32 1.0, %v1044_v58  ;;  %v1105_v8 = vadd.f32 1.0, %v2821_v36 }
 0x1f8   :  { %v1136_v19 = vmul.f32 %v1079_v28, %v3790_v1  ;;  %v1082_v6 = vmul.f32 %v2823_v25, %v3869_v56  ;;  %v1092_v38 = vand.u32 2147483648, %v3869_v56  ;;  %v2825_v1 = vpop.eup %2824  ;;  %vm1087_vm2 = vweird.f32 %v2823_v25 }
 0x1f9   :  { %v1046_v11 = vmul.f32 %v2817_v46, %v1045_v50  ;;  %2826 = vrcp.f32 %v1105_v8  ;;  %v1055_v32 = vor.u32 1.1754944e-38, %v1054_v15  ;;  %v1108_v5 = vsub.f32 1.0, %v1107_v57  ;;  %vm1088_vm6 = vmor %vm1086_vm5, %vm1087_vm2 }
 0x1fa   :  { %v3881_v53 = vadd.f32 %v1138_v0, %v1136_v19  ;;  %v1083_v44 = vsub.f32 1.0, %v1082_v6  ;;  %v1093_v28 = vor.u32 1.1754944e-38, %v1092_v38  ;;  %vm1091_vm7 = vcmp.eq.f32.partialorder %v1090_v43, 8.507059e+37 }
 0x1fb   :  { %v1047_v34 = vadd.f32 %v2817_v46, %v1046_v11  ;;  %v1109_v19 = vmul.f32 %v3872_v21, %v1108_v5  ;;  %vm1112_vm8 = vweird.f32 %v3872_v21  ;;  %vm1126_vm11 = vweird.f32 %v1105_v8 }
 0x1fc   :  { %v1084_v7 = vmul.f32 %v2823_v25, %v1083_v44  ;;  %2828 = vtanh.f32 %v3881_v53  ;;  %v1132_v44 = vand.u32 2147483648, %v1105_v8  ;;  %vm1113_vm12 = vmor %vm1111_vm9, %vm1112_vm8  ;;  %v1130_v38 = vand.u32 2147483647, %v1105_v8 }
 0x1fd   :  { %v1051_v20 = vsel %vm1050_vm3, %v2817_v46, %v1047_v34 }
 0x1fe   :  { %v1056_v31 = vsel %vm1053_vm4, %v1055_v32, %v1051_v20  ;;  %v1085_v58 = vadd.f32 %v2823_v25, %v1084_v7  ;;  %v1118_v32 = vor.u32 1.1754944e-38, %v1117_v12  ;;  %v1133_v43 = vor.u32 1.1754944e-38, %v1132_v44 }
 0x1ff   :  { %v2827_v36 = vpop.eup %2826  ;;  %v1139_v39 = vmul.f32 %v2825_v1, %v1056_v31  ;;  %vm1131_vm15 = vcmp.eq.f32.partialorder %v1130_v38, 8.507059e+37 }
 0x200   :  { %v1089_v0 = vsel %vm1088_vm6, %v2823_v25, %v1085_v58  ;;  %v1122_v50 = vmul.f32 %v2827_v36, %v1105_v8  ;;  %v1110_v25 = vadd.f32 %v3872_v21, %v1109_v19  ;;  %vm1127_vm10 = vweird.f32 %v2827_v36  ;;  %v4435_v8 = vld [vmem:[#allocation13_spill] sm:$0xff] }
 0x201   :  { %v1094_v6 = vsel %vm1091_vm7, %v1093_v28, %v1089_v0  ;;  %vm1128_vm13 = vmor %vm1126_vm11, %vm1127_vm10 }
 0x202   :  { %v1137_v15 = vmul.f32 %v1094_v6, %v3803_v33  ;;  %v1123_v11 = vsub.f32 1.0, %v1122_v50  ;;  %v1115_v33 = vand.u32 2147483647, %v3861_v51  ;;  %v1114_v34 = vsel %vm1113_vm12, %v3872_v21, %v1110_v25  ;;  %v2829_v7 = vpop.eup %2828  ;;  %v4434_v51 = vld [vmem:[#allocation12_spill] sm:$0xff]  ;;  %v4437_v25 = vld [vmem:[#allocation15_spill] sm:$0xff] }
 0x203   :  { %v311_v21 = vadd.f32 %v4434_v51, %v3743_v24 }
 0x204   :  { %v3890_v46 = vadd.f32 %v1139_v39, %v1137_v15  ;;  %v1124_v56 = vmul.f32 %v2827_v36, %v1123_v11  ;;  %vm1116_vm14 = vcmp.eq.f32.partialorder %v1115_v33, 8.507059e+37  ;;  %v4439_v33 = vld [vmem:[#allocation17_spill] sm:$0xff] }
 0x205   :  { %v1119_v20 = vsel %vm1116_vm14, %v1118_v32, %v1114_v34  ;;  %v362_v38 = vadd.f32 %v4439_v33, %v3745_v29 }
 0x206   :  { %2830 = vtanh.f32 %v3890_v46  ;;  %v1125_v57 = vadd.f32 %v2827_v36, %v1124_v56  ;;  %v1144_v58 = vmul.f32 %v2829_v7, %v1119_v20  ;;  %v4436_v56 = vld [vmem:[#allocation60_spill] sm:$0xff] }
 0x207   :  { %v458_v12 = vadd.f32 %v4437_v25, %v4436_v56 }
 0x208   :  { %v1129_v1 = vsel %vm1128_vm13, %v2827_v36, %v1125_v57  ;;  %v360_v36 = vadd.f32 %v4435_v8, %v3745_v29  ;;  %v4438_v57 = vld [vmem:[#allocation16_spill] sm:$0xff] }
 0x209   :  { %v1134_v31 = vsel %vm1131_vm15, %v1133_v43, %v1129_v1  ;;  %v313_v44 = vadd.f32 %v4438_v57, %v3743_v24 }
 0x20c   :  { %v2831_v5 = vpop.eup %2830 }
 0x20d   :  { %v1145_v28 = vmul.f32 %v2831_v5, %v1134_v31 }
 0x20f   :  { %v1155_v0 = vpack.c.bf16 %v1145_v28, %v1144_v58 }
 0x211   :  { %1164 = vmatmul.bf16.vlgmr.msrb.gmra.mxu0 %v1155_v0  ;;  %1178 = vmatmul.bf16.vlgmr.msrb.gmra.mxu1 %v1155_v0 }
 0x212   :  { %1192 = vmatmul.bf16.vlgmr.msrb.gmra.mxu2 %v1155_v0  ;;  %1206 = vmatmul.bf16.vlgmr.msrb.gmra.mxu3 %v1155_v0 }
 0x213   :  { %1556 = vmatpush.bf16.msrb.mxu0 %v3257_v37  ;;  %1570 = vmatpush.bf16.msrb.mxu1 %v3268_v41 }
 0x214   :  { %1584 = vmatpush.bf16.msrb.mxu2 %v3285_v47  ;;  %1598 = vmatpush.bf16.msrb.mxu3 %v3288_v48 }
 0x217   :  { %1557 = vmatpush.bf16.msrb.mxu0 %v3290_v49  ;;  %1571 = vmatpush.bf16.msrb.mxu1 %v3299_v52 }
 0x218   :  { %1585 = vmatpush.bf16.msrb.mxu2 %v3308_v55  ;;  %1599 = vmatpush.bf16.msrb.mxu3 %v3321_v59 }
 0x21b   :  { %1558 = vmatpush.bf16.msrb.mxu0 %v3323_v60  ;;  %1572 = vmatpush.bf16.msrb.mxu1 %v3332_v63 }
 0x21c   :  { %1586 = vmatpush.bf16.msrb.mxu2 %v3344_v3  ;;  %1600 = vmatpush.bf16.msrb.mxu3 %v3348_v4 }
 0x21f   :  { %1559 = vmatpush.bf16.msrb.mxu0 %v3365_v9  ;;  %1573 = vmatpush.bf16.msrb.mxu1 %v3376_v13 }
 0x220   :  { %1587 = vmatpush.bf16.msrb.mxu2 %v3387_v17  ;;  %1601 = vmatpush.bf16.msrb.mxu3 %v3378_v14 }
 0x223   :  { %1560 = vmatpush.bf16.msrb.mxu0 %v3404_v22  ;;  %1574 = vmatpush.bf16.msrb.mxu1 %v3415_v26 }
 0x224   :  { %1588 = vmatpush.bf16.msrb.mxu2 %v3426_v30  ;;  %1602 = vmatpush.bf16.msrb.mxu3 %v3417_v27 }
 0x227   :  { %1561 = vmatpush.bf16.msrb.mxu0 %v3443_v35  ;;  %1575 = vmatpush.bf16.msrb.mxu1 %v3454_v40 }
 0x228   :  { %1589 = vmatpush.bf16.msrb.mxu2 %v3465_v45  ;;  %1603 = vmatpush.bf16.msrb.mxu3 %v3456_v42 }
 0x22b   :  { %1562 = vmatpush.bf16.msrb.mxu0 %v3482_v54  ;;  %1576 = vmatpush.bf16.msrb.mxu1 %v3493_v61 }
 0x22c   :  { %1590 = vmatpush.bf16.msrb.mxu2 %v3504_v2  ;;  %1604 = vmatpush.bf16.msrb.mxu3 %v3495_v62 }
 0x22f   :  { %1563 = vmatpush.bf16.msrb.mxu0 %v3521_v10  ;;  %1577 = vmatpush.bf16.msrb.mxu1 %v3532_v16 }
 0x230   :  { %1591 = vmatpush.bf16.msrb.mxu2 %v3554_v23  ;;  %1605 = vmatpush.bf16.msrb.mxu3 %v3534_v18 }
 0x28e   :  { %v1165_v39 = vpop.f32.mrf.mxu0  ;;  %v1179_v50 = vpop.f32.mrf.mxu1 }
 0x28f   :  { %v1212_v19 = vadd.f32 %v1165_v39, %v311_v21  ;;  %v1213_v6 = vadd.f32 %v1179_v50, %v360_v36  ;;  %v4440_v36 = vld [vmem:[#allocation62_spill] sm:$0xff] }
 0x290   :  { %v4441_v39 = vld [vmem:[#allocation14_spill] sm:$0xff] }
 0x291   :  { %v2659_v15 = vmul.f32 -1.442695, %v1212_v19  ;;  %v2661_v11 = vmul.f32 -1.442695, %v1213_v6  ;;  %v409_v50 = vadd.f32 %v4441_v39, %v4440_v36  ;;  %v4442_v19 = vld [vmem:[#allocation19_spill] sm:$0xff] }
 0x292   :  { %v460_v6 = vadd.f32 %v4442_v19, %v4436_v56 }
 0x293   :  { %2832 = vpow2.f32 %v2659_v15 }
 0x294   :  { %2834 = vpow2.f32 %v2661_v11 }
 0x295   :  { %v1207_v34 = vpop.f32.mrf.mxu3  ;;  %v1193_v8 = vpop.f32.mrf.mxu2 }
 0x296   :  { %v1215_v1 = vadd.f32 %v1207_v34, %v458_v12  ;;  %v1167_v7 = vpop.f32.mrf.mxu0  ;;  %v1181_v32 = vpop.f32.mrf.mxu1  ;;  %v1214_v11 = vadd.f32 %v1193_v8, %v409_v50 }
 0x297   :  { %v1216_v43 = vadd.f32 %v1167_v7, %v313_v44  ;;  %v1217_v5 = vadd.f32 %v1181_v32, %v362_v38 }
 0x298   :  { %v2663_v20 = vmul.f32 -1.442695, %v1215_v1 }
 0x299   :  { %v2833_v31 = vpop.eup %2832  ;;  %v2660_v58 = vmul.f32 -1.442695, %v1216_v43  ;;  %v2662_v51 = vmul.f32 -1.442695, %v1217_v5  ;;  %v4443_v5 = vld [vmem:[#allocation18_spill] sm:$0xff] }
 0x29a   :  { %v2835_v28 = vpop.eup %2834  ;;  %v1226_v0 = vadd.f32 1.0, %v2833_v31  ;;  %2836 = vpow2.f32 %v2663_v20  ;;  %v411_v20 = vadd.f32 %v4443_v5, %v4440_v36 }
 0x29b   :  { %v1264_v21 = vadd.f32 1.0, %v2835_v28  ;;  %2838 = vpow2.f32 %v2660_v58 }
 0x29c   :  { %2840 = vrcp.f32 %v1226_v0  ;;  %v1237_v8 = vand.u32 2147483647, %v1226_v0  ;;  %v1239_v39 = vand.u32 2147483648, %v1226_v0  ;;  %vm1233_vm2 = vweird.f32 %v1226_v0 }
 0x29d   :  { %2842 = vrcp.f32 %v1264_v21  ;;  %v1209_v15 = vpop.f32.mrf.mxu3  ;;  %v1195_v28 = vpop.f32.mrf.mxu2  ;;  %v1277_v50 = vand.u32 2147483648, %v1264_v21  ;;  %vm1271_vm3 = vweird.f32 %v1264_v21 }
 0x29e   :  { %2844 = vpow2.f32 %v2662_v51  ;;  %v1219_v25 = vadd.f32 %v1209_v15, %v460_v6  ;;  %v1275_v15 = vand.u32 2147483647, %v1264_v21  ;;  %vm1238_vm6 = vcmp.eq.f32.partialorder %v1237_v8, 8.507059e+37 }
 0x29f   :  { %2846 = vtanh.f32 %v1214_v11  ;;  %v1218_v11 = vadd.f32 %v1195_v28, %v411_v20 }
 0x2a0   :  { %v2837_v12 = vpop.eup %2836  ;;  %v2664_v34 = vmul.f32 -1.442695, %v1219_v25  ;;  %vm1276_vm7 = vcmp.eq.f32.partialorder %v1275_v15, 8.507059e+37 }
 0x2a1   :  { %v2839_v57 = vpop.eup %2838  ;;  %v3945_v44 = vadd.f32 1.0, %v2837_v12 }
 0x2a2   :  { %v2841_v33 = vpop.eup %2840  ;;  %v3947_v38 = vadd.f32 1.0, %v2839_v57 }
 0x2a3   :  { %v2843_v1 = vpop.eup %2842  ;;  %v1229_v7 = vmul.f32 %v2841_v33, %v1226_v0  ;;  %vm1234_vm0 = vweird.f32 %v2841_v33 }
 0x2a4   :  { %v2845_v32 = vpop.eup %2844  ;;  %v1267_v43 = vmul.f32 %v2843_v1, %v1264_v21  ;;  %2848 = vrcp.f32 %v3947_v38  ;;  %vm1272_vm1 = vweird.f32 %v2843_v1  ;;  %vm1235_vm4 = vmor %vm1233_vm2, %vm1234_vm0  ;;  %vm1248_vm9 = vweird.f32 %v3947_v38 }
 0x2a5   :  { %v1230_v31 = vsub.f32 1.0, %v1229_v7  ;;  %2850 = vrcp.f32 %v3945_v44  ;;  %v3953_v58 = vadd.f32 1.0, %v2845_v32  ;;  %v2847_v25 = vpop.eup %2846  ;;  %v1240_v7 = vor.u32 1.1754944e-38, %v1239_v39  ;;  %vm1273_vm5 = vmor %vm1271_vm3, %vm1272_vm1 }
 0x2a6   :  { %v1268_v51 = vsub.f32 1.0, %v1267_v43  ;;  %2852 = vpow2.f32 %v2664_v34  ;;  %v1278_v34 = vor.u32 1.1754944e-38, %v1277_v50  ;;  %v1252_v50 = vand.u32 2147483647, %v3947_v38 }
 0x2a7   :  { %v1231_v19 = vmul.f32 %v2841_v33, %v1230_v31  ;;  %2854 = vrcp.f32 %v3953_v58  ;;  %vm1286_vm13 = vweird.f32 %v3953_v58  ;;  %vm1311_vm1 = vweird.f32 %v3945_v44 }
 0x2a8   :  { %v1269_v6 = vmul.f32 %v2843_v1, %v1268_v51  ;;  %2856 = vtanh.f32 %v1218_v11  ;;  %vm1253_vm12 = vcmp.eq.f32.partialorder %v1252_v50, 8.507059e+37  ;;  %v1317_v50 = vand.u32 2147483648, %v3945_v44 }
 0x2a9   :  { %v1232_v12 = vadd.f32 %v2841_v33, %v1231_v19 }
 0x2aa   :  { %v2849_v57 = vpop.eup %2848  ;;  %v1270_v32 = vadd.f32 %v2843_v1, %v1269_v6 }
 0x2ab   :  { %v3956_v43 = vpop.eup %2850  ;;  %v1236_v5 = vsel %vm1235_vm4, %v2841_v33, %v1232_v12  ;;  %v1244_v31 = vmul.f32 %v2849_v57, %v3947_v38  ;;  %v1254_v33 = vand.u32 2147483648, %v3947_v38  ;;  %vm1249_vm8 = vweird.f32 %v2849_v57 }
 0x2ac   :  { %v2853_v51 = vpop.eup %2852  ;;  %v1241_v36 = vsel %vm1238_vm6, %v1240_v7, %v1236_v5  ;;  %v1274_v56 = vsel %vm1273_vm5, %v2843_v1, %v1270_v32  ;;  %v1307_v8 = vmul.f32 %v3956_v43, %v3945_v44  ;;  %vm1250_vm11 = vmor %vm1248_vm9, %vm1249_vm8  ;;  %v1290_v7 = vand.u32 2147483647, %v3953_v58 }
 0x2ad   :  { %v2855_v20 = vpop.eup %2854  ;;  %v1279_v0 = vsel %vm1276_vm7, %v1278_v34, %v1274_v56  ;;  %v1338_v28 = vmul.f32 %v2847_v25, %v1241_v36  ;;  %v1245_v21 = vsub.f32 1.0, %v1244_v31  ;;  %v1305_v19 = vadd.f32 1.0, %v2853_v51 }
 0x2ae   :  { %v1336_v39 = vmul.f32 %v1279_v0, %v3881_v53  ;;  %v1282_v6 = vmul.f32 %v2855_v20, %v3953_v58  ;;  %v1292_v36 = vand.u32 2147483648, %v3953_v58  ;;  %v2857_v53 = vpop.eup %2856  ;;  %vm1287_vm10 = vweird.f32 %v2855_v20 }
 0x2af   :  { %v1246_v12 = vmul.f32 %v2849_v57, %v1245_v21  ;;  %2858 = vrcp.f32 %v1305_v19  ;;  %v1255_v25 = vor.u32 1.1754944e-38, %v1254_v33  ;;  %v1308_v32 = vsub.f32 1.0, %v1307_v8  ;;  %vm1288_vm14 = vmor %vm1286_vm13, %vm1287_vm10 }
 0x2b0   :  { %v3965_v1 = vadd.f32 %v1338_v28, %v1336_v39  ;;  %v1283_v56 = vsub.f32 1.0, %v1282_v6  ;;  %v1293_v0 = vor.u32 1.1754944e-38, %v1292_v36  ;;  %vm1291_vm15 = vcmp.eq.f32.partialorder %v1290_v7, 8.507059e+37 }
 0x2b1   :  { %v1247_v15 = vadd.f32 %v2849_v57, %v1246_v12  ;;  %v1309_v39 = vmul.f32 %v3956_v43, %v1308_v32  ;;  %vm1312_vm0 = vweird.f32 %v3956_v43  ;;  %vm1326_vm3 = vweird.f32 %v1305_v19 }
 0x2b2   :  { %v1284_v11 = vmul.f32 %v2855_v20, %v1283_v56  ;;  %2860 = vtanh.f32 %v3965_v1  ;;  %v1332_v56 = vand.u32 2147483648, %v1305_v19  ;;  %vm1313_vm4 = vmor %vm1311_vm1, %vm1312_vm0  ;;  %v1330_v36 = vand.u32 2147483647, %v1305_v19 }
 0x2b3   :  { %v1251_v34 = vsel %vm1250_vm11, %v2849_v57, %v1247_v15 }
 0x2b4   :  { %v1256_v5 = vsel %vm1253_vm12, %v1255_v25, %v1251_v34  ;;  %v1285_v31 = vadd.f32 %v2855_v20, %v1284_v11  ;;  %v1318_v25 = vor.u32 1.1754944e-38, %v1317_v50  ;;  %v1333_v7 = vor.u32 1.1754944e-38, %v1332_v56 }
 0x2b5   :  { %v2859_v51 = vpop.eup %2858  ;;  %v1339_v38 = vmul.f32 %v2857_v53, %v1256_v5  ;;  %vm1331_vm7 = vcmp.eq.f32.partialorder %v1330_v36, 8.507059e+37 }
 0x2b6   :  { %v1289_v28 = vsel %vm1288_vm14, %v2855_v20, %v1285_v31  ;;  %v1322_v21 = vmul.f32 %v2859_v51, %v1305_v19  ;;  %v1310_v20 = vadd.f32 %v3956_v43, %v1309_v39  ;;  %vm1327_vm2 = vweird.f32 %v2859_v51  ;;  %v4445_v19 = vld [vmem:[#allocation21_spill] sm:$0xff] }
 0x2b7   :  { %v1294_v6 = vsel %vm1291_vm15, %v1293_v0, %v1289_v28  ;;  %vm1328_vm5 = vmor %vm1326_vm3, %vm1327_vm2 }
 0x2b8   :  { %v1337_v33 = vmul.f32 %v1294_v6, %v3890_v46  ;;  %v1323_v12 = vsub.f32 1.0, %v1322_v21  ;;  %v1315_v46 = vand.u32 2147483647, %v3945_v44  ;;  %v1314_v15 = vsel %vm1313_vm4, %v3956_v43, %v1310_v20  ;;  %v2861_v11 = vpop.eup %2860  ;;  %v4444_v44 = vld [vmem:[#allocation20_spill] sm:$0xff]  ;;  %v4447_v20 = vld [vmem:[#allocation23_spill] sm:$0xff] }
 0x2b9   :  { %v316_v43 = vadd.f32 %v4444_v44, %v3743_v24 }
 0x2ba   :  { %v3974_v57 = vadd.f32 %v1339_v38, %v1337_v33  ;;  %v1324_v58 = vmul.f32 %v2859_v51, %v1323_v12  ;;  %vm1316_vm6 = vcmp.eq.f32.partialorder %v1315_v46, 8.507059e+37  ;;  %v4449_v46 = vld [vmem:[#allocation25_spill] sm:$0xff] }
 0x2bb   :  { %v1319_v34 = vsel %vm1316_vm6, %v1318_v25, %v1314_v15  ;;  %v367_v36 = vadd.f32 %v4449_v46, %v3745_v29 }
 0x2bc   :  { %2862 = vtanh.f32 %v3974_v57  ;;  %v1325_v8 = vadd.f32 %v2859_v51, %v1324_v58  ;;  %v1344_v31 = vmul.f32 %v2861_v11, %v1319_v34  ;;  %v4446_v58 = vld [vmem:[#allocation60_spill] sm:$0xff] }
 0x2bd   :  { %v463_v50 = vadd.f32 %v4447_v20, %v4446_v58 }
 0x2be   :  { %v1329_v53 = vsel %vm1328_vm5, %v2859_v51, %v1325_v8  ;;  %v365_v51 = vadd.f32 %v4445_v19, %v3745_v29  ;;  %v4448_v8 = vld [vmem:[#allocation24_spill] sm:$0xff] }
 0x2bf   :  { %v1334_v5 = vsel %vm1331_vm7, %v1333_v7, %v1329_v53  ;;  %v318_v56 = vadd.f32 %v4448_v8, %v3743_v24 }
 0x2c2   :  { %v2863_v32 = vpop.eup %2862 }
 0x2c3   :  { %v1345_v0 = vmul.f32 %v2863_v32, %v1334_v5 }
 0x2c5   :  { %v1355_v28 = vpack.c.bf16 %v1345_v0, %v1344_v31 }
 0x2c7   :  { %1364 = vmatmul.bf16.vlgmr.msra.gmra.mxu0 %v1355_v28  ;;  %1378 = vmatmul.bf16.vlgmr.msra.gmra.mxu1 %v1355_v28 }
 0x2c8   :  { %1392 = vmatmul.bf16.vlgmr.msra.gmra.mxu2 %v1355_v28  ;;  %1406 = vmatmul.bf16.vlgmr.msra.gmra.mxu3 %v1355_v28 }
 0x2c9   :  { %1756 = vmatpush.bf16.msra.mxu0 %v3257_v37  ;;  %1770 = vmatpush.bf16.msra.mxu1 %v3268_v41 }
 0x2ca   :  { %1784 = vmatpush.bf16.msra.mxu2 %v3285_v47  ;;  %1798 = vmatpush.bf16.msra.mxu3 %v3288_v48 }
 0x2cd   :  { %1757 = vmatpush.bf16.msra.mxu0 %v3290_v49  ;;  %1771 = vmatpush.bf16.msra.mxu1 %v3299_v52 }
 0x2ce   :  { %1785 = vmatpush.bf16.msra.mxu2 %v3308_v55  ;;  %1799 = vmatpush.bf16.msra.mxu3 %v3321_v59 }
 0x2d1   :  { %1758 = vmatpush.bf16.msra.mxu0 %v3323_v60  ;;  %1772 = vmatpush.bf16.msra.mxu1 %v3332_v63 }
 0x2d2   :  { %1786 = vmatpush.bf16.msra.mxu2 %v3344_v3  ;;  %1800 = vmatpush.bf16.msra.mxu3 %v3348_v4 }
 0x2d5   :  { %1759 = vmatpush.bf16.msra.mxu0 %v3365_v9  ;;  %1773 = vmatpush.bf16.msra.mxu1 %v3376_v13 }
 0x2d6   :  { %1787 = vmatpush.bf16.msra.mxu2 %v3387_v17  ;;  %1801 = vmatpush.bf16.msra.mxu3 %v3378_v14 }
 0x2d9   :  { %1760 = vmatpush.bf16.msra.mxu0 %v3404_v22  ;;  %1774 = vmatpush.bf16.msra.mxu1 %v3415_v26 }
 0x2da   :  { %1788 = vmatpush.bf16.msra.mxu2 %v3426_v30  ;;  %1802 = vmatpush.bf16.msra.mxu3 %v3417_v27 }
 0x2dd   :  { %1761 = vmatpush.bf16.msra.mxu0 %v3443_v35  ;;  %1775 = vmatpush.bf16.msra.mxu1 %v3454_v40 }
 0x2de   :  { %1789 = vmatpush.bf16.msra.mxu2 %v3465_v45  ;;  %1803 = vmatpush.bf16.msra.mxu3 %v3456_v42 }
 0x2e1   :  { %1762 = vmatpush.bf16.msra.mxu0 %v3482_v54  ;;  %1776 = vmatpush.bf16.msra.mxu1 %v3493_v61 }
 0x2e2   :  { %1790 = vmatpush.bf16.msra.mxu2 %v3504_v2  ;;  %1804 = vmatpush.bf16.msra.mxu3 %v3495_v62 }
 0x2e5   :  { %1763 = vmatpush.bf16.msra.mxu0 %v3521_v10  ;;  %1777 = vmatpush.bf16.msra.mxu1 %v3532_v16 }
 0x2e6   :  { %1791 = vmatpush.bf16.msra.mxu2 %v3554_v23  ;;  %1805 = vmatpush.bf16.msra.mxu3 %v3534_v18 }
 0x344   :  { %v1365_v38 = vpop.f32.mrf.mxu0  ;;  %v1379_v21 = vpop.f32.mrf.mxu1 }
 0x345   :  { %v1412_v39 = vadd.f32 %v1365_v38, %v316_v43  ;;  %v1413_v6 = vadd.f32 %v1379_v21, %v365_v51  ;;  %v4450_v51 = vld [vmem:[#allocation62_spill] sm:$0xff] }
 0x346   :  { %v4451_v38 = vld [vmem:[#allocation22_spill] sm:$0xff] }
 0x347   :  { %v2665_v33 = vmul.f32 -1.442695, %v1412_v39  ;;  %v2667_v12 = vmul.f32 -1.442695, %v1413_v6  ;;  %v414_v21 = vadd.f32 %v4451_v38, %v4450_v51  ;;  %v4452_v6 = vld [vmem:[#allocation27_spill] sm:$0xff] }
 0x349   :  { %2864 = vpow2.f32 %v2665_v33  ;;  %v465_v33 = vadd.f32 %v4452_v6, %v4446_v58  ;;  %v4453_v6 = vld [vmem:[#allocation26_spill] sm:$0xff] }
 0x34a   :  { %2866 = vpow2.f32 %v2667_v12 }
 0x34b   :  { %v1407_v15 = vpop.f32.mrf.mxu3  ;;  %v1393_v19 = vpop.f32.mrf.mxu2 }
 0x34c   :  { %v1415_v53 = vadd.f32 %v1407_v15, %v463_v50  ;;  %v1367_v11 = vpop.f32.mrf.mxu0  ;;  %v1381_v25 = vpop.f32.mrf.mxu1  ;;  %v1414_v20 = vadd.f32 %v1393_v19, %v414_v21 }
 0x34d   :  { %v1416_v7 = vadd.f32 %v1367_v11, %v318_v56  ;;  %v1417_v32 = vadd.f32 %v1381_v25, %v367_v36 }
 0x34e   :  { %v2669_v34 = vmul.f32 -1.442695, %v1415_v53 }
 0x34f   :  { %v2865_v5 = vpop.eup %2864  ;;  %v2666_v31 = vmul.f32 -1.442695, %v1416_v7  ;;  %v2668_v44 = vmul.f32 -1.442695, %v1417_v32 }
 0x350   :  { %v2867_v0 = vpop.eup %2866  ;;  %v1426_v28 = vadd.f32 1.0, %v2865_v5  ;;  %2868 = vpow2.f32 %v2669_v34 }
 0x351   :  { %v1464_v43 = vadd.f32 1.0, %v2867_v0  ;;  %2870 = vpow2.f32 %v2666_v31 }
 0x352   :  { %2872 = vrcp.f32 %v1426_v28  ;;  %v1437_v31 = vand.u32 2147483647, %v1426_v28  ;;  %v1439_v0 = vand.u32 2147483648, %v1426_v28  ;;  %vm1433_vm10 = vweird.f32 %v1426_v28 }
 0x353   :  { %2874 = vrcp.f32 %v1464_v43  ;;  %v1409_v39 = vpop.f32.mrf.mxu3  ;;  %v1475_v21 = vand.u32 2147483647, %v1464_v43  ;;  %vm1471_vm11 = vweird.f32 %v1464_v43 }
 0x354   :  { %2876 = vpow2.f32 %v2668_v44  ;;  %v1419_v8 = vadd.f32 %v1409_v39, %v465_v33  ;;  %v1477_v44 = vand.u32 2147483648, %v1464_v43  ;;  %v1395_v39 = vpop.f32.mrf.mxu2  ;;  %v416_v33 = vadd.f32 %v4453_v6, %v4450_v51 }
 0x355   :  { %2878 = vtanh.f32 %v1414_v20  ;;  %vm1438_vm14 = vcmp.eq.f32.partialorder %v1437_v31, 8.507059e+37  ;;  %vm1476_vm15 = vcmp.eq.f32.partialorder %v1475_v21, 8.507059e+37 }
 0x356   :  { %v2869_v12 = vpop.eup %2868  ;;  %v2670_v34 = vmul.f32 -1.442695, %v1419_v8 }
 0x357   :  { %v2871_v50 = vpop.eup %2870  ;;  %v4029_v46 = vadd.f32 1.0, %v2869_v12 }
 0x358   :  { %v2873_v56 = vpop.eup %2872  ;;  %v4031_v36 = vadd.f32 1.0, %v2871_v50  ;;  %v1440_v50 = vor.u32 1.1754944e-38, %v1439_v0 }
 0x359   :  { %v2875_v15 = vpop.eup %2874  ;;  %v1429_v53 = vmul.f32 %v2873_v56, %v1426_v28  ;;  %vm1434_vm8 = vweird.f32 %v2873_v56 }
 0x35a   :  { %v2877_v11 = vpop.eup %2876  ;;  %v1467_v25 = vmul.f32 %v2875_v15, %v1464_v43  ;;  %2880 = vrcp.f32 %v4031_v36  ;;  %vm1472_vm9 = vweird.f32 %v2875_v15  ;;  %vm1435_vm12 = vmor %vm1433_vm10, %vm1434_vm8  ;;  %v1452_v31 = vand.u32 2147483647, %v4031_v36 }
 0x35b   :  { %v1430_v7 = vsub.f32 1.0, %v1429_v53  ;;  %v4034_v32 = vadd.f32 1.0, %v2877_v11  ;;  %2882 = vrcp.f32 %v4029_v46  ;;  %v2879_v20 = vpop.eup %2878  ;;  %vm1473_vm13 = vmor %vm1471_vm11, %vm1472_vm9  ;;  %v1478_v11 = vor.u32 1.1754944e-38, %v1477_v44 }
 0x35c   :  { %v1468_v5 = vsub.f32 1.0, %v1467_v25  ;;  %v1454_v44 = vand.u32 2147483648, %v4031_v36  ;;  %vm1448_vm1 = vweird.f32 %v4031_v36  ;;  %vm1453_vm5 = vcmp.eq.f32.partialorder %v1452_v31, 8.507059e+37 }
 0x35d   :  { %v1431_v19 = vmul.f32 %v2873_v56, %v1430_v7  ;;  %2884 = vrcp.f32 %v4034_v32  ;;  %v1418_v7 = vadd.f32 %v1395_v39, %v416_v33  ;;  %vm1486_vm3 = vweird.f32 %v4034_v32 }
 0x35e   :  { %v1469_v38 = vmul.f32 %v2875_v15, %v1468_v5  ;;  %2886 = vpow2.f32 %v2670_v34  ;;  %vm1511_vm9 = vweird.f32 %v4029_v46 }
 0x35f   :  { %v1432_v12 = vadd.f32 %v2873_v56, %v1431_v19  ;;  %2888 = vtanh.f32 %v1418_v7 }
 0x360   :  { %v1470_v8 = vadd.f32 %v2875_v15, %v1469_v38  ;;  %v2881_v53 = vpop.eup %2880 }
 0x361   :  { %v1436_v25 = vsel %vm1435_vm12, %v2873_v56, %v1432_v12  ;;  %v4040_v5 = vpop.eup %2882  ;;  %v1444_v19 = vmul.f32 %v2881_v53, %v4031_v36  ;;  %vm1449_vm0 = vweird.f32 %v2881_v53  ;;  %v1490_v12 = vand.u32 2147483647, %v4034_v32 }
 0x362   :  { %v1441_v58 = vsel %vm1438_vm14, %v1440_v50, %v1436_v25  ;;  %v1474_v29 = vsel %vm1473_vm13, %v2875_v15, %v1470_v8  ;;  %v1507_v56 = vmul.f32 %v4040_v5, %v4029_v46  ;;  %vm1450_vm4 = vmor %vm1448_vm1, %vm1449_vm0  ;;  %vm1512_vm8 = vweird.f32 %v4040_v5 }
 0x363   :  { %v2885_v28 = vpop.eup %2884  ;;  %v1479_v34 = vsel %vm1476_vm15, %v1478_v11, %v1474_v29  ;;  %v1538_v6 = vmul.f32 %v2879_v20, %v1441_v58  ;;  %v1445_v0 = vsub.f32 1.0, %v1444_v19  ;;  %v1492_v29 = vand.u32 2147483648, %v4034_v32  ;;  %vm1513_vm11 = vmor %vm1511_vm9, %vm1512_vm8 }
 0x364   :  { %v1536_v43 = vmul.f32 %v1479_v34, %v3965_v1  ;;  %v1482_v38 = vmul.f32 %v2885_v28, %v4034_v32  ;;  %v2887_v51 = vpop.eup %2886  ;;  %vm1487_vm2 = vweird.f32 %v2885_v28  ;;  %v1455_v20 = vor.u32 1.1754944e-38, %v1454_v44 }
 0x365   :  { %v1446_v39 = vmul.f32 %v2881_v53, %v1445_v0  ;;  %v1505_v1 = vadd.f32 1.0, %v2887_v51  ;;  %v1508_v50 = vsub.f32 1.0, %v1507_v56  ;;  %v2889_v25 = vpop.eup %2888  ;;  %vm1488_vm6 = vmor %vm1486_vm3, %vm1487_vm2  ;;  %v1493_v7 = vor.u32 1.1754944e-38, %v1492_v29 }
 0x366   :  { %v4049_v15 = vadd.f32 %v1538_v6, %v1536_v43  ;;  %v1483_v21 = vsub.f32 1.0, %v1482_v38  ;;  %vm1491_vm7 = vcmp.eq.f32.partialorder %v1490_v12, 8.507059e+37  ;;  %v1517_v56 = vand.u32 2147483648, %v4029_v46 }
 0x367   :  { %v1447_v33 = vadd.f32 %v2881_v53, %v1446_v39  ;;  %2890 = vrcp.f32 %v1505_v1  ;;  %v1509_v6 = vmul.f32 %v4040_v5, %v1508_v50  ;;  %v1532_v31 = vand.u32 2147483648, %v1505_v1 }
 0x368   :  { %v1484_v58 = vmul.f32 %v2885_v28, %v1483_v21  ;;  %2892 = vtanh.f32 %v4049_v15  ;;  %v1530_v21 = vand.u32 2147483647, %v1505_v1  ;;  %vm1526_vm12 = vweird.f32 %v1505_v1 }
 0x369   :  { %v1451_v8 = vsel %vm1450_vm4, %v2881_v53, %v1447_v33  ;;  %v1510_v53 = vadd.f32 %v4040_v5, %v1509_v6  ;;  %v1518_v33 = vor.u32 1.1754944e-38, %v1517_v56  ;;  %v1533_v12 = vor.u32 1.1754944e-38, %v1532_v31  ;;  %v4458_v56 = vld [vmem:[#allocation31_spill] sm:$0xff] }
 0x36a   :  { %v1485_v11 = vadd.f32 %v2885_v28, %v1484_v58  ;;  %v1456_v19 = vsel %vm1453_vm5, %v1455_v20, %v1451_v8  ;;  %vm1531_vm15 = vcmp.eq.f32.partialorder %v1530_v21, 8.507059e+37  ;;  %v4460_v21 = vld [vmem:[#allocation33_spill] sm:$0xff] }
 0x36b   :  { %v1539_v51 = vmul.f32 %v2889_v25, %v1456_v19  ;;  %v1514_v29 = vsel %vm1513_vm11, %v4040_v5, %v1510_v53  ;;  %v4454_v5 = vld [vmem:[#allocation28_spill] sm:$0xff]  ;;  %v4455_v19 = vld [vmem:[#allocation57_spill] sm:$0xff] }
 0x36c   :  { %v1489_v36 = vsel %vm1488_vm6, %v2885_v28, %v1485_v11 }
 0x36d   :  { %v1494_v34 = vsel %vm1491_vm7, %v1493_v7, %v1489_v36  ;;  %v2891_v32 = vpop.eup %2890  ;;  %v4456_v36 = vld [vmem:[#allocation29_spill] sm:$0xff] }
 0x36e   :  { %v1537_v43 = vmul.f32 %v1494_v34, %v3974_v57  ;;  %v1522_v38 = vmul.f32 %v2891_v32, %v1505_v1  ;;  %v1515_v57 = vand.u32 2147483647, %v4029_v46  ;;  %vm1527_vm10 = vweird.f32 %v2891_v32  ;;  %v2893_v58 = vpop.eup %2892 }
 0x36f   :  { %vm1528_vm13 = vmor %vm1526_vm12, %vm1527_vm10  ;;  %v321_v1 = vadd.f32 %v4454_v5, %v3743_v24 }
 0x370   :  { %v4057_v0 = vadd.f32 %v1539_v51, %v1537_v43  ;;  %v1523_v28 = vsub.f32 1.0, %v1522_v38  ;;  %vm1516_vm14 = vcmp.eq.f32.partialorder %v1515_v57, 8.507059e+37  ;;  %v370_v51 = vadd.f32 %v4456_v36, %v4455_v19  ;;  %v4459_v57 = vld [vmem:[#allocation32_spill] sm:$0xff] }
 0x371   :  { %v1519_v8 = vsel %vm1516_vm14, %v1518_v33, %v1514_v29 }
 0x372   :  { %2894 = vtanh.f32 %v4057_v0  ;;  %v1524_v44 = vmul.f32 %v2891_v32, %v1523_v28  ;;  %v1544_v25 = vmul.f32 %v2893_v58, %v1519_v8  ;;  %v4457_v28 = vld [vmem:[#allocation60_spill] sm:$0xff] }
 0x373   :  { %v468_v31 = vadd.f32 %v4458_v56, %v4457_v28 }
 0x374   :  { %v1525_v39 = vadd.f32 %v2891_v32, %v1524_v44  ;;  %v323_v44 = vadd.f32 %v4459_v57, %v3743_v24 }
 0x376   :  { %v1529_v50 = vsel %vm1528_vm13, %v2891_v32, %v1525_v39  ;;  %v372_v39 = vadd.f32 %v4460_v21, %v4455_v19 }
 0x377   :  { %v1534_v11 = vsel %vm1531_vm15, %v1533_v12, %v1529_v50 }
 0x378   :  { %v2895_v20 = vpop.eup %2894 }
 0x379   :  { %v1545_v46 = vmul.f32 %v2895_v20, %v1534_v11 }
 0x37b   :  { %v1555_v7 = vpack.c.bf16 %v1545_v46, %v1544_v25 }
 0x37d   :  { %1564 = vmatmul.bf16.vlgmr.msrb.gmra.mxu0 %v1555_v7  ;;  %1578 = vmatmul.bf16.vlgmr.msrb.gmra.mxu1 %v1555_v7 }
 0x37e   :  { %1592 = vmatmul.bf16.vlgmr.msrb.gmra.mxu2 %v1555_v7  ;;  %1606 = vmatmul.bf16.vlgmr.msrb.gmra.mxu3 %v1555_v7 }
 0x37f   :  { %1956 = vmatpush.bf16.msrb.mxu0 %v3257_v37  ;;  %1970 = vmatpush.bf16.msrb.mxu1 %v3268_v41 }
 0x380   :  { %1984 = vmatpush.bf16.msrb.mxu2 %v3285_v47  ;;  %1998 = vmatpush.bf16.msrb.mxu3 %v3288_v48 }
 0x383   :  { %1957 = vmatpush.bf16.msrb.mxu0 %v3290_v49  ;;  %1971 = vmatpush.bf16.msrb.mxu1 %v3299_v52 }
 0x384   :  { %1985 = vmatpush.bf16.msrb.mxu2 %v3308_v55  ;;  %1999 = vmatpush.bf16.msrb.mxu3 %v3321_v59 }
 0x387   :  { %1958 = vmatpush.bf16.msrb.mxu0 %v3323_v60  ;;  %1972 = vmatpush.bf16.msrb.mxu1 %v3332_v63 }
 0x388   :  { %1986 = vmatpush.bf16.msrb.mxu2 %v3344_v3  ;;  %2000 = vmatpush.bf16.msrb.mxu3 %v3348_v4 }
 0x38b   :  { %1959 = vmatpush.bf16.msrb.mxu0 %v3365_v9  ;;  %1973 = vmatpush.bf16.msrb.mxu1 %v3376_v13 }
 0x38c   :  { %1987 = vmatpush.bf16.msrb.mxu2 %v3387_v17  ;;  %2001 = vmatpush.bf16.msrb.mxu3 %v3378_v14 }
 0x38f   :  { %1960 = vmatpush.bf16.msrb.mxu0 %v3404_v22  ;;  %1974 = vmatpush.bf16.msrb.mxu1 %v3415_v26 }
 0x390   :  { %1988 = vmatpush.bf16.msrb.mxu2 %v3426_v30  ;;  %2002 = vmatpush.bf16.msrb.mxu3 %v3417_v27 }
 0x393   :  { %1961 = vmatpush.bf16.msrb.mxu0 %v3443_v35  ;;  %1975 = vmatpush.bf16.msrb.mxu1 %v3454_v40 }
 0x394   :  { %1989 = vmatpush.bf16.msrb.mxu2 %v3465_v45  ;;  %2003 = vmatpush.bf16.msrb.mxu3 %v3456_v42 }
 0x397   :  { %1962 = vmatpush.bf16.msrb.mxu0 %v3482_v54  ;;  %1976 = vmatpush.bf16.msrb.mxu1 %v3493_v61 }
 0x398   :  { %1990 = vmatpush.bf16.msrb.mxu2 %v3504_v2  ;;  %2004 = vmatpush.bf16.msrb.mxu3 %v3495_v62 }
 0x39b   :  { %1963 = vmatpush.bf16.msrb.mxu0 %v3521_v10  ;;  %1977 = vmatpush.bf16.msrb.mxu1 %v3532_v16 }
 0x39c   :  { %1991 = vmatpush.bf16.msrb.mxu2 %v3554_v23  ;;  %2005 = vmatpush.bf16.msrb.mxu3 %v3534_v18 }
 0x3fa   :  { %v1565_v34 = vpop.f32.mrf.mxu0  ;;  %v1579_v6 = vpop.f32.mrf.mxu1 }
 0x3fb   :  { %v1612_v43 = vadd.f32 %v1565_v34, %v321_v1  ;;  %v1613_v32 = vadd.f32 %v1579_v6, %v370_v51  ;;  %v4461_v51 = vld [vmem:[#allocation62_spill] sm:$0xff] }
 0x3fc   :  { %v4462_v34 = vld [vmem:[#allocation30_spill] sm:$0xff] }
 0x3fd   :  { %v2671_v38 = vmul.f32 -1.442695, %v1612_v43  ;;  %v2673_v53 = vmul.f32 -1.442695, %v1613_v32  ;;  %v419_v6 = vadd.f32 %v4462_v34, %v4461_v51  ;;  %v4463_v32 = vld [vmem:[#allocation35_spill] sm:$0xff] }
 0x3ff   :  { %2896 = vpow2.f32 %v2671_v38  ;;  %v470_v38 = vadd.f32 %v4463_v32, %v4457_v28  ;;  %v4464_v32 = vld [vmem:[#allocation34_spill] sm:$0xff] }
 0x400   :  { %2898 = vpow2.f32 %v2673_v53 }
 0x401   :  { %v1607_v29 = vpop.f32.mrf.mxu3  ;;  %v1593_v36 = vpop.f32.mrf.mxu2 }
 0x402   :  { %v1615_v58 = vadd.f32 %v1607_v29, %v468_v31  ;;  %v1567_v33 = vpop.f32.mrf.mxu0  ;;  %v1581_v12 = vpop.f32.mrf.mxu1  ;;  %v1614_v56 = vadd.f32 %v1593_v36, %v419_v6 }
 0x403   :  { %v1616_v20 = vadd.f32 %v1567_v33, %v323_v44  ;;  %v1617_v50 = vadd.f32 %v1581_v12, %v372_v39 }
 0x404   :  { %v2675_v8 = vmul.f32 -1.442695, %v1615_v58 }
 0x405   :  { %v2897_v11 = vpop.eup %2896  ;;  %v2672_v25 = vmul.f32 -1.442695, %v1616_v20  ;;  %v2674_v5 = vmul.f32 -1.442695, %v1617_v50 }
 0x406   :  { %v2899_v46 = vpop.eup %2898  ;;  %v1626_v7 = vadd.f32 1.0, %v2897_v11  ;;  %2900 = vpow2.f32 %v2675_v8 }
 0x407   :  { %v1664_v1 = vadd.f32 1.0, %v2899_v46  ;;  %2902 = vpow2.f32 %v2672_v25 }
 0x408   :  { %2904 = vrcp.f32 %v1626_v7  ;;  %v1637_v25 = vand.u32 2147483647, %v1626_v7  ;;  %v1639_v46 = vand.u32 2147483648, %v1626_v7  ;;  %vm1633_vm2 = vweird.f32 %v1626_v7 }
 0x409   :  { %2906 = vrcp.f32 %v1664_v1  ;;  %v1609_v43 = vpop.f32.mrf.mxu3  ;;  %v1675_v6 = vand.u32 2147483647, %v1664_v1  ;;  %vm1671_vm3 = vweird.f32 %v1664_v1 }
 0x40a   :  { %2908 = vpow2.f32 %v2674_v5  ;;  %v1619_v57 = vadd.f32 %v1609_v43, %v470_v38  ;;  %v1677_v5 = vand.u32 2147483648, %v1664_v1  ;;  %v1595_v43 = vpop.f32.mrf.mxu2  ;;  %v421_v38 = vadd.f32 %v4464_v32, %v4461_v51 }
 0x40b   :  { %2910 = vtanh.f32 %v1614_v56  ;;  %vm1638_vm6 = vcmp.eq.f32.partialorder %v1637_v25, 8.507059e+37  ;;  %vm1676_vm7 = vcmp.eq.f32.partialorder %v1675_v6, 8.507059e+37 }
 0x40c   :  { %v2901_v53 = vpop.eup %2900  ;;  %v2676_v8 = vmul.f32 -1.442695, %v1619_v57 }
 0x40d   :  { %v2903_v31 = vpop.eup %2902  ;;  %v4113_v21 = vadd.f32 1.0, %v2901_v53 }
 0x40e   :  { %v2905_v44 = vpop.eup %2904  ;;  %v4115_v39 = vadd.f32 1.0, %v2903_v31  ;;  %v1640_v31 = vor.u32 1.1754944e-38, %v1639_v46 }
 0x40f   :  { %v2907_v29 = vpop.eup %2906  ;;  %v1629_v58 = vmul.f32 %v2905_v44, %v1626_v7  ;;  %vm1634_vm0 = vweird.f32 %v2905_v44 }
 0x410   :  { %v2909_v33 = vpop.eup %2908  ;;  %v1667_v12 = vmul.f32 %v2907_v29, %v1664_v1  ;;  %2912 = vrcp.f32 %v4115_v39  ;;  %vm1672_vm1 = vweird.f32 %v2907_v29  ;;  %vm1635_vm4 = vmor %vm1633_vm2, %vm1634_vm0  ;;  %v1652_v25 = vand.u32 2147483647, %v4115_v39 }
 0x411   :  { %v1630_v20 = vsub.f32 1.0, %v1629_v58  ;;  %v4118_v50 = vadd.f32 1.0, %v2909_v33  ;;  %2914 = vrcp.f32 %v4113_v21  ;;  %v2911_v56 = vpop.eup %2910  ;;  %vm1673_vm5 = vmor %vm1671_vm3, %vm1672_vm1  ;;  %v1678_v33 = vor.u32 1.1754944e-38, %v1677_v5 }
 0x412   :  { %v1668_v11 = vsub.f32 1.0, %v1667_v12  ;;  %v1654_v5 = vand.u32 2147483648, %v4115_v39  ;;  %vm1648_vm9 = vweird.f32 %v4115_v39  ;;  %vm1653_vm13 = vcmp.eq.f32.partialorder %v1652_v25, 8.507059e+37 }
 0x413   :  { %v1631_v36 = vmul.f32 %v2905_v44, %v1630_v20  ;;  %2916 = vrcp.f32 %v4118_v50  ;;  %v1618_v20 = vadd.f32 %v1595_v43, %v421_v38  ;;  %vm1686_vm11 = vweird.f32 %v4118_v50 }
 0x414   :  { %v1669_v34 = vmul.f32 %v2907_v29, %v1668_v11  ;;  %2918 = vpow2.f32 %v2676_v8  ;;  %vm1711_vm1 = vweird.f32 %v4113_v21 }
 0x415   :  { %v1632_v53 = vadd.f32 %v2905_v44, %v1631_v36  ;;  %2920 = vtanh.f32 %v1618_v20 }
 0x416   :  { %v1670_v57 = vadd.f32 %v2907_v29, %v1669_v34  ;;  %v2913_v58 = vpop.eup %2912 }
 0x417   :  { %v1636_v12 = vsel %vm1635_vm4, %v2905_v44, %v1632_v53  ;;  %v4124_v11 = vpop.eup %2914  ;;  %v1644_v36 = vmul.f32 %v2913_v58, %v4115_v39  ;;  %vm1649_vm8 = vweird.f32 %v2913_v58  ;;  %v1690_v53 = vand.u32 2147483647, %v4118_v50 }
 0x418   :  { %v1641_v28 = vsel %vm1638_vm6, %v1640_v31, %v1636_v12  ;;  %v1674_v19 = vsel %vm1673_vm5, %v2907_v29, %v1670_v57  ;;  %v1707_v44 = vmul.f32 %v4124_v11, %v4113_v21  ;;  %vm1650_vm12 = vmor %vm1648_vm9, %vm1649_vm8  ;;  %vm1712_vm0 = vweird.f32 %v4124_v11 }
 0x419   :  { %v2917_v7 = vpop.eup %2916  ;;  %v1679_v8 = vsel %vm1676_vm7, %v1678_v33, %v1674_v19  ;;  %v1738_v32 = vmul.f32 %v2911_v56, %v1641_v28  ;;  %v1645_v46 = vsub.f32 1.0, %v1644_v36  ;;  %v1692_v19 = vand.u32 2147483648, %v4118_v50  ;;  %vm1713_vm3 = vmor %vm1711_vm1, %vm1712_vm0 }
 0x41a   :  { %v1736_v1 = vmul.f32 %v1679_v8, %v4049_v15  ;;  %v1682_v34 = vmul.f32 %v2917_v7, %v4118_v50  ;;  %v2919_v51 = vpop.eup %2918  ;;  %vm1687_vm10 = vweird.f32 %v2917_v7  ;;  %v1655_v56 = vor.u32 1.1754944e-38, %v1654_v5 }
 0x41b   :  { %v1646_v43 = vmul.f32 %v2913_v58, %v1645_v46  ;;  %v1705_v15 = vadd.f32 1.0, %v2919_v51  ;;  %v1708_v31 = vsub.f32 1.0, %v1707_v44  ;;  %v2921_v12 = vpop.eup %2920  ;;  %vm1688_vm14 = vmor %vm1686_vm11, %vm1687_vm10  ;;  %v1693_v20 = vor.u32 1.1754944e-38, %v1692_v19 }
 0x41c   :  { %v4133_v29 = vadd.f32 %v1738_v32, %v1736_v1  ;;  %v1683_v6 = vsub.f32 1.0, %v1682_v34  ;;  %vm1691_vm15 = vcmp.eq.f32.partialorder %v1690_v53, 8.507059e+37  ;;  %v1717_v44 = vand.u32 2147483648, %v4113_v21 }
 0x41d   :  { %v1647_v38 = vadd.f32 %v2913_v58, %v1646_v43  ;;  %2922 = vrcp.f32 %v1705_v15  ;;  %v1709_v32 = vmul.f32 %v4124_v11, %v1708_v31  ;;  %v1732_v25 = vand.u32 2147483648, %v1705_v15 }
 0x41e   :  { %v1684_v28 = vmul.f32 %v2917_v7, %v1683_v6  ;;  %2924 = vtanh.f32 %v4133_v29  ;;  %v1730_v6 = vand.u32 2147483647, %v1705_v15  ;;  %vm1726_vm4 = vweird.f32 %v1705_v15 }
 0x41f   :  { %v1651_v57 = vsel %vm1650_vm12, %v2913_v58, %v1647_v38  ;;  %v1710_v58 = vadd.f32 %v4124_v11, %v1709_v32  ;;  %v1718_v38 = vor.u32 1.1754944e-38, %v1717_v44  ;;  %v1733_v53 = vor.u32 1.1754944e-38, %v1732_v25 }
 0x420   :  { %v1685_v33 = vadd.f32 %v2917_v7, %v1684_v28  ;;  %v1656_v36 = vsel %vm1653_vm13, %v1655_v56, %v1651_v57  ;;  %vm1731_vm7 = vcmp.eq.f32.partialorder %v1730_v6, 8.507059e+37 }
 0x421   :  { %v1739_v51 = vmul.f32 %v2921_v12, %v1656_v36  ;;  %v1714_v19 = vsel %vm1713_vm3, %v4124_v11, %v1710_v58  ;;  %v4472_v11 = vld [vmem:[#allocation62_spill] sm:$0xff] }
 0x422   :  { %v1689_v39 = vsel %vm1688_vm14, %v2917_v7, %v1685_v33 }
 0x423   :  { %v1694_v8 = vsel %vm1691_vm15, %v1693_v20, %v1689_v39  ;;  %v2923_v50 = vpop.eup %2922 }
 0x424   :  { %v1737_v1 = vmul.f32 %v1694_v8, %v4057_v0  ;;  %v1722_v34 = vmul.f32 %v2923_v50, %v1705_v15  ;;  %v1715_v0 = vand.u32 2147483647, %v4113_v21  ;;  %vm1727_vm2 = vweird.f32 %v2923_v50  ;;  %v2925_v28 = vpop.eup %2924  ;;  %v4473_v15 = vld [vmem:[#allocation38_spill] sm:$0xff] }
 0x425   :  { %vm1728_vm5 = vmor %vm1726_vm4, %vm1727_vm2  ;;  %v424_v36 = vadd.f32 %v4473_v15, %v4472_v11 }
 0x426   :  { %v4141_v46 = vadd.f32 %v1739_v51, %v1737_v1  ;;  %v1723_v7 = vsub.f32 1.0, %v1722_v34  ;;  %vm1716_vm6 = vcmp.eq.f32.partialorder %v1715_v0, 8.507059e+37  ;;  %v4474_v51 = vld [vmem:[#allocation43_spill] sm:$0xff] }
 0x427   :  { %v1719_v57 = vsel %vm1716_vm6, %v1718_v38, %v1714_v19 }
 0x428   :  { %2926 = vtanh.f32 %v4141_v46  ;;  %v1724_v5 = vmul.f32 %v2923_v50, %v1723_v7  ;;  %v1744_v12 = vmul.f32 %v2925_v28, %v1719_v57 }
 0x42a   :  { %v1725_v43 = vadd.f32 %v2923_v50, %v1724_v5 }
 0x42c   :  { %v1729_v31 = vsel %vm1728_vm5, %v2923_v50, %v1725_v43 }
 0x42d   :  { %v1734_v33 = vsel %vm1731_vm7, %v1733_v53, %v1729_v31 }
 0x42e   :  { %v2927_v56 = vpop.eup %2926 }
 0x42f   :  { %v1745_v21 = vmul.f32 %v2927_v56, %v1734_v33 }
 0x431   :  { %v1755_v20 = vpack.c.bf16 %v1745_v21, %v1744_v12 }
 0x433   :  { %1764 = vmatmul.bf16.vlgmr.msra.gmra.mxu0 %v1755_v20  ;;  %1778 = vmatmul.bf16.vlgmr.msra.gmra.mxu1 %v1755_v20 }
 0x434   :  { %1792 = vmatmul.bf16.vlgmr.msra.gmra.mxu2 %v1755_v20  ;;  %1806 = vmatmul.bf16.vlgmr.msra.gmra.mxu3 %v1755_v20  ;;  %v4475_v20 = vld [vmem:[#allocation42_spill] sm:$0xff] }
 0x435   :  { %2156 = vmatpush.bf16.msra.mxu0 %v3257_v37  ;;  %2170 = vmatpush.bf16.msra.mxu1 %v3268_v41  ;;  %v4465_v37 = vld [vmem:[#allocation36_spill] sm:$0xff] }
 0x436   :  { %2184 = vmatpush.bf16.msra.mxu2 %v3285_v47  ;;  %2198 = vmatpush.bf16.msra.mxu3 %v3288_v48  ;;  %v326_v41 = vadd.f32 %v4465_v37, %v3743_v24  ;;  %v4466_v47 = vld [vmem:[#allocation57_spill] sm:$0xff]  ;;  %v426_v37 = vadd.f32 %v4475_v20, %v4472_v11 }
 0x437   :  { %v4467_v48 = vld [vmem:[#allocation37_spill] sm:$0xff] }
 0x439   :  { %2157 = vmatpush.bf16.msra.mxu0 %v3290_v49  ;;  %2171 = vmatpush.bf16.msra.mxu1 %v3299_v52  ;;  %v375_v49 = vadd.f32 %v4467_v48, %v4466_v47 }
 0x43a   :  { %2185 = vmatpush.bf16.msra.mxu2 %v3308_v55  ;;  %2199 = vmatpush.bf16.msra.mxu3 %v3321_v59 }
 0x43d   :  { %2158 = vmatpush.bf16.msra.mxu0 %v3323_v60  ;;  %2172 = vmatpush.bf16.msra.mxu1 %v3332_v63 }
 0x43e   :  { %2186 = vmatpush.bf16.msra.mxu2 %v3344_v3  ;;  %2200 = vmatpush.bf16.msra.mxu3 %v3348_v4  ;;  %v4468_v4 = vld [vmem:[#allocation60_spill] sm:$0xff] }
 0x43f   :  { %v475_v8 = vadd.f32 %v4474_v51, %v4468_v4 }
 0x441   :  { %2159 = vmatpush.bf16.msra.mxu0 %v3365_v9  ;;  %2173 = vmatpush.bf16.msra.mxu1 %v3376_v13  ;;  %v4469_v9 = vld [vmem:[#allocation39_spill] sm:$0xff] }
 0x442   :  { %2187 = vmatpush.bf16.msra.mxu2 %v3387_v17  ;;  %2201 = vmatpush.bf16.msra.mxu3 %v3378_v14  ;;  %v473_v13 = vadd.f32 %v4469_v9, %v4468_v4  ;;  %v4470_v14 = vld [vmem:[#allocation40_spill] sm:$0xff] }
 0x443   :  { %v328_v17 = vadd.f32 %v4470_v14, %v3743_v24 }
 0x445   :  { %2160 = vmatpush.bf16.msra.mxu0 %v3404_v22  ;;  %2174 = vmatpush.bf16.msra.mxu1 %v3415_v26  ;;  %v4471_v22 = vld [vmem:[#allocation41_spill] sm:$0xff] }
 0x446   :  { %2188 = vmatpush.bf16.msra.mxu2 %v3426_v30  ;;  %2202 = vmatpush.bf16.msra.mxu3 %v3417_v27  ;;  %v377_v26 = vadd.f32 %v4471_v22, %v4466_v47 }
 0x449   :  { %2161 = vmatpush.bf16.msra.mxu0 %v3443_v35  ;;  %2175 = vmatpush.bf16.msra.mxu1 %v3454_v40 }
 0x44a   :  { %2189 = vmatpush.bf16.msra.mxu2 %v3465_v45  ;;  %2203 = vmatpush.bf16.msra.mxu3 %v3456_v42 }
 0x44d   :  { %2162 = vmatpush.bf16.msra.mxu0 %v3482_v54  ;;  %2176 = vmatpush.bf16.msra.mxu1 %v3493_v61 }
 0x44e   :  { %2190 = vmatpush.bf16.msra.mxu2 %v3504_v2  ;;  %2204 = vmatpush.bf16.msra.mxu3 %v3495_v62 }
 0x451   :  { %2163 = vmatpush.bf16.msra.mxu0 %v3521_v10  ;;  %2177 = vmatpush.bf16.msra.mxu1 %v3532_v16 }
 0x452   :  { %2191 = vmatpush.bf16.msra.mxu2 %v3554_v23  ;;  %2205 = vmatpush.bf16.msra.mxu3 %v3534_v18 }
 0x4b0   :  { %v1765_v52 = vpop.f32.mrf.mxu0  ;;  %v1779_v55 = vpop.f32.mrf.mxu1 }
 0x4b1   :  { %v1812_v59 = vadd.f32 %v1765_v52, %v326_v41  ;;  %v1813_v60 = vadd.f32 %v1779_v55, %v375_v49 }
 0x4b3   :  { %v2677_v63 = vmul.f32 -1.442695, %v1812_v59  ;;  %v2679_v3 = vmul.f32 -1.442695, %v1813_v60 }
 0x4b5   :  { %2928 = vpow2.f32 %v2677_v63 }
 0x4b6   :  { %2930 = vpow2.f32 %v2679_v3 }
 0x4b7   :  { %v1807_v27 = vpop.f32.mrf.mxu3  ;;  %v1793_v23 = vpop.f32.mrf.mxu2 }
 0x4b8   :  { %v1815_v30 = vadd.f32 %v1807_v27, %v473_v13  ;;  %v1767_v35 = vpop.f32.mrf.mxu0  ;;  %v1781_v40 = vpop.f32.mrf.mxu1  ;;  %v1814_v1 = vadd.f32 %v1793_v23, %v424_v36 }
 0x4b9   :  { %v1816_v42 = vadd.f32 %v1767_v35, %v328_v17  ;;  %v1817_v45 = vadd.f32 %v1781_v40, %v377_v26 }
 0x4ba   :  { %v2681_v54 = vmul.f32 -1.442695, %v1815_v30 }
 0x4bb   :  { %v2929_v61 = vpop.eup %2928  ;;  %v2678_v62 = vmul.f32 -1.442695, %v1816_v42  ;;  %v2680_v16 = vmul.f32 -1.442695, %v1817_v45 }
 0x4bc   :  { %v2931_v2 = vpop.eup %2930  ;;  %v1826_v10 = vadd.f32 1.0, %v2929_v61  ;;  %2932 = vpow2.f32 %v2681_v54 }
 0x4bd   :  { %v1864_v18 = vadd.f32 1.0, %v2931_v2  ;;  %2934 = vpow2.f32 %v2678_v62 }
 0x4be   :  { %2936 = vrcp.f32 %v1826_v10  ;;  %v1837_v53 = vand.u32 2147483647, %v1826_v10  ;;  %v1839_v56 = vand.u32 2147483648, %v1826_v10  ;;  %vm1833_vm10 = vweird.f32 %v1826_v10 }
 0x4bf   :  { %2938 = vrcp.f32 %v1864_v18  ;;  %v1809_v39 = vpop.f32.mrf.mxu3  ;;  %v1877_v31 = vand.u32 2147483648, %v1864_v18  ;;  %v1875_v12 = vand.u32 2147483647, %v1864_v18  ;;  %v1795_v21 = vpop.f32.mrf.mxu2  ;;  %vm1871_vm11 = vweird.f32 %v1864_v18 }
 0x4c0   :  { %2940 = vpow2.f32 %v2680_v16  ;;  %v1819_v34 = vadd.f32 %v1809_v39, %v475_v8  ;;  %v1840_v49 = vor.u32 1.1754944e-38, %v1839_v56  ;;  %vm1838_vm14 = vcmp.eq.f32.partialorder %v1837_v53, 8.507059e+37 }
 0x4c1   :  { %2942 = vtanh.f32 %v1814_v1  ;;  %v1878_v59 = vor.u32 1.1754944e-38, %v1877_v31  ;;  %v1818_v63 = vadd.f32 %v1795_v21, %v426_v37  ;;  %vm1876_vm15 = vcmp.eq.f32.partialorder %v1875_v12, 8.507059e+37 }
 0x4c2   :  { %v2933_v32 = vpop.eup %2932  ;;  %v2682_v28 = vmul.f32 -1.442695, %v1819_v34 }
 0x4c3   :  { %v2935_v50 = vpop.eup %2934  ;;  %v4197_v7 = vadd.f32 1.0, %v2933_v32 }
 0x4c4   :  { %v2937_v58 = vpop.eup %2936  ;;  %v4199_v44 = vadd.f32 1.0, %v2935_v50 }
 0x4c5   :  { %v2939_v25 = vpop.eup %2938  ;;  %v1829_v0 = vmul.f32 %v2937_v58, %v1826_v10  ;;  %vm1834_vm8 = vweird.f32 %v2937_v58 }
 0x4c6   :  { %v2941_v5 = vpop.eup %2940  ;;  %v1867_v6 = vmul.f32 %v2939_v25, %v1864_v18  ;;  %2944 = vrcp.f32 %v4199_v44  ;;  %vm1872_vm9 = vweird.f32 %v2939_v25  ;;  %vm1835_vm12 = vmor %vm1833_vm10, %vm1834_vm8  ;;  %v1852_v45 = vand.u32 2147483647, %v4199_v44 }
 0x4c7   :  { %v1830_v43 = vsub.f32 1.0, %v1829_v0  ;;  %v4202_v19 = vadd.f32 1.0, %v2941_v5  ;;  %2946 = vrcp.f32 %v4197_v7  ;;  %v2943_v48 = vpop.eup %2942  ;;  %vm1873_vm13 = vmor %vm1871_vm11, %vm1872_vm9  ;;  %v1854_v54 = vand.u32 2147483648, %v4199_v44 }
 0x4c8   :  { %v1868_v38 = vsub.f32 1.0, %v1867_v6  ;;  %vm1848_vm1 = vweird.f32 %v4199_v44  ;;  %vm1853_vm5 = vcmp.eq.f32.partialorder %v1852_v45, 8.507059e+37  ;;  %vm1911_vm9 = vweird.f32 %v4197_v7 }
 0x4c9   :  { %v1831_v57 = vmul.f32 %v2937_v58, %v1830_v43  ;;  %2948 = vrcp.f32 %v4202_v19  ;;  %v1892_v10 = vand.u32 2147483648, %v4202_v19  ;;  %v1890_v23 = vand.u32 2147483647, %v4202_v19 }
 0x4ca   :  { %v1869_v33 = vmul.f32 %v2939_v25, %v1868_v38  ;;  %2950 = vpow2.f32 %v2682_v28  ;;  %vm1886_vm3 = vweird.f32 %v4202_v19  ;;  %v1855_v15 = vor.u32 1.1754944e-38, %v1854_v54 }
 0x4cb   :  { %v1832_v41 = vadd.f32 %v2937_v58, %v1831_v57  ;;  %2952 = vtanh.f32 %v1818_v63  ;;  %v1893_v32 = vor.u32 1.1754944e-38, %v1892_v10  ;;  %vm1891_vm7 = vcmp.eq.f32.partialorder %v1890_v23, 8.507059e+37 }
 0x4cc   :  { %v1870_v52 = vadd.f32 %v2939_v25, %v1869_v33  ;;  %v2945_v55 = vpop.eup %2944  ;;  %v1917_v28 = vand.u32 2147483648, %v4197_v7 }
 0x4cd   :  { %v1836_v60 = vsel %vm1835_vm12, %v2937_v58, %v1832_v41  ;;  %v4208_v3 = vpop.eup %2946  ;;  %v1844_v14 = vmul.f32 %v2945_v55, %v4199_v44  ;;  %vm1849_vm0 = vweird.f32 %v2945_v55 }
 0x4ce   :  { %v1841_v9 = vsel %vm1838_vm14, %v1840_v49, %v1836_v60  ;;  %v1874_v13 = vsel %vm1873_vm13, %v2939_v25, %v1870_v52  ;;  %v1907_v42 = vmul.f32 %v4208_v3, %v4197_v7  ;;  %vm1850_vm4 = vmor %vm1848_vm1, %vm1849_vm0  ;;  %vm1912_vm8 = vweird.f32 %v4208_v3  ;;  %v4477_v60 = vld [vmem:[#allocation45_spill] sm:$0xff] }
 0x4cf   :  { %v2949_v17 = vpop.eup %2948  ;;  %v1879_v22 = vsel %vm1876_vm15, %v1878_v59, %v1874_v13  ;;  %v1938_v26 = vmul.f32 %v2943_v48, %v1841_v9  ;;  %v1845_v30 = vsub.f32 1.0, %v1844_v14  ;;  %vm1913_vm11 = vmor %vm1911_vm9, %vm1912_vm8  ;;  %v1918_v12 = vor.u32 1.1754944e-38, %v1917_v28 }
 0x4d0   :  { %v1936_v27 = vmul.f32 %v1879_v22, %v4133_v29  ;;  %v1882_v35 = vmul.f32 %v2949_v17, %v4202_v19  ;;  %v2951_v40 = vpop.eup %2950  ;;  %vm1887_vm2 = vweird.f32 %v2949_v17  ;;  %v1908_v36 = vsub.f32 1.0, %v1907_v42 }
 0x4d1   :  { %v1846_v2 = vmul.f32 %v2945_v55, %v1845_v30  ;;  %v1905_v29 = vadd.f32 1.0, %v2951_v40  ;;  %v2953_v8 = vpop.eup %2952  ;;  %vm1888_vm6 = vmor %vm1886_vm3, %vm1887_vm2  ;;  %v380_v63 = vadd.f32 %v4477_v60, %v4466_v47  ;;  %v4479_v30 = vld [vmem:[#allocation48_spill] sm:$0xff]  ;;  %v4480_v40 = vld [vmem:[#allocation49_spill] sm:$0xff] }
 0x4d2   :  { %v4217_v61 = vadd.f32 %v1938_v26, %v1936_v27  ;;  %v1883_v62 = vsub.f32 1.0, %v1882_v35  ;;  %v1909_v44 = vmul.f32 %v4208_v3, %v1908_v36  ;;  %v4478_v26 = vld [vmem:[#allocation47_spill] sm:$0xff]  ;;  %v333_v35 = vadd.f32 %v4479_v30, %v3743_v24 }
 0x4d3   :  { %v1847_v18 = vadd.f32 %v2945_v55, %v1846_v2  ;;  %2954 = vrcp.f32 %v1905_v29  ;;  %v1932_v38 = vand.u32 2147483648, %v1905_v29  ;;  %v1930_v56 = vand.u32 2147483647, %v1905_v29 }
 0x4d4   :  { %v1884_v16 = vmul.f32 %v2949_v17, %v1883_v62  ;;  %2956 = vtanh.f32 %v4217_v61  ;;  %v1910_v43 = vadd.f32 %v4208_v3, %v1909_v44  ;;  %vm1926_vm12 = vweird.f32 %v1905_v29 }
 0x4d5   :  { %v1851_v39 = vsel %vm1850_vm4, %v2945_v55, %v1847_v18  ;;  %v1933_v21 = vor.u32 1.1754944e-38, %v1932_v38  ;;  %vm1931_vm15 = vcmp.eq.f32.partialorder %v1930_v56, 8.507059e+37  ;;  %v4476_v55 = vld [vmem:[#allocation44_spill] sm:$0xff]  ;;  %v478_v27 = vadd.f32 %v4478_v26, %v4468_v4 }
 0x4d6   :  { %v1885_v51 = vadd.f32 %v2949_v17, %v1884_v16  ;;  %v1856_v1 = vsel %vm1853_vm5, %v1855_v15, %v1851_v39  ;;  %v1914_v57 = vsel %vm1913_vm11, %v4208_v3, %v1910_v43  ;;  %v331_v59 = vadd.f32 %v4476_v55, %v3743_v24 }
 0x4d7   :  { %v1939_v34 = vmul.f32 %v2953_v8, %v1856_v1  ;;  %v382_v42 = vadd.f32 %v4480_v40, %v4466_v47 }
 0x4d8   :  { %v1889_v50 = vsel %vm1888_vm6, %v2949_v17, %v1885_v51 }
 0x4d9   :  { %v1894_v58 = vsel %vm1891_vm7, %v1893_v32, %v1889_v50  ;;  %v2955_v0 = vpop.eup %2954  ;;  %v4481_v32 = vld [vmem:[#allocation46_spill] sm:$0xff] }
 0x4da   :  { %v1937_v25 = vmul.f32 %v1894_v58, %v4141_v46  ;;  %v1922_v6 = vmul.f32 %v2955_v0, %v1905_v29  ;;  %v1915_v46 = vand.u32 2147483647, %v4197_v7  ;;  %vm1927_vm10 = vweird.f32 %v2955_v0  ;;  %v2957_v33 = vpop.eup %2956 }
 0x4db   :  { %vm1928_vm13 = vmor %vm1926_vm12, %vm1927_vm10  ;;  %v429_v1 = vadd.f32 %v4481_v32, %v4472_v11 }
 0x4dc   :  { %v4225_v5 = vadd.f32 %v1939_v34, %v1937_v25  ;;  %v1923_v19 = vsub.f32 1.0, %v1922_v6  ;;  %vm1916_vm14 = vcmp.eq.f32.partialorder %v1915_v46, 8.507059e+37  ;;  %v4482_v34 = vld [vmem:[#allocation50_spill] sm:$0xff] }
 0x4dd   :  { %v1919_v41 = vsel %vm1916_vm14, %v1918_v12, %v1914_v57  ;;  %v480_v58 = vadd.f32 %v4482_v34, %v4468_v4 }
 0x4de   :  { %2958 = vtanh.f32 %v4225_v5  ;;  %v1924_v53 = vmul.f32 %v2955_v0, %v1923_v19  ;;  %v1944_v49 = vmul.f32 %v2957_v33, %v1919_v41 }
 0x4e0   :  { %v1925_v31 = vadd.f32 %v2955_v0, %v1924_v53 }
 0x4e2   :  { %v1929_v37 = vsel %vm1928_vm13, %v2955_v0, %v1925_v31 }
 0x4e3   :  { %v1934_v48 = vsel %vm1931_vm15, %v1933_v21, %v1929_v37 }
 0x4e4   :  { %v2959_v20 = vpop.eup %2958 }
 0x4e5   :  { %v1945_v7 = vmul.f32 %v2959_v20, %v1934_v48 }
 0x4e7   :  { %v1955_v52 = vpack.c.bf16 %v1945_v7, %v1944_v49 }
 0x4e9   :  { %1964 = vmatmul.bf16.vlgmr.msrb.gmra.mxu0 %v1955_v52  ;;  %1978 = vmatmul.bf16.vlgmr.msrb.gmra.mxu1 %v1955_v52 }
 0x4ea   :  { %1992 = vmatmul.bf16.vlgmr.msrb.gmra.mxu2 %v1955_v52  ;;  %2006 = vmatmul.bf16.vlgmr.msrb.gmra.mxu3 %v1955_v52  ;;  %v4483_v52 = vld [vmem:[#allocation53_spill] sm:$0xff] }
 0x4eb   :  { %v431_v55 = vadd.f32 %v4483_v52, %v4472_v11 }
 0x566   :  { %v1965_v3 = vpop.f32.mrf.mxu0  ;;  %v1979_v9 = vpop.f32.mrf.mxu1 }
 0x567   :  { %v2012_v13 = vadd.f32 %v1965_v3, %v331_v59  ;;  %v2013_v14 = vadd.f32 %v1979_v9, %v380_v63 }
 0x569   :  { %v2683_v17 = vmul.f32 -1.442695, %v2012_v13  ;;  %v2685_v22 = vmul.f32 -1.442695, %v2013_v14 }
 0x56b   :  { %2960 = vpow2.f32 %v2683_v17 }
 0x56c   :  { %2962 = vpow2.f32 %v2685_v22 }
 0x56d   :  { %v2007_v45 = vpop.f32.mrf.mxu3  ;;  %v1993_v8 = vpop.f32.mrf.mxu2 }
 0x56e   :  { %v2015_v54 = vadd.f32 %v2007_v45, %v478_v27  ;;  %v1967_v62 = vpop.f32.mrf.mxu0  ;;  %v1981_v2 = vpop.f32.mrf.mxu1  ;;  %v2014_v25 = vadd.f32 %v1993_v8, %v429_v1 }
 0x56f   :  { %v2016_v10 = vadd.f32 %v1967_v62, %v333_v35  ;;  %v2017_v29 = vadd.f32 %v1981_v2, %v382_v42 }
 0x570   :  { %v2687_v16 = vmul.f32 -1.442695, %v2015_v54 }
 0x571   :  { %v2961_v18 = vpop.eup %2960  ;;  %v2684_v23 = vmul.f32 -1.442695, %v2016_v10  ;;  %v2686_v39 = vmul.f32 -1.442695, %v2017_v29 }
 0x572   :  { %v2963_v15 = vpop.eup %2962  ;;  %v2026_v36 = vadd.f32 1.0, %v2961_v18  ;;  %2964 = vpow2.f32 %v2687_v16 }
 0x573   :  { %v2064_v51 = vadd.f32 1.0, %v2963_v15  ;;  %2966 = vpow2.f32 %v2684_v23 }
 0x574   :  { %2968 = vrcp.f32 %v2026_v36  ;;  %v2037_v21 = vand.u32 2147483647, %v2026_v36  ;;  %v2039_v20 = vand.u32 2147483648, %v2026_v36  ;;  %vm2033_vm2 = vweird.f32 %v2026_v36 }
 0x575   :  { %2970 = vrcp.f32 %v2064_v51  ;;  %v2009_v50 = vpop.f32.mrf.mxu3  ;;  %v2077_v37 = vand.u32 2147483648, %v2064_v51  ;;  %v2075_v49 = vand.u32 2147483647, %v2064_v51  ;;  %v1995_v7 = vpop.f32.mrf.mxu2  ;;  %vm2071_vm3 = vweird.f32 %v2064_v51 }
 0x576   :  { %2972 = vpow2.f32 %v2686_v39  ;;  %v2019_v6 = vadd.f32 %v2009_v50, %v480_v58  ;;  %v2040_v63 = vor.u32 1.1754944e-38, %v2039_v20  ;;  %vm2038_vm6 = vcmp.eq.f32.partialorder %v2037_v21, 8.507059e+37 }
 0x577   :  { %2974 = vtanh.f32 %v2014_v25  ;;  %v2078_v13 = vor.u32 1.1754944e-38, %v2077_v37  ;;  %v2018_v17 = vadd.f32 %v1995_v7, %v431_v55  ;;  %vm2076_vm7 = vcmp.eq.f32.partialorder %v2075_v49, 8.507059e+37 }
 0x578   :  { %v2965_v44 = vpop.eup %2964  ;;  %v2688_v33 = vmul.f32 -1.442695, %v2019_v6 }
 0x579   :  { %v2967_v0 = vpop.eup %2966  ;;  %v4249_v19 = vadd.f32 1.0, %v2965_v44 }
 0x57a   :  { %v2969_v43 = vpop.eup %2968  ;;  %v4251_v28 = vadd.f32 1.0, %v2967_v0 }
 0x57b   :  { %v2971_v38 = vpop.eup %2970  ;;  %v2029_v46 = vmul.f32 %v2969_v43, %v2026_v36  ;;  %vm2034_vm0 = vweird.f32 %v2969_v43 }
 0x57c   :  { %v2973_v53 = vpop.eup %2972  ;;  %v2067_v56 = vmul.f32 %v2971_v38, %v2064_v51  ;;  %2976 = vrcp.f32 %v4251_v28  ;;  %vm2072_vm1 = vweird.f32 %v2971_v38  ;;  %vm2035_vm4 = vmor %vm2033_vm2, %vm2034_vm0  ;;  %v2052_v29 = vand.u32 2147483647, %v4251_v28 }
 0x57d   :  { %v2030_v31 = vsub.f32 1.0, %v2029_v46  ;;  %v4254_v57 = vadd.f32 1.0, %v2973_v53  ;;  %2978 = vrcp.f32 %v4249_v19  ;;  %v2975_v60 = vpop.eup %2974  ;;  %vm2073_vm5 = vmor %vm2071_vm3, %vm2072_vm1  ;;  %v2054_v16 = vand.u32 2147483648, %v4251_v28 }
 0x57e   :  { %v2068_v12 = vsub.f32 1.0, %v2067_v56  ;;  %vm2048_vm9 = vweird.f32 %v4251_v28  ;;  %vm2053_vm13 = vcmp.eq.f32.partialorder %v2052_v29, 8.507059e+37  ;;  %vm2111_vm1 = vweird.f32 %v4249_v19 }
 0x57f   :  { %v2031_v41 = vmul.f32 %v2969_v43, %v2030_v31  ;;  %2980 = vrcp.f32 %v4254_v57  ;;  %v2092_v36 = vand.u32 2147483648, %v4254_v57  ;;  %v2090_v8 = vand.u32 2147483647, %v4254_v57 }
 0x580   :  { %v2069_v48 = vmul.f32 %v2971_v38, %v2068_v12  ;;  %2982 = vpow2.f32 %v2688_v33  ;;  %vm2086_vm11 = vweird.f32 %v4254_v57  ;;  %v2055_v32 = vor.u32 1.1754944e-38, %v2054_v16 }
 0x581   :  { %v2032_v59 = vadd.f32 %v2969_v43, %v2031_v41  ;;  %2984 = vtanh.f32 %v2018_v17  ;;  %v2093_v44 = vor.u32 1.1754944e-38, %v2092_v36  ;;  %vm2091_vm15 = vcmp.eq.f32.partialorder %v2090_v8, 8.507059e+37 }
 0x582   :  { %v2070_v3 = vadd.f32 %v2971_v38, %v2069_v48  ;;  %v2977_v9 = vpop.eup %2976  ;;  %v2117_v33 = vand.u32 2147483648, %v4249_v19 }
 0x583   :  { %v2036_v14 = vsel %vm2035_vm4, %v2969_v43, %v2032_v59  ;;  %v4260_v22 = vpop.eup %2978  ;;  %v2044_v30 = vmul.f32 %v2977_v9, %v4251_v28  ;;  %vm2049_vm8 = vweird.f32 %v2977_v9 }
 0x584   :  { %v2041_v26 = vsel %vm2038_vm6, %v2040_v63, %v2036_v14  ;;  %v2074_v27 = vsel %vm2073_vm5, %v2971_v38, %v2070_v3  ;;  %v2107_v10 = vmul.f32 %v4260_v22, %v4249_v19  ;;  %vm2050_vm12 = vmor %vm2048_vm9, %vm2049_vm8  ;;  %vm2112_vm0 = vweird.f32 %v4260_v22  ;;  %v4485_v14 = vld [vmem:[#allocation52_spill] sm:$0xff] }
 0x585   :  { %v2981_v35 = vpop.eup %2980  ;;  %v2079_v40 = vsel %vm2076_vm7, %v2078_v13, %v2074_v27  ;;  %v2138_v42 = vmul.f32 %v2975_v60, %v2041_v26  ;;  %v2045_v54 = vsub.f32 1.0, %v2044_v30  ;;  %vm2113_vm3 = vmor %vm2111_vm1, %vm2112_vm0  ;;  %v2118_v49 = vor.u32 1.1754944e-38, %v2117_v33 }
 0x586   :  { %v2136_v45 = vmul.f32 %v2079_v40, %v4217_v61  ;;  %v2082_v62 = vmul.f32 %v2981_v35, %v4254_v57  ;;  %v2983_v2 = vpop.eup %2982  ;;  %vm2087_vm10 = vweird.f32 %v2981_v35  ;;  %v2108_v1 = vsub.f32 1.0, %v2107_v10 }
 0x587   :  { %v2046_v15 = vmul.f32 %v2977_v9, %v2045_v54  ;;  %v2105_v61 = vadd.f32 1.0, %v2983_v2  ;;  %v2985_v58 = vpop.eup %2984  ;;  %vm2088_vm14 = vmor %vm2086_vm11, %vm2087_vm10  ;;  %v385_v17 = vadd.f32 %v4485_v14, %v4466_v47  ;;  %v4487_v54 = vld [vmem:[#allocation55_spill] sm:$0xff]  ;;  %v4488_v2 = vld [vmem:[#allocation56_spill] sm:$0xff] }
 0x588   :  { %v4269_v18 = vadd.f32 %v2138_v42, %v2136_v45  ;;  %v2083_v23 = vsub.f32 1.0, %v2082_v62  ;;  %v2109_v28 = vmul.f32 %v4260_v22, %v2108_v1  ;;  %v4486_v42 = vld [vmem:[#allocation54_spill] sm:$0xff]  ;;  %v338_v62 = vadd.f32 %v4487_v54, %v3743_v24 }
 0x589   :  { %v2047_v51 = vadd.f32 %v2977_v9, %v2046_v15  ;;  %2986 = vrcp.f32 %v2105_v61  ;;  %v2132_v12 = vand.u32 2147483648, %v2105_v61  ;;  %v2130_v20 = vand.u32 2147483647, %v2105_v61 }
 0x58a   :  { %v2084_v39 = vmul.f32 %v2981_v35, %v2083_v23  ;;  %2988 = vtanh.f32 %v4269_v18  ;;  %v2110_v31 = vadd.f32 %v4260_v22, %v2109_v28  ;;  %vm2126_vm4 = vweird.f32 %v2105_v61 }
 0x58b   :  { %v2051_v50 = vsel %vm2050_vm12, %v2977_v9, %v2047_v51  ;;  %v2133_v7 = vor.u32 1.1754944e-38, %v2132_v12  ;;  %vm2131_vm7 = vcmp.eq.f32.partialorder %v2130_v20, 8.507059e+37  ;;  %v4484_v9 = vld [vmem:[#allocation51_spill] sm:$0xff]  ;;  %v483_v45 = vadd.f32 %v4486_v42, %v4468_v4 }
 0x58c   :  { %v2085_v34 = vadd.f32 %v2981_v35, %v2084_v39  ;;  %v2056_v25 = vsel %vm2053_vm13, %v2055_v32, %v2051_v50  ;;  %v2114_v41 = vsel %vm2113_vm3, %v4260_v22, %v2110_v31  ;;  %v336_v13 = vadd.f32 %v4484_v9, %v3743_v24 }
 0x58d   :  { %v2139_v6 = vmul.f32 %v2985_v58, %v2056_v25  ;;  %v387_v10 = vadd.f32 %v4488_v2, %v4466_v47  ;;  %v4489_v47 = vld [vmem:[#allocation58_spill] sm:$0xff]  ;;  %v4490_v25 = vld [vmem:[#allocation59_spill] sm:$0xff] }
 0x58e   :  { %v2089_v0 = vsel %vm2088_vm14, %v2981_v35, %v2085_v34  ;;  %v434_v58 = vadd.f32 %v4489_v47, %v4472_v11 }
 0x58f   :  { %v2094_v43 = vsel %vm2091_vm15, %v2093_v44, %v2089_v0  ;;  %v2987_v46 = vpop.eup %2986  ;;  %v485_v0 = vadd.f32 %v4490_v25, %v4468_v4 }
 0x590   :  { %v2137_v38 = vmul.f32 %v2094_v43, %v4225_v5  ;;  %v2122_v56 = vmul.f32 %v2987_v46, %v2105_v61  ;;  %v2115_v5 = vand.u32 2147483647, %v4249_v19  ;;  %vm2127_vm2 = vweird.f32 %v2987_v46  ;;  %v2989_v48 = vpop.eup %2988 }
 0x591   :  { %vm2128_vm5 = vmor %vm2126_vm4, %vm2127_vm2 }
 0x592   :  { %v4277_v53 = vadd.f32 %v2139_v6, %v2137_v38  ;;  %v2123_v57 = vsub.f32 1.0, %v2122_v56  ;;  %vm2116_vm6 = vcmp.eq.f32.partialorder %v2115_v5, 8.507059e+37  ;;  %v4491_v5 = vld [vmem:[#allocation61_spill] sm:$0xff] }
 0x593   :  { %v2119_v59 = vsel %vm2116_vm6, %v2118_v49, %v2114_v41 }
 0x594   :  { %2990 = vtanh.f32 %v4277_v53  ;;  %v2124_v21 = vmul.f32 %v2987_v46, %v2123_v57  ;;  %v2144_v63 = vmul.f32 %v2989_v48, %v2119_v59 }
 0x596   :  { %v2125_v37 = vadd.f32 %v2987_v46, %v2124_v21  ;;  %v436_v21 = vadd.f32 %v4491_v5, %v4472_v11 }
 0x598   :  { %v2129_v55 = vsel %vm2128_vm5, %v2987_v46, %v2125_v37 }
 0x599   :  { %v2134_v60 = vsel %vm2131_vm7, %v2133_v7, %v2129_v55 }
 0x59a   :  { %v2991_v52 = vpop.eup %2990 }
 0x59b   :  { %v2145_v19 = vmul.f32 %v2991_v52, %v2134_v60 }
 0x59d   :  { %v2155_v3 = vpack.c.bf16 %v2145_v19, %v2144_v63 }
 0x59f   :  { %2164 = vmatmul.bf16.vlgmr.msra.gmra.mxu0 %v2155_v3  ;;  %2178 = vmatmul.bf16.vlgmr.msra.gmra.mxu1 %v2155_v3 }
 0x5a0   :  { %2192 = vmatmul.bf16.vlgmr.msra.gmra.mxu2 %v2155_v3  ;;  %2206 = vmatmul.bf16.vlgmr.msra.gmra.mxu3 %v2155_v3 }
 0x61c   :  { %v2165_v22 = vpop.f32.mrf.mxu0  ;;  %v2179_v26 = vpop.f32.mrf.mxu1 }
 0x61d   :  { %v2212_v27 = vadd.f32 %v2165_v22, %v336_v13  ;;  %v2213_v30 = vadd.f32 %v2179_v26, %v385_v17 }
 0x61f   :  { %v2689_v35 = vmul.f32 -1.442695, %v2212_v27  ;;  %v2691_v40 = vmul.f32 -1.442695, %v2213_v30 }
 0x621   :  { %2992 = vpow2.f32 %v2689_v35 }
 0x622   :  { %2994 = vpow2.f32 %v2691_v40 }
 0x623   :  { %v2207_v29 = vpop.f32.mrf.mxu3  ;;  %v2193_v24 = vpop.f32.mrf.mxu2 }
 0x624   :  { %v2215_v16 = vadd.f32 %v2207_v29, %v483_v45  ;;  %v2167_v23 = vpop.f32.mrf.mxu0  ;;  %v2181_v15 = vpop.f32.mrf.mxu1  ;;  %v2214_v43 = vadd.f32 %v2193_v24, %v434_v58 }
 0x625   :  { %v2216_v36 = vadd.f32 %v2167_v23, %v338_v62  ;;  %v2217_v61 = vadd.f32 %v2181_v15, %v387_v10 }
 0x626   :  { %v2693_v39 = vmul.f32 -1.442695, %v2215_v16 }
 0x627   :  { %v2993_v51 = vpop.eup %2992  ;;  %v2690_v8 = vmul.f32 -1.442695, %v2216_v36  ;;  %v2692_v50 = vmul.f32 -1.442695, %v2217_v61 }
 0x628   :  { %v2995_v32 = vpop.eup %2994  ;;  %v2226_v1 = vadd.f32 1.0, %v2993_v51  ;;  %2996 = vpow2.f32 %v2693_v39 }
 0x629   :  { %v2264_v34 = vadd.f32 1.0, %v2995_v32  ;;  %2998 = vpow2.f32 %v2690_v8 }
 0x62a   :  { %3000 = vrcp.f32 %v2226_v1  ;;  %v2237_v7 = vand.u32 2147483647, %v2226_v1  ;;  %v2239_v52 = vand.u32 2147483648, %v2226_v1  ;;  %vm2233_vm10 = vweird.f32 %v2226_v1 }
 0x62b   :  { %3002 = vrcp.f32 %v2264_v34  ;;  %v2209_v44 = vpop.f32.mrf.mxu3  ;;  %v2277_v49 = vand.u32 2147483648, %v2264_v34  ;;  %v2195_v55 = vpop.f32.mrf.mxu2  ;;  %v2275_v60 = vand.u32 2147483647, %v2264_v34  ;;  %vm2271_vm11 = vweird.f32 %v2264_v34 }
 0x62c   :  { %3004 = vpow2.f32 %v2692_v50  ;;  %v2219_v46 = vadd.f32 %v2209_v44, %v485_v0  ;;  %v2218_v3 = vadd.f32 %v2195_v55, %v436_v21  ;;  %v2240_v13 = vor.u32 1.1754944e-38, %v2239_v52 }
 0x62d   :  { %v2278_v26 = vor.u32 1.1754944e-38, %v2277_v49  ;;  %vm2238_vm14 = vcmp.eq.f32.partialorder %v2237_v7, 8.507059e+37  ;;  %vm2276_vm15 = vcmp.eq.f32.partialorder %v2275_v60, 8.507059e+37 }
 0x62e   :  { %v2997_v6 = vpop.eup %2996  ;;  %v2694_v41 = vmul.f32 -1.442695, %v2219_v46 }
 0x62f   :  { %v2999_v28 = vpop.eup %2998  ;;  %v4301_v38 = vadd.f32 1.0, %v2997_v6 }
 0x630   :  { %v3001_v56 = vpop.eup %3000  ;;  %v4303_v31 = vadd.f32 1.0, %v2999_v28 }
 0x631   :  { %v3003_v57 = vpop.eup %3002  ;;  %v2229_v33 = vmul.f32 %v3001_v56, %v2226_v1  ;;  %3006 = vrcp.f32 %v4301_v38  ;;  %vm2234_vm8 = vweird.f32 %v3001_v56  ;;  %v2317_v2 = vand.u32 2147483648, %v4301_v38 }
 0x632   :  { %v3005_v12 = vpop.eup %3004  ;;  %v2267_v20 = vmul.f32 %v3003_v57, %v2264_v34  ;;  %3008 = vtanh.f32 %v2214_v43  ;;  %vm2272_vm9 = vweird.f32 %v3003_v57  ;;  %vm2235_vm12 = vmor %vm2233_vm10, %vm2234_vm8  ;;  %vm2248_vm0 = vweird.f32 %v4303_v31 }
 0x633   :  { %v2230_v4 = vsub.f32 1.0, %v2229_v33  ;;  %3010 = vrcp.f32 %v4303_v31  ;;  %v4309_v37 = vadd.f32 1.0, %v3005_v12  ;;  %vm2273_vm13 = vmor %vm2271_vm11, %vm2272_vm9  ;;  %v2252_v61 = vand.u32 2147483647, %v4303_v31 }
 0x634   :  { %v2268_v48 = vsub.f32 1.0, %v2267_v20  ;;  %v2254_v39 = vand.u32 2147483648, %v4303_v31  ;;  %vm2311_vm4 = vweird.f32 %v4301_v38  ;;  %v2315_v58 = vand.u32 2147483647, %v4301_v38 }
 0x635   :  { %v2231_v59 = vmul.f32 %v3001_v56, %v2230_v4  ;;  %3012 = vrcp.f32 %v4309_v37  ;;  %v2292_v36 = vand.u32 2147483648, %v4309_v37  ;;  %v2290_v1 = vand.u32 2147483647, %v4309_v37 }
 0x636   :  { %v2269_v63 = vmul.f32 %v3003_v57, %v2268_v48  ;;  %3014 = vpow2.f32 %v2694_v41  ;;  %v2255_v44 = vor.u32 1.1754944e-38, %v2254_v39  ;;  %vm2286_vm7 = vweird.f32 %v4309_v37 }
 0x637   :  { %v4312_v11 = vpop.eup %3006  ;;  %v2232_v19 = vadd.f32 %v3001_v56, %v2231_v59  ;;  %3016 = vtanh.f32 %v2218_v3  ;;  %vm2253_vm8 = vcmp.eq.f32.partialorder %v2252_v61, 8.507059e+37  ;;  %v2293_v28 = vor.u32 1.1754944e-38, %v2292_v36 }
 0x638   :  { %v3009_v9 = vpop.eup %3008  ;;  %v2270_v14 = vadd.f32 %v3003_v57, %v2269_v63  ;;  %v2307_v17 = vmul.f32 %v4312_v11, %v4301_v38  ;;  %vm2312_vm2 = vweird.f32 %v4312_v11  ;;  %v2318_v46 = vor.u32 1.1754944e-38, %v2317_v2 }
 0x639   :  { %v3011_v22 = vpop.eup %3010  ;;  %v2236_v27 = vsel %vm2235_vm12, %v3001_v56, %v2232_v19  ;;  %vm4332_vm6 = vmor %vm2311_vm4, %vm2312_vm2  ;;  %vm2291_vm10 = vcmp.eq.f32.partialorder %v2290_v1, 8.507059e+37  ;;  %vm2316_vm11 = vcmp.eq.f32.partialorder %v2315_v58, 8.507059e+37 }
 0x63a   :  { %v2241_v30 = vsel %vm2238_vm14, %v2240_v13, %v2236_v27  ;;  %v2274_v35 = vsel %vm2273_vm13, %v3003_v57, %v2270_v14  ;;  %v2308_v40 = vsub.f32 1.0, %v2307_v17  ;;  %v2244_v42 = vmul.f32 %v3011_v22, %v4303_v31 }
 0x63b   :  { %v3013_v45 = vpop.eup %3012  ;;  %v2279_v54 = vsel %vm2276_vm15, %v2278_v26, %v2274_v35  ;;  %v2338_v62 = vmul.f32 %v3009_v9, %v2241_v30  ;;  %vm2249_vm1 = vweird.f32 %v3011_v22 }
 0x63c   :  { %v2336_v10 = vmul.f32 %v2279_v54, %v4269_v18  ;;  %v2309_v29 = vmul.f32 %v4312_v11, %v2308_v40  ;;  %v2245_v16 = vsub.f32 1.0, %v2244_v42  ;;  %v2282_v23 = vmul.f32 %v3013_v45, %v4309_v37  ;;  %v3015_v15 = vpop.eup %3014  ;;  %vm2250_vm5 = vmor %vm2248_vm0, %vm2249_vm1 }
 0x63d   :  { %v2305_v50 = vadd.f32 1.0, %v3015_v15  ;;  %vm2287_vm3 = vweird.f32 %v3013_v45  ;;  %v3017_v47 = vpop.eup %3016 }
 0x63e   :  { %v2340_v51 = vadd.f32 %v2338_v62, %v2336_v10  ;;  %v2283_v8 = vsub.f32 1.0, %v2282_v23  ;;  %v2246_v32 = vmul.f32 %v3011_v22, %v2245_v16  ;;  %v2310_v18 = vadd.f32 %v4312_v11, %v2309_v29  ;;  %vm2288_vm9 = vmor %vm2286_vm7, %vm2287_vm3 }
 0x63f   :  { %v2332_v48 = vand.u32 2147483648, %v2305_v50  ;;  %v2330_v7 = vand.u32 2147483647, %v2305_v50  ;;  %vm2326_vm13 = vweird.f32 %v2305_v50 }
 0x640   :  { %3018 = vtanh.f32 %v2340_v51  ;;  %v2284_v34 = vmul.f32 %v3013_v45, %v2283_v8  ;;  %v2247_v24 = vadd.f32 %v3011_v22, %v2246_v32  ;;  %v2314_v43 = vsel %vm4332_vm6, %v4312_v11, %v2310_v18 }
 0x641   :  { %3020 = vrcp.f32 %v2305_v50  ;;  %v2319_v12 = vsel %vm2316_vm11, %v2318_v46, %v2314_v43  ;;  %v2333_v55 = vor.u32 1.1754944e-38, %v2332_v48  ;;  %vm2331_vm15 = vcmp.eq.f32.partialorder %v2330_v7, 8.507059e+37 }
 0x642   :  { %v2251_v0 = vsel %vm2250_vm5, %v3011_v22, %v2247_v24  ;;  %v2285_v6 = vadd.f32 %v3013_v45, %v2284_v34 }
 0x643   :  { %v2256_v38 = vsel %vm2253_vm8, %v2255_v44, %v2251_v0 }
 0x644   :  { %v2289_v56 = vsel %vm2288_vm9, %v3013_v45, %v2285_v6  ;;  %v2339_v31 = vmul.f32 %v3017_v47, %v2256_v38 }
 0x645   :  { %v2294_v57 = vsel %vm2291_vm10, %v2293_v28, %v2289_v56 }
 0x646   :  { %v3019_v33 = vpop.eup %3018  ;;  %v2337_v5 = vmul.f32 %v2294_v57, %v4277_v53 }
 0x647   :  { %v3021_v21 = vpop.eup %3020  ;;  %v2344_v20 = vmul.f32 %v3019_v33, %v2319_v12 }
 0x648   :  { %v2341_v4 = vadd.f32 %v2339_v31, %v2337_v5  ;;  %v2322_v37 = vmul.f32 %v3021_v21, %v2305_v50  ;;  %vm2327_vm12 = vweird.f32 %v3021_v21 }
 0x649   :  { %2353 = vst [vmem:[%s4351_s4] sm:$0xff] %v2344_v20  ;;  %vm2328_vm14 = vmor %vm2326_vm13, %vm2327_vm12 }
 0x64a   :  { %3022 = vtanh.f32 %v2341_v4  ;;  %v2323_v41 = vsub.f32 1.0, %v2322_v37 }
 0x64c   :  { %v2324_v49 = vmul.f32 %v3021_v21, %v2323_v41 }
 0x64e   :  { %v2325_v52 = vadd.f32 %v3021_v21, %v2324_v49 }
 0x650   :  { %v3023_v59 = vpop.eup %3022  ;;  %v2329_v53 = vsel %vm2328_vm14, %v3021_v21, %v2325_v52 }
 0x651   :  { %v2334_v60 = vsel %vm2331_vm15, %v2333_v55, %v2329_v53 }
 0x652   :  { %v2345_v63 = vmul.f32 %v3023_v59, %v2334_v60 }
 0x654   :  { %2354 = vst [vmem:[%s4351_s4 + $0x8] sm:$0xff] %v2345_v63 }

</bundles_post_ra>
